<compile_context>
chip_gen: v7x
topology: tpu7x:2x2x1
jax: 0.10.0
libtpu: 0.0.40
codegen_flags: <defaults>
</compile_context>

<pallas_src>
import functools

import jax
import jax.numpy as jnp
from jax import lax
from jax.experimental import pallas as pl
from jax.experimental.pallas import tpu as pltpu


# ----------------------------------------------------------------------------
# Fused bidirectional LSTM recurrence kernel (one layer, both directions).
# Grid axis = time chunk (sequential).  Forward consumes chunk c; backward
# consumes chunk nc-1-c (mirrored via its BlockSpec index_map).
# ----------------------------------------------------------------------------
def _bilstm_chunk_kernel(gxf_ref, gxb_ref, whf_ref, whb_ref, len_ref,
                         outf_ref, outb_ref,
                         hf_sc, cf_sc, hb_sc, cb_sc):
    c = pl.program_id(0)
    nc = pl.num_programs(0)
    Tc = gxf_ref.shape[0]
    H = whf_ref.shape[0]

    @pl.when(c == 0)
    def _():
        hf_sc[...] = jnp.zeros_like(hf_sc)
        cf_sc[...] = jnp.zeros_like(cf_sc)
        hb_sc[...] = jnp.zeros_like(hb_sc)
        cb_sc[...] = jnp.zeros_like(cb_sc)

    # Hoisted out of the unrolled step loop: weights + lengths stay in vregs.
    w_f = whf_ref[...]
    w_b = whb_ref[...]
    lens = len_ref[...]                          # (B, 1) int32

    def cell(gx, h, c_state, w_hh):
        # gx already contains x @ W_ih + b (precomputed outside the recurrence).
        # Gate order (i, f, o, g): one sigmoid over a contiguous (B, 3H) slab.
        gates = gx + jnp.dot(h, w_hh, preferred_element_type=jnp.float32)
        sig = jax.nn.sigmoid(gates[:, :3 * H])
        i_g = sig[:, 0 * H:1 * H]
        f_g = sig[:, 1 * H:2 * H]
        o_g = sig[:, 2 * H:3 * H]
        g_g = jnp.tanh(gates[:, 3 * H:])
        c_new = f_g * c_state + i_g * g_g
        h_new = o_g * jnp.tanh(c_new)
        return h_new, c_new

    def step(i, carry):
        # ---- forward direction: global time t = c*Tc + i --------------------
        t_f = c * Tc + i
        valid_f = t_f < lens                                    # (B, 1) bool
        h_new, c_new = cell(gxf_ref[i], hf_sc[...], cf_sc[...], w_f)
        h_sel = jnp.where(valid_f, h_new, hf_sc[...])
        hf_sc[...] = h_sel
        cf_sc[...] = jnp.where(valid_f, c_new, cf_sc[...])
        outf_ref[i] = jnp.where(valid_f, h_sel, 0.0).astype(outf_ref.dtype)

        # ---- backward direction: this block is time chunk nc-1-c ------------
        j = Tc - 1 - i
        t_b = (nc - 1 - c) * Tc + j
        valid_b = t_b < lens
        h_new, c_new = cell(gxb_ref[j], hb_sc[...], cb_sc[...], w_b)
        h_sel = jnp.where(valid_b, h_new, hb_sc[...])
        hb_sc[...] = h_sel
        cb_sc[...] = jnp.where(valid_b, c_new, cb_sc[...])
        outb_ref[j] = jnp.where(valid_b, h_sel, 0.0).astype(outb_ref.dtype)
        return carry

    lax.fori_loop(0, Tc, step, 0, unroll=True)


def _pick_time_chunk(T, cap=64):
    """Largest divisor of T that is <= cap (amortizes per-grid-step overhead)."""
    tc = min(T, cap)
    while T % tc:
        tc -= 1
    return tc


def bilstm_layer_recurrence(gx_f, gx_b, w_hh_f, w_hh_b, len_col, time_chunk=None):
    """Fused bidirectional recurrence for one layer.

    gx_f, gx_b: [T, B, 4H] precomputed input pre-activations (time-major).
    w_hh_f, w_hh_b: [H, 4H].  len_col: [B, 1] int32.
    Returns (out_fwd, out_bwd), each [T, B, H] time-major, zero on padded frames.
    """
    T, B, G = gx_f.shape
    H = w_hh_f.shape[0]
    Tc = time_chunk or _pick_time_chunk(T)
    nc = T // Tc

    out_f, out_b = pl.pallas_call(
        _bilstm_chunk_kernel,
        out_shape=(jax.ShapeDtypeStruct((T, B, H), jnp.float32),
                   jax.ShapeDtypeStruct((T, B, H), jnp.float32)),
        grid_spec=pltpu.PrefetchScalarGridSpec(
            num_scalar_prefetch=0,
            grid=(nc,),
            in_specs=[
                pl.BlockSpec((Tc, B, G), lambda c: (c, 0, 0)),            # fwd gates
                pl.BlockSpec((Tc, B, G), lambda c: (nc - 1 - c, 0, 0)),   # bwd gates (mirrored)
                pl.BlockSpec((H, G), lambda c: (0, 0)),                   # W_hh fwd (resident)
                pl.BlockSpec((H, G), lambda c: (0, 0)),                   # W_hh bwd (resident)
                pl.BlockSpec((B, 1), lambda c: (0, 0)),                   # seq_len (resident)
            ],
            out_specs=(
                pl.BlockSpec((Tc, B, H), lambda c: (c, 0, 0)),            # fwd outputs
                pl.BlockSpec((Tc, B, H), lambda c: (nc - 1 - c, 0, 0)),   # bwd outputs
            ),
            scratch_shapes=[pltpu.VMEM((B, H), jnp.float32) for _ in range(4)],
        ),
        compiler_params=pltpu.CompilerParams(
            dimension_semantics=("arbitrary",)),   # recurrence -> strictly sequential
    )(gx_f, gx_b, w_hh_f, w_hh_b, len_col)
    return out_f, out_b


# ----------------------------------------------------------------------------
# Hoisted input projection (one big matmul over all T frames, both directions
# of the previous layer consumed without materializing their concat).
# ----------------------------------------------------------------------------
def _input_projection(parts, w_ih, bias):
    """sum_i parts[i] @ w_ih[rows_i] + bias over all T frames.  -> [T, B, 4H]"""
    T, B = parts[0].shape[0], parts[0].shape[1]
    total = None
    off = 0
    for p in parts:
        d = p.shape[-1]
        contrib = jnp.dot(p.reshape(T * B, d), w_ih[off:off + d],
                          precision=lax.Precision.HIGHEST)
        total = contrib if total is None else total + contrib
        off += d
    total = total + bias
    return total.reshape(T, B, -1)


def _reorder_gates_ifog(w):
    """Reorder last-axis gate blocks from PyTorch's (i,f,g,o) to (i,f,o,g)."""
    i, f, g, o = jnp.split(w, 4, axis=-1)
    return jnp.concatenate([i, f, o, g], axis=-1)


def _prep_dir_params(p):
    w_ih, w_hh, bias = p
    return (_reorder_gates_ifog(w_ih), _reorder_gates_ifog(w_hh),
            _reorder_gates_ifog(bias))


# ----------------------------------------------------------------------------
# BlstmEncoderV1 forward (eval semantics)
# ----------------------------------------------------------------------------
def blstm_encoder_v1(x, seq_len, params):
    """x: [B, T, input_dim], seq_len: [B] -> [B, T, 2*hidden_dim].

    Frames with t >= seq_len[b] are zero (pad_packed_sequence, padding_value=0.0).
    NOTE: PyTorch returns T_out = max(seq_len); here max(seq_len) == T.
    """
    B, T, _ = x.shape
    x_tbf = jnp.transpose(x.astype(jnp.float32), (1, 0, 2))    # time-major, once
    len_col = seq_len.astype(jnp.int32).reshape(B, 1)

    parts = (x_tbf,)
    for fwd_p, bwd_p in params:
        w_ih_f, w_hh_f, b_f = _prep_dir_params(fwd_p)
        w_ih_b, w_hh_b, b_b = _prep_dir_params(bwd_p)
        gx_f = _input_projection(parts, w_ih_f, b_f)
        gx_b = _input_projection(parts, w_ih_b, b_b)
        parts = bilstm_layer_recurrence(gx_f, gx_b, w_hh_f, w_hh_b, len_col)
        # TODO(synk): nn.LSTM inter-layer dropout is training-mode only; eval
        # semantics (identity) are implemented here.
    out_tbf = jnp.concatenate(parts, axis=-1)                   # [T, B, 2H], once
    return jnp.transpose(out_tbf, (1, 0, 2))                    # back to batch-first


# ----------------------------------------------------------------------------
# Pure-JAX reference (lax.scan, PyTorch gate order) for correctness checking
# ----------------------------------------------------------------------------
def _lstm_scan_ref(x_btf, w_ih, w_hh, bias):
    B = x_btf.shape[0]
    H = w_hh.shape[0]

    def step(carry, x_t):
        h, c = carry
        gates = (jnp.dot(x_t, w_ih, precision=lax.Precision.HIGHEST)
                 + jnp.dot(h, w_hh, precision=lax.Precision.HIGHEST) + bias)
        i = jax.nn.sigmoid(gates[:, :H])
        f = jax.nn.sigmoid(gates[:, H:2 * H])
        g = jnp.tanh(gates[:, 2 * H:3 * H])
        o = jax.nn.sigmoid(gates[:, 3 * H:])
        c = f * c + i * g
        h = o * jnp.tanh(c)
        return (h, c), h

    init = (jnp.zeros((B, H), jnp.float32), jnp.zeros((B, H), jnp.float32))
    _, hs = lax.scan(step, init, jnp.transpose(x_btf, (1, 0, 2)))
    return jnp.transpose(hs, (1, 0, 2))


def _reverse_padded(x, seq_len):
    B, T, _ = x.shape
    t_idx = jnp.arange(T)[None, :]
    rev_idx = seq_len[:, None] - 1 - t_idx
    valid = rev_idx >= 0
    rev_idx = jnp.where(valid, rev_idx, 0)
    gathered = jnp.take_along_axis(x, rev_idx[:, :, None], axis=1)
    return jnp.where(valid[:, :, None], gathered, 0.0)


def blstm_encoder_ref(x, seq_len, params):
    """Packed-sequence BLSTM reference built from lax.scan + explicit reversal."""
    B, T, _ = x.shape
    mask = (jnp.arange(T)[None, :] < seq_len[:, None])[:, :, None]
    layer_in = jnp.where(mask, x.astype(jnp.float32), 0.0)
    for fwd_p, bwd_p in params:
        h_f = _lstm_scan_ref(layer_in, *fwd_p)
        h_b = _reverse_padded(
            _lstm_scan_ref(_reverse_padded(layer_in, seq_len), *bwd_p), seq_len)
        layer_in = jnp.where(mask, jnp.concatenate([h_f, h_b], axis=-1), 0.0)
    return layer_in


# ----------------------------------------------------------------------------
# Deterministic parameter init (shapes per nn.LSTM(bidirectional, num_layers),
# stored transposed as [D, 4H] / [H, 4H], PyTorch gate order i,f,g,o).
# ----------------------------------------------------------------------------
def init_params(key, num_layers, input_dim, hidden_dim):
    stdv = 1.0 / jnp.sqrt(hidden_dim)
    params = []
    for layer in range(num_layers):
        in_dim = input_dim if layer == 0 else 2 * hidden_dim
        dir_params = []
        for _ in range(2):  # forward, backward
            key, k1, k2, k3, k4 = jax.random.split(key, 5)
            w_ih = jax.random.uniform(k1, (in_dim, 4 * hidden_dim),
                                      jnp.float32, -stdv, stdv)
            w_hh = jax.random.uniform(k2, (hidden_dim, 4 * hidden_dim),
                                      jnp.float32, -stdv, stdv)
            b_ih = jax.random.uniform(k3, (4 * hidden_dim,), jnp.float32, -stdv, stdv)
            b_hh = jax.random.uniform(k4, (4 * hidden_dim,), jnp.float32, -stdv, stdv)
            bias = (b_ih + b_hh).reshape(1, 4 * hidden_dim)
            dir_params.append((w_ih, w_hh, bias))
        params.append(tuple(dir_params))
    return params


if __name__ == "__main__":
    # Config: num_layers=2, input_dim=16, hidden_dim=32, dropout=0.0, enforce_sorted=False
    num_layers, input_dim, hidden_dim = 2, 16, 32
    B, T = 2, 8

    key = jax.random.PRNGKey(0)
    key, kx = jax.random.split(key)
    x = jax.random.normal(kx, (B, T, input_dim), jnp.float32)
    seq_len = jnp.array([8, 5], dtype=jnp.int32)   # max(seq_len) == T

    params = init_params(key, num_layers, input_dim, hidden_dim)

    fwd = jax.jit(functools.partial(blstm_encoder_v1, params=params))
    out = jax.block_until_ready(fwd(x, seq_len))
    assert out.shape == (B, T, 2 * hidden_dim)

    # correctness vs pure-JAX packed-sequence reference (tight f32 tolerance)
    ref = blstm_encoder_ref(x, seq_len, params)
    max_err = float(jnp.max(jnp.abs(out - ref)))
    assert jnp.allclose(out, ref, atol=1e-4, rtol=1e-4), max_err

    print("KERNEL_OK")
</pallas_src>

<mosaic_0001>
module attributes {stable_mosaic.version = 11 : i64} {
  func.func @_bilstm_chunk_kernel(%arg0: i32, %arg1: memref<8x2x128xf32, #tpu.memory_space<vmem>>, %arg2: memref<8x2x128xf32, #tpu.memory_space<vmem>>, %arg3: memref<32x128xf32, #tpu.memory_space<vmem>>, %arg4: memref<32x128xf32, #tpu.memory_space<vmem>>, %arg5: memref<2x1xi32, #tpu.memory_space<vmem>>, %arg6: memref<8x2x32xf32, #tpu.memory_space<vmem>>, %arg7: memref<8x2x32xf32, #tpu.memory_space<vmem>>, %arg8: memref<2x32xf32, #tpu.memory_space<vmem>>, %arg9: memref<2x32xf32, #tpu.memory_space<vmem>>, %arg10: memref<2x32xf32, #tpu.memory_space<vmem>>, %arg11: memref<2x32xf32, #tpu.memory_space<vmem>>) attributes {dimension_semantics = [#tpu.dimension_semantics<arbitrary>], iteration_bounds = array<i64: 1>, scalar_prefetch = 0 : i64, scratch_operands = 4 : i64, tpu.core_type = #tpu.core_type<tc>, window_params = [{transform_indices = @transform_0, window_bounds = array<i64: 8, 2, 128>}, {transform_indices = @transform_1, window_bounds = array<i64: 8, 2, 128>}, {pipeline_mode = #tpu.pipeline_mode<synchronous>, transform_indices = @transform_2, window_bounds = array<i64: 32, 128>}, {pipeline_mode = #tpu.pipeline_mode<synchronous>, transform_indices = @transform_3, window_bounds = array<i64: 32, 128>}, {pipeline_mode = #tpu.pipeline_mode<synchronous>, transform_indices = @transform_4, window_bounds = array<i64: 2, 1>}, {transform_indices = @transform_5, window_bounds = array<i64: 8, 2, 32>}, {transform_indices = @transform_6, window_bounds = array<i64: 8, 2, 32>}]} {
    %c0_i32 = arith.constant 0 : i32
    %0 = arith.cmpi eq, %arg0, %c0_i32 : i32
    %1 = arith.extui %0 : i1 to i32
    %c0_i32_0 = arith.constant 0 : i32
    %2 = arith.cmpi ne, %1, %c0_i32_0 : i32
    scf.if %2 {
      %cst_342 = arith.constant 0.000000e+00 : f32
      %742 = vector.broadcast %cst_342 : f32 to vector<2x32xf32>
      %c0_343 = arith.constant 0 : index
      %c0_344 = arith.constant 0 : index
      %743 = vector.load %arg8[%c0_343, %c0_344] : memref<2x32xf32, #tpu.memory_space<vmem>>, vector<2x32xf32>
      tpu.vector_store %arg8[%c0_343, %c0_344], %742 {strides = array<i32>} : memref<2x32xf32, #tpu.memory_space<vmem>>, vector<2x32xf32>,
      %cst_345 = arith.constant 0.000000e+00 : f32
      %744 = vector.broadcast %cst_345 : f32 to vector<2x32xf32>
      %c0_346 = arith.constant 0 : index
      %c0_347 = arith.constant 0 : index
      %745 = vector.load %arg9[%c0_346, %c0_347] : memref<2x32xf32, #tpu.memory_space<vmem>>, vector<2x32xf32>
      tpu.vector_store %arg9[%c0_346, %c0_347], %744 {strides = array<i32>} : memref<2x32xf32, #tpu.memory_space<vmem>>, vector<2x32xf32>,
      %cst_348 = arith.constant 0.000000e+00 : f32
      %746 = vector.broadcast %cst_348 : f32 to vector<2x32xf32>
      %c0_349 = arith.constant 0 : index
      %c0_350 = arith.constant 0 : index
      %747 = vector.load %arg10[%c0_349, %c0_350] : memref<2x32xf32, #tpu.memory_space<vmem>>, vector<2x32xf32>
      tpu.vector_store %arg10[%c0_349, %c0_350], %746 {strides = array<i32>} : memref<2x32xf32, #tpu.memory_space<vmem>>, vector<2x32xf32>,
      %cst_351 = arith.constant 0.000000e+00 : f32
      %748 = vector.broadcast %cst_351 : f32 to vector<2x32xf32>
      %c0_352 = arith.constant 0 : index
      %c0_353 = arith.constant 0 : index
      %749 = vector.load %arg11[%c0_352, %c0_353] : memref<2x32xf32, #tpu.memory_space<vmem>>, vector<2x32xf32>
      tpu.vector_store %arg11[%c0_352, %c0_353], %748 {strides = array<i32>} : memref<2x32xf32, #tpu.memory_space<vmem>>, vector<2x32xf32>,
    } else {
    }
    %c0 = arith.constant 0 : index
    %c0_1 = arith.constant 0 : index
    %3 = vector.load %arg3[%c0, %c0_1] : memref<32x128xf32, #tpu.memory_space<vmem>>, vector<32x128xf32>
    %c0_2 = arith.constant 0 : index
    %c0_3 = arith.constant 0 : index
    %4 = vector.load %arg4[%c0_2, %c0_3] : memref<32x128xf32, #tpu.memory_space<vmem>>, vector<32x128xf32>
    %c0_4 = arith.constant 0 : index
    %c0_5 = arith.constant 0 : index
    %5 = vector.load %arg5[%c0_4, %c0_5] : memref<2x1xi32, #tpu.memory_space<vmem>>, vector<2x1xi32>
    %c0_i32_6 = arith.constant 0 : i32
    %c8_i32 = arith.constant 8 : i32
    %6 = arith.muli %arg0, %c8_i32 : i32
    %7 = arith.addi %6, %c0_i32_6 : i32
    %8 = vector.broadcast %7 : i32 to vector<2x1xi32>
    %9 = arith.cmpi slt, %8, %5 : vector<2x1xi32>
    %10 = arith.index_cast %c0_i32_6 : i32 to index
    %c0_7 = arith.constant 0 : index
    %c0_8 = arith.constant 0 : index
    %11 = vector.load %arg1[%10, %c0_7, %c0_8] : memref<8x2x128xf32, #tpu.memory_space<vmem>>, vector<1x2x128xf32>
    %12 = vector.shape_cast %11 : vector<1x2x128xf32> to vector<2x128xf32>
    %c0_9 = arith.constant 0 : index
    %c0_10 = arith.constant 0 : index
    %13 = vector.load %arg8[%c0_9, %c0_10] : memref<2x32xf32, #tpu.memory_space<vmem>>, vector<2x32xf32>
    %c0_11 = arith.constant 0 : index
    %c0_12 = arith.constant 0 : index
    %14 = vector.load %arg9[%c0_11, %c0_12] : memref<2x32xf32, #tpu.memory_space<vmem>>, vector<2x32xf32>
    %cst = arith.constant dense<0.000000e+00> : vector<2x128xf32>
    %15 = tpu.matmul %13, %3, %cst {dimension_numbers = #tpu.dot_dimension_numbers<[1], [0], [0], [1], [0, 0, 1, 1], [], []>} : vector<2x32xf32>, vector<32x128xf32>, vector<2x128xf32> -> vector<2x128xf32>
    %16 = arith.addf %12, %15 : vector<2x128xf32>
    %17 = vector.extract_strided_slice %16 {offsets = [0, 0], sizes = [2, 96], strides = [1, 1]} : vector<2x128xf32> to vector<2x96xf32>
    %18 = arith.negf %17 : vector<2x96xf32>
    %19 = math.exp %18 : vector<2x96xf32>
    %cst_13 = arith.constant 1.000000e+00 : f32
    %20 = vector.broadcast %cst_13 : f32 to vector<2x96xf32>
    %21 = arith.addf %20, %19 : vector<2x96xf32>
    %22 = arith.divf %20, %21 : vector<2x96xf32>
    %23 = vector.extract_strided_slice %22 {offsets = [0, 0], sizes = [2, 32], strides = [1, 1]} : vector<2x96xf32> to vector<2x32xf32>
    %24 = vector.extract_strided_slice %22 {offsets = [0, 32], sizes = [2, 32], strides = [1, 1]} : vector<2x96xf32> to vector<2x32xf32>
    %25 = vector.extract_strided_slice %22 {offsets = [0, 64], sizes = [2, 32], strides = [1, 1]} : vector<2x96xf32> to vector<2x32xf32>
    %26 = vector.extract_strided_slice %16 {offsets = [0, 96], sizes = [2, 32], strides = [1, 1]} : vector<2x128xf32> to vector<2x32xf32>
    %27 = math.tanh %26 : vector<2x32xf32>
    %28 = arith.mulf %24, %14 : vector<2x32xf32>
    %29 = arith.mulf %23, %27 : vector<2x32xf32>
    %30 = arith.addf %28, %29 : vector<2x32xf32>
    %31 = math.tanh %30 : vector<2x32xf32>
    %32 = arith.mulf %25, %31 : vector<2x32xf32>
    %c0_14 = arith.constant 0 : index
    %c0_15 = arith.constant 0 : index
    %33 = vector.load %arg8[%c0_14, %c0_15] : memref<2x32xf32, #tpu.memory_space<vmem>>, vector<2x32xf32>
    %34 = vector.shape_cast %9 : vector<2x1xi1> to vector<2x1xi1>
    %35 = vector.broadcast %34 : vector<2x1xi1> to vector<2x32xi1>
    %36 = arith.select %35, %32, %33 : vector<2x32xi1>, vector<2x32xf32>
    %c0_16 = arith.constant 0 : index
    %c0_17 = arith.constant 0 : index
    %37 = vector.load %arg8[%c0_16, %c0_17] : memref<2x32xf32, #tpu.memory_space<vmem>>, vector<2x32xf32>
    tpu.vector_store %arg8[%c0_16, %c0_17], %36 {strides = array<i32>} : memref<2x32xf32, #tpu.memory_space<vmem>>, vector<2x32xf32>,
    %c0_18 = arith.constant 0 : index
    %c0_19 = arith.constant 0 : index
    %38 = vector.load %arg9[%c0_18, %c0_19] : memref<2x32xf32, #tpu.memory_space<vmem>>, vector<2x32xf32>
    %39 = vector.shape_cast %9 : vector<2x1xi1> to vector<2x1xi1>
    %40 = vector.broadcast %39 : vector<2x1xi1> to vector<2x32xi1>
    %41 = arith.select %40, %30, %38 : vector<2x32xi1>, vector<2x32xf32>
    %c0_20 = arith.constant 0 : index
    %c0_21 = arith.constant 0 : index
    %42 = vector.load %arg9[%c0_20, %c0_21] : memref<2x32xf32, #tpu.memory_space<vmem>>, vector<2x32xf32>
    tpu.vector_store %arg9[%c0_20, %c0_21], %41 {strides = array<i32>} : memref<2x32xf32, #tpu.memory_space<vmem>>, vector<2x32xf32>,
    %cst_22 = arith.constant 0.000000e+00 : f32
    %43 = vector.shape_cast %9 : vector<2x1xi1> to vector<2x1xi1>
    %44 = vector.broadcast %43 : vector<2x1xi1> to vector<2x32xi1>
    %45 = vector.broadcast %cst_22 : f32 to vector<2x32xf32>
    %46 = arith.select %44, %36, %45 : vector<2x32xi1>, vector<2x32xf32>
    %47 = arith.index_cast %c0_i32_6 : i32 to index
    %c0_23 = arith.constant 0 : index
    %c0_24 = arith.constant 0 : index
    %48 = vector.load %arg6[%47, %c0_23, %c0_24] : memref<8x2x32xf32, #tpu.memory_space<vmem>>, vector<1x2x32xf32>
    %49 = vector.shape_cast %48 : vector<1x2x32xf32> to vector<2x32xf32>
    %50 = vector.shape_cast %46 : vector<2x32xf32> to vector<1x2x32xf32>
    tpu.vector_store %arg6[%47, %c0_23, %c0_24], %50 {strides = array<i32>} : memref<8x2x32xf32, #tpu.memory_space<vmem>>, vector<1x2x32xf32>,
    %c7_i32 = arith.constant 7 : i32
    %51 = arith.subi %c7_i32, %c0_i32_6 : i32
    %c0_i32_25 = arith.constant 0 : i32
    %52 = arith.subi %c0_i32_25, %arg0 : i32
    %c8_i32_26 = arith.constant 8 : i32
    %53 = arith.muli %52, %c8_i32_26 : i32
    %54 = arith.addi %53, %51 : i32
    %55 = vector.broadcast %54 : i32 to vector<2x1xi32>
    %56 = arith.cmpi slt, %55, %5 : vector<2x1xi32>
    %57 = arith.index_cast %51 : i32 to index
    %c0_27 = arith.constant 0 : index
    %c0_28 = arith.constant 0 : index
    %58 = vector.load %arg2[%57, %c0_27, %c0_28] : memref<8x2x128xf32, #tpu.memory_space<vmem>>, vector<1x2x128xf32>
    %59 = vector.shape_cast %58 : vector<1x2x128xf32> to vector<2x128xf32>
    %c0_29 = arith.constant 0 : index
    %c0_30 = arith.constant 0 : index
    %60 = vector.load %arg10[%c0_29, %c0_30] : memref<2x32xf32, #tpu.memory_space<vmem>>, vector<2x32xf32>
    %c0_31 = arith.constant 0 : index
    %c0_32 = arith.constant 0 : index
    %61 = vector.load %arg11[%c0_31, %c0_32] : memref<2x32xf32, #tpu.memory_space<vmem>>, vector<2x32xf32>
    %cst_33 = arith.constant dense<0.000000e+00> : vector<2x128xf32>
    %62 = tpu.matmul %60, %4, %cst_33 {dimension_numbers = #tpu.dot_dimension_numbers<[1], [0], [0], [1], [0, 0, 1, 1], [], []>} : vector<2x32xf32>, vector<32x128xf32>, vector<2x128xf32> -> vector<2x128xf32>
    %63 = arith.addf %59, %62 : vector<2x128xf32>
    %64 = vector.extract_strided_slice %63 {offsets = [0, 0], sizes = [2, 96], strides = [1, 1]} : vector<2x128xf32> to vector<2x96xf32>
    %65 = arith.negf %64 : vector<2x96xf32>
    %66 = math.exp %65 : vector<2x96xf32>
    %cst_34 = arith.constant 1.000000e+00 : f32
    %67 = vector.broadcast %cst_34 : f32 to vector<2x96xf32>
    %68 = arith.addf %67, %66 : vector<2x96xf32>
    %69 = arith.divf %67, %68 : vector<2x96xf32>
    %70 = vector.extract_strided_slice %69 {offsets = [0, 0], sizes = [2, 32], strides = [1, 1]} : vector<2x96xf32> to vector<2x32xf32>
    %71 = vector.extract_strided_slice %69 {offsets = [0, 32], sizes = [2, 32], strides = [1, 1]} : vector<2x96xf32> to vector<2x32xf32>
    %72 = vector.extract_strided_slice %69 {offsets = [0, 64], sizes = [2, 32], strides = [1, 1]} : vector<2x96xf32> to vector<2x32xf32>
    %73 = vector.extract_strided_slice %63 {offsets = [0, 96], sizes = [2, 32], strides = [1, 1]} : vector<2x128xf32> to vector<2x32xf32>
    %74 = math.tanh %73 : vector<2x32xf32>
    %75 = arith.mulf %71, %61 : vector<2x32xf32>
    %76 = arith.mulf %70, %74 : vector<2x32xf32>
    %77 = arith.addf %75, %76 : vector<2x32xf32>
    %78 = math.tanh %77 : vector<2x32xf32>
    %79 = arith.mulf %72, %78 : vector<2x32xf32>
    %c0_35 = arith.constant 0 : index
    %c0_36 = arith.constant 0 : index
    %80 = vector.load %arg10[%c0_35, %c0_36] : memref<2x32xf32, #tpu.memory_space<vmem>>, vector<2x32xf32>
    %81 = vector.shape_cast %56 : vector<2x1xi1> to vector<2x1xi1>
    %82 = vector.broadcast %81 : vector<2x1xi1> to vector<2x32xi1>
    %83 = arith.select %82, %79, %80 : vector<2x32xi1>, vector<2x32xf32>
    %c0_37 = arith.constant 0 : index
    %c0_38 = arith.constant 0 : index
    %84 = vector.load %arg10[%c0_37, %c0_38] : memref<2x32xf32, #tpu.memory_space<vmem>>, vector<2x32xf32>
    tpu.vector_store %arg10[%c0_37, %c0_38], %83 {strides = array<i32>} : memref<2x32xf32, #tpu.memory_space<vmem>>, vector<2x32xf32>,
    %c0_39 = arith.constant 0 : index
    %c0_40 = arith.constant 0 : index
    %85 = vector.load %arg11[%c0_39, %c0_40] : memref<2x32xf32, #tpu.memory_space<vmem>>, vector<2x32xf32>
    %86 = vector.shape_cast %56 : vector<2x1xi1> to vector<2x1xi1>
    %87 = vector.broadcast %86 : vector<2x1xi1> to vector<2x32xi1>
    %88 = arith.select %87, %77, %85 : vector<2x32xi1>, vector<2x32xf32>
    %c0_41 = arith.constant 0 : index
    %c0_42 = arith.constant 0 : index
    %89 = vector.load %arg11[%c0_41, %c0_42] : memref<2x32xf32, #tpu.memory_space<vmem>>, vector<2x32xf32>
    tpu.vector_store %arg11[%c0_41, %c0_42], %88 {strides = array<i32>} : memref<2x32xf32, #tpu.memory_space<vmem>>, vector<2x32xf32>,
    %cst_43 = arith.constant 0.000000e+00 : f32
    %90 = vector.shape_cast %56 : vector<2x1xi1> to vector<2x1xi1>
    %91 = vector.broadcast %90 : vector<2x1xi1> to vector<2x32xi1>
    %92 = vector.broadcast %cst_43 : f32 to vector<2x32xf32>
    %93 = arith.select %91, %83, %92 : vector<2x32xi1>, vector<2x32xf32>
    %94 = arith.index_cast %51 : i32 to index
    %c0_44 = arith.constant 0 : index
    %c0_45 = arith.constant 0 : index
    %95 = vector.load %arg7[%94, %c0_44, %c0_45] : memref<8x2x32xf32, #tpu.memory_space<vmem>>, vector<1x2x32xf32>
    %96 = vector.shape_cast %95 : vector<1x2x32xf32> to vector<2x32xf32>
    %97 = vector.shape_cast %93 : vector<2x32xf32> to vector<1x2x32xf32>
    tpu.vector_store %arg7[%94, %c0_44, %c0_45], %97 {strides = array<i32>} : memref<8x2x32xf32, #tpu.memory_space<vmem>>, vector<1x2x32xf32>,
    %c1_i32 = arith.constant 1 : i32
    %c8_i32_46 = arith.constant 8 : i32
    %98 = arith.muli %arg0, %c8_i32_46 : i32
    %99 = arith.addi %98, %c1_i32 : i32
    %100 = vector.broadcast %99 : i32 to vector<2x1xi32>
    %101 = arith.cmpi slt, %100, %5 : vector<2x1xi32>
    %102 = arith.index_cast %c1_i32 : i32 to index
    %c0_47 = arith.constant 0 : index
    %c0_48 = arith.constant 0 : index
    %103 = vector.load %arg1[%102, %c0_47, %c0_48] : memref<8x2x128xf32, #tpu.memory_space<vmem>>, vector<1x2x128xf32>
    %104 = vector.shape_cast %103 : vector<1x2x128xf32> to vector<2x128xf32>
    %c0_49 = arith.constant 0 : index
    %c0_50 = arith.constant 0 : index
    %105 = vector.load %arg8[%c0_49, %c0_50] : memref<2x32xf32, #tpu.memory_space<vmem>>, vector<2x32xf32>
    %c0_51 = arith.constant 0 : index
    %c0_52 = arith.constant 0 : index
    %106 = vector.load %arg9[%c0_51, %c0_52] : memref<2x32xf32, #tpu.memory_space<vmem>>, vector<2x32xf32>
    %cst_53 = arith.constant dense<0.000000e+00> : vector<2x128xf32>
    %107 = tpu.matmul %105, %3, %cst_53 {dimension_numbers = #tpu.dot_dimension_numbers<[1], [0], [0], [1], [0, 0, 1, 1], [], []>} : vector<2x32xf32>, vector<32x128xf32>, vector<2x128xf32> -> vector<2x128xf32>
    %108 = arith.addf %104, %107 : vector<2x128xf32>
    %109 = vector.extract_strided_slice %108 {offsets = [0, 0], sizes = [2, 96], strides = [1, 1]} : vector<2x128xf32> to vector<2x96xf32>
    %110 = arith.negf %109 : vector<2x96xf32>
    %111 = math.exp %110 : vector<2x96xf32>
    %cst_54 = arith.constant 1.000000e+00 : f32
    %112 = vector.broadcast %cst_54 : f32 to vector<2x96xf32>
    %113 = arith.addf %112, %111 : vector<2x96xf32>
    %114 = arith.divf %112, %113 : vector<2x96xf32>
    %115 = vector.extract_strided_slice %114 {offsets = [0, 0], sizes = [2, 32], strides = [1, 1]} : vector<2x96xf32> to vector<2x32xf32>
    %116 = vector.extract_strided_slice %114 {offsets = [0, 32], sizes = [2, 32], strides = [1, 1]} : vector<2x96xf32> to vector<2x32xf32>
    %117 = vector.extract_strided_slice %114 {offsets = [0, 64], sizes = [2, 32], strides = [1, 1]} : vector<2x96xf32> to vector<2x32xf32>
    %118 = vector.extract_strided_slice %108 {offsets = [0, 96], sizes = [2, 32], strides = [1, 1]} : vector<2x128xf32> to vector<2x32xf32>
    %119 = math.tanh %118 : vector<2x32xf32>
    %120 = arith.mulf %116, %106 : vector<2x32xf32>
    %121 = arith.mulf %115, %119 : vector<2x32xf32>
    %122 = arith.addf %120, %121 : vector<2x32xf32>
    %123 = math.tanh %122 : vector<2x32xf32>
    %124 = arith.mulf %117, %123 : vector<2x32xf32>
    %c0_55 = arith.constant 0 : index
    %c0_56 = arith.constant 0 : index
    %125 = vector.load %arg8[%c0_55, %c0_56] : memref<2x32xf32, #tpu.memory_space<vmem>>, vector<2x32xf32>
    %126 = vector.shape_cast %101 : vector<2x1xi1> to vector<2x1xi1>
    %127 = vector.broadcast %126 : vector<2x1xi1> to vector<2x32xi1>
    %128 = arith.select %127, %124, %125 : vector<2x32xi1>, vector<2x32xf32>
    %c0_57 = arith.constant 0 : index
    %c0_58 = arith.constant 0 : index
    %129 = vector.load %arg8[%c0_57, %c0_58] : memref<2x32xf32, #tpu.memory_space<vmem>>, vector<2x32xf32>
    tpu.vector_store %arg8[%c0_57, %c0_58], %128 {strides = array<i32>} : memref<2x32xf32, #tpu.memory_space<vmem>>, vector<2x32xf32>,
    %c0_59 = arith.constant 0 : index
    %c0_60 = arith.constant 0 : index
    %130 = vector.load %arg9[%c0_59, %c0_60] : memref<2x32xf32, #tpu.memory_space<vmem>>, vector<2x32xf32>
    %131 = vector.shape_cast %101 : vector<2x1xi1> to vector<2x1xi1>
    %132 = vector.broadcast %131 : vector<2x1xi1> to vector<2x32xi1>
    %133 = arith.select %132, %122, %130 : vector<2x32xi1>, vector<2x32xf32>
    %c0_61 = arith.constant 0 : index
    %c0_62 = arith.constant 0 : index
    %134 = vector.load %arg9[%c0_61, %c0_62] : memref<2x32xf32, #tpu.memory_space<vmem>>, vector<2x32xf32>
    tpu.vector_store %arg9[%c0_61, %c0_62], %133 {strides = array<i32>} : memref<2x32xf32, #tpu.memory_space<vmem>>, vector<2x32xf32>,
    %cst_63 = arith.constant 0.000000e+00 : f32
    %135 = vector.shape_cast %101 : vector<2x1xi1> to vector<2x1xi1>
    %136 = vector.broadcast %135 : vector<2x1xi1> to vector<2x32xi1>
    %137 = vector.broadcast %cst_63 : f32 to vector<2x32xf32>
    %138 = arith.select %136, %128, %137 : vector<2x32xi1>, vector<2x32xf32>
    %139 = arith.index_cast %c1_i32 : i32 to index
    %c0_64 = arith.constant 0 : index
    %c0_65 = arith.constant 0 : index
    %140 = vector.load %arg6[%139, %c0_64, %c0_65] : memref<8x2x32xf32, #tpu.memory_space<vmem>>, vector<1x2x32xf32>
    %141 = vector.shape_cast %140 : vector<1x2x32xf32> to vector<2x32xf32>
    %142 = vector.shape_cast %138 : vector<2x32xf32> to vector<1x2x32xf32>
    tpu.vector_store %arg6[%139, %c0_64, %c0_65], %142 {strides = array<i32>} : memref<8x2x32xf32, #tpu.memory_space<vmem>>, vector<1x2x32xf32>,
    %c7_i32_66 = arith.constant 7 : i32
    %143 = arith.subi %c7_i32_66, %c1_i32 : i32
    %c0_i32_67 = arith.constant 0 : i32
    %144 = arith.subi %c0_i32_67, %arg0 : i32
    %c8_i32_68 = arith.constant 8 : i32
    %145 = arith.muli %144, %c8_i32_68 : i32
    %146 = arith.addi %145, %143 : i32
    %147 = vector.broadcast %146 : i32 to vector<2x1xi32>
    %148 = arith.cmpi slt, %147, %5 : vector<2x1xi32>
    %149 = arith.index_cast %143 : i32 to index
    %c0_69 = arith.constant 0 : index
    %c0_70 = arith.constant 0 : index
    %150 = vector.load %arg2[%149, %c0_69, %c0_70] : memref<8x2x128xf32, #tpu.memory_space<vmem>>, vector<1x2x128xf32>
    %151 = vector.shape_cast %150 : vector<1x2x128xf32> to vector<2x128xf32>
    %c0_71 = arith.constant 0 : index
    %c0_72 = arith.constant 0 : index
    %152 = vector.load %arg10[%c0_71, %c0_72] : memref<2x32xf32, #tpu.memory_space<vmem>>, vector<2x32xf32>
    %c0_73 = arith.constant 0 : index
    %c0_74 = arith.constant 0 : index
    %153 = vector.load %arg11[%c0_73, %c0_74] : memref<2x32xf32, #tpu.memory_space<vmem>>, vector<2x32xf32>
    %cst_75 = arith.constant dense<0.000000e+00> : vector<2x128xf32>
    %154 = tpu.matmul %152, %4, %cst_75 {dimension_numbers = #tpu.dot_dimension_numbers<[1], [0], [0], [1], [0, 0, 1, 1], [], []>} : vector<2x32xf32>, vector<32x128xf32>, vector<2x128xf32> -> vector<2x128xf32>
    %155 = arith.addf %151, %154 : vector<2x128xf32>
    %156 = vector.extract_strided_slice %155 {offsets = [0, 0], sizes = [2, 96], strides = [1, 1]} : vector<2x128xf32> to vector<2x96xf32>
    %157 = arith.negf %156 : vector<2x96xf32>
    %158 = math.exp %157 : vector<2x96xf32>
    %cst_76 = arith.constant 1.000000e+00 : f32
    %159 = vector.broadcast %cst_76 : f32 to vector<2x96xf32>
    %160 = arith.addf %159, %158 : vector<2x96xf32>
    %161 = arith.divf %159, %160 : vector<2x96xf32>
    %162 = vector.extract_strided_slice %161 {offsets = [0, 0], sizes = [2, 32], strides = [1, 1]} : vector<2x96xf32> to vector<2x32xf32>
    %163 = vector.extract_strided_slice %161 {offsets = [0, 32], sizes = [2, 32], strides = [1, 1]} : vector<2x96xf32> to vector<2x32xf32>
    %164 = vector.extract_strided_slice %161 {offsets = [0, 64], sizes = [2, 32], strides = [1, 1]} : vector<2x96xf32> to vector<2x32xf32>
    %165 = vector.extract_strided_slice %155 {offsets = [0, 96], sizes = [2, 32], strides = [1, 1]} : vector<2x128xf32> to vector<2x32xf32>
    %166 = math.tanh %165 : vector<2x32xf32>
    %167 = arith.mulf %163, %153 : vector<2x32xf32>
    %168 = arith.mulf %162, %166 : vector<2x32xf32>
    %169 = arith.addf %167, %168 : vector<2x32xf32>
    %170 = math.tanh %169 : vector<2x32xf32>
    %171 = arith.mulf %164, %170 : vector<2x32xf32>
    %c0_77 = arith.constant 0 : index
    %c0_78 = arith.constant 0 : index
    %172 = vector.load %arg10[%c0_77, %c0_78] : memref<2x32xf32, #tpu.memory_space<vmem>>, vector<2x32xf32>
    %173 = vector.shape_cast %148 : vector<2x1xi1> to vector<2x1xi1>
    %174 = vector.broadcast %173 : vector<2x1xi1> to vector<2x32xi1>
    %175 = arith.select %174, %171, %172 : vector<2x32xi1>, vector<2x32xf32>
    %c0_79 = arith.constant 0 : index
    %c0_80 = arith.constant 0 : index
    %176 = vector.load %arg10[%c0_79, %c0_80] : memref<2x32xf32, #tpu.memory_space<vmem>>, vector<2x32xf32>
    tpu.vector_store %arg10[%c0_79, %c0_80], %175 {strides = array<i32>} : memref<2x32xf32, #tpu.memory_space<vmem>>, vector<2x32xf32>,
    %c0_81 = arith.constant 0 : index
    %c0_82 = arith.constant 0 : index
    %177 = vector.load %arg11[%c0_81, %c0_82] : memref<2x32xf32, #tpu.memory_space<vmem>>, vector<2x32xf32>
    %178 = vector.shape_cast %148 : vector<2x1xi1> to vector<2x1xi1>
    %179 = vector.broadcast %178 : vector<2x1xi1> to vector<2x32xi1>
    %180 = arith.select %179, %169, %177 : vector<2x32xi1>, vector<2x32xf32>
    %c0_83 = arith.constant 0 : index
    %c0_84 = arith.constant 0 : index
    %181 = vector.load %arg11[%c0_83, %c0_84] : memref<2x32xf32, #tpu.memory_space<vmem>>, vector<2x32xf32>
    tpu.vector_store %arg11[%c0_83, %c0_84], %180 {strides = array<i32>} : memref<2x32xf32, #tpu.memory_space<vmem>>, vector<2x32xf32>,
    %cst_85 = arith.constant 0.000000e+00 : f32
    %182 = vector.shape_cast %148 : vector<2x1xi1> to vector<2x1xi1>
    %183 = vector.broadcast %182 : vector<2x1xi1> to vector<2x32xi1>
    %184 = vector.broadcast %cst_85 : f32 to vector<2x32xf32>
    %185 = arith.select %183, %175, %184 : vector<2x32xi1>, vector<2x32xf32>
    %186 = arith.index_cast %143 : i32 to index
    %c0_86 = arith.constant 0 : index
    %c0_87 = arith.constant 0 : index
    %187 = vector.load %arg7[%186, %c0_86, %c0_87] : memref<8x2x32xf32, #tpu.memory_space<vmem>>, vector<1x2x32xf32>
    %188 = vector.shape_cast %187 : vector<1x2x32xf32> to vector<2x32xf32>
    %189 = vector.shape_cast %185 : vector<2x32xf32> to vector<1x2x32xf32>
    tpu.vector_store %arg7[%186, %c0_86, %c0_87], %189 {strides = array<i32>} : memref<8x2x32xf32, #tpu.memory_space<vmem>>, vector<1x2x32xf32>,
    %c2_i32 = arith.constant 2 : i32
    %c8_i32_88 = arith.constant 8 : i32
    %190 = arith.muli %arg0, %c8_i32_88 : i32
    %191 = arith.addi %190, %c2_i32 : i32
    %192 = vector.broadcast %191 : i32 to vector<2x1xi32>
    %193 = arith.cmpi slt, %192, %5 : vector<2x1xi32>
    %194 = arith.index_cast %c2_i32 : i32 to index
    %c0_89 = arith.constant 0 : index
    %c0_90 = arith.constant 0 : index
    %195 = vector.load %arg1[%194, %c0_89, %c0_90] : memref<8x2x128xf32, #tpu.memory_space<vmem>>, vector<1x2x128xf32>
    %196 = vector.shape_cast %195 : vector<1x2x128xf32> to vector<2x128xf32>
    %c0_91 = arith.constant 0 : index
    %c0_92 = arith.constant 0 : index
    %197 = vector.load %arg8[%c0_91, %c0_92] : memref<2x32xf32, #tpu.memory_space<vmem>>, vector<2x32xf32>
    %c0_93 = arith.constant 0 : index
    %c0_94 = arith.constant 0 : index
    %198 = vector.load %arg9[%c0_93, %c0_94] : memref<2x32xf32, #tpu.memory_space<vmem>>, vector<2x32xf32>
    %cst_95 = arith.constant dense<0.000000e+00> : vector<2x128xf32>
    %199 = tpu.matmul %197, %3, %cst_95 {dimension_numbers = #tpu.dot_dimension_numbers<[1], [0], [0], [1], [0, 0, 1, 1], [], []>} : vector<2x32xf32>, vector<32x128xf32>, vector<2x128xf32> -> vector<2x128xf32>
    %200 = arith.addf %196, %199 : vector<2x128xf32>
    %201 = vector.extract_strided_slice %200 {offsets = [0, 0], sizes = [2, 96], strides = [1, 1]} : vector<2x128xf32> to vector<2x96xf32>
    %202 = arith.negf %201 : vector<2x96xf32>
    %203 = math.exp %202 : vector<2x96xf32>
    %cst_96 = arith.constant 1.000000e+00 : f32
    %204 = vector.broadcast %cst_96 : f32 to vector<2x96xf32>
    %205 = arith.addf %204, %203 : vector<2x96xf32>
    %206 = arith.divf %204, %205 : vector<2x96xf32>
    %207 = vector.extract_strided_slice %206 {offsets = [0, 0], sizes = [2, 32], strides = [1, 1]} : vector<2x96xf32> to vector<2x32xf32>
    %208 = vector.extract_strided_slice %206 {offsets = [0, 32], sizes = [2, 32], strides = [1, 1]} : vector<2x96xf32> to vector<2x32xf32>
    %209 = vector.extract_strided_slice %206 {offsets = [0, 64], sizes = [2, 32], strides = [1, 1]} : vector<2x96xf32> to vector<2x32xf32>
    %210 = vector.extract_strided_slice %200 {offsets = [0, 96], sizes = [2, 32], strides = [1, 1]} : vector<2x128xf32> to vector<2x32xf32>
    %211 = math.tanh %210 : vector<2x32xf32>
    %212 = arith.mulf %208, %198 : vector<2x32xf32>
    %213 = arith.mulf %207, %211 : vector<2x32xf32>
    %214 = arith.addf %212, %213 : vector<2x32xf32>
    %215 = math.tanh %214 : vector<2x32xf32>
    %216 = arith.mulf %209, %215 : vector<2x32xf32>
    %c0_97 = arith.constant 0 : index
    %c0_98 = arith.constant 0 : index
    %217 = vector.load %arg8[%c0_97, %c0_98] : memref<2x32xf32, #tpu.memory_space<vmem>>, vector<2x32xf32>
    %218 = vector.shape_cast %193 : vector<2x1xi1> to vector<2x1xi1>
    %219 = vector.broadcast %218 : vector<2x1xi1> to vector<2x32xi1>
    %220 = arith.select %219, %216, %217 : vector<2x32xi1>, vector<2x32xf32>
    %c0_99 = arith.constant 0 : index
    %c0_100 = arith.constant 0 : index
    %221 = vector.load %arg8[%c0_99, %c0_100] : memref<2x32xf32, #tpu.memory_space<vmem>>, vector<2x32xf32>
    tpu.vector_store %arg8[%c0_99, %c0_100], %220 {strides = array<i32>} : memref<2x32xf32, #tpu.memory_space<vmem>>, vector<2x32xf32>,
    %c0_101 = arith.constant 0 : index
    %c0_102 = arith.constant 0 : index
    %222 = vector.load %arg9[%c0_101, %c0_102] : memref<2x32xf32, #tpu.memory_space<vmem>>, vector<2x32xf32>
    %223 = vector.shape_cast %193 : vector<2x1xi1> to vector<2x1xi1>
    %224 = vector.broadcast %223 : vector<2x1xi1> to vector<2x32xi1>
    %225 = arith.select %224, %214, %222 : vector<2x32xi1>, vector<2x32xf32>
    %c0_103 = arith.constant 0 : index
    %c0_104 = arith.constant 0 : index
    %226 = vector.load %arg9[%c0_103, %c0_104] : memref<2x32xf32, #tpu.memory_space<vmem>>, vector<2x32xf32>
    tpu.vector_store %arg9[%c0_103, %c0_104], %225 {strides = array<i32>} : memref<2x32xf32, #tpu.memory_space<vmem>>, vector<2x32xf32>,
    %cst_105 = arith.constant 0.000000e+00 : f32
    %227 = vector.shape_cast %193 : vector<2x1xi1> to vector<2x1xi1>
    %228 = vector.broadcast %227 : vector<2x1xi1> to vector<2x32xi1>
    %229 = vector.broadcast %cst_105 : f32 to vector<2x32xf32>
    %230 = arith.select %228, %220, %229 : vector<2x32xi1>, vector<2x32xf32>
    %231 = arith.index_cast %c2_i32 : i32 to index
    %c0_106 = arith.constant 0 : index
    %c0_107 = arith.constant 0 : index
    %232 = vector.load %arg6[%231, %c0_106, %c0_107] : memref<8x2x32xf32, #tpu.memory_space<vmem>>, vector<1x2x32xf32>
    %233 = vector.shape_cast %232 : vector<1x2x32xf32> to vector<2x32xf32>
    %234 = vector.shape_cast %230 : vector<2x32xf32> to vector<1x2x32xf32>
    tpu.vector_store %arg6[%231, %c0_106, %c0_107], %234 {strides = array<i32>} : memref<8x2x32xf32, #tpu.memory_space<vmem>>, vector<1x2x32xf32>,
    %c7_i32_108 = arith.constant 7 : i32
    %235 = arith.subi %c7_i32_108, %c2_i32 : i32
    %c0_i32_109 = arith.constant 0 : i32
    %236 = arith.subi %c0_i32_109, %arg0 : i32
    %c8_i32_110 = arith.constant 8 : i32
    %237 = arith.muli %236, %c8_i32_110 : i32
    %238 = arith.addi %237, %235 : i32
    %239 = vector.broadcast %238 : i32 to vector<2x1xi32>
    %240 = arith.cmpi slt, %239, %5 : vector<2x1xi32>
    %241 = arith.index_cast %235 : i32 to index
    %c0_111 = arith.constant 0 : index
    %c0_112 = arith.constant 0 : index
    %242 = vector.load %arg2[%241, %c0_111, %c0_112] : memref<8x2x128xf32, #tpu.memory_space<vmem>>, vector<1x2x128xf32>
    %243 = vector.shape_cast %242 : vector<1x2x128xf32> to vector<2x128xf32>
    %c0_113 = arith.constant 0 : index
    %c0_114 = arith.constant 0 : index
    %244 = vector.load %arg10[%c0_113, %c0_114] : memref<2x32xf32, #tpu.memory_space<vmem>>, vector<2x32xf32>
    %c0_115 = arith.constant 0 : index
    %c0_116 = arith.constant 0 : index
    %245 = vector.load %arg11[%c0_115, %c0_116] : memref<2x32xf32, #tpu.memory_space<vmem>>, vector<2x32xf32>
    %cst_117 = arith.constant dense<0.000000e+00> : vector<2x128xf32>
    %246 = tpu.matmul %244, %4, %cst_117 {dimension_numbers = #tpu.dot_dimension_numbers<[1], [0], [0], [1], [0, 0, 1, 1], [], []>} : vector<2x32xf32>, vector<32x128xf32>, vector<2x128xf32> -> vector<2x128xf32>
    %247 = arith.addf %243, %246 : vector<2x128xf32>
    %248 = vector.extract_strided_slice %247 {offsets = [0, 0], sizes = [2, 96], strides = [1, 1]} : vector<2x128xf32> to vector<2x96xf32>
    %249 = arith.negf %248 : vector<2x96xf32>
    %250 = math.exp %249 : vector<2x96xf32>
    %cst_118 = arith.constant 1.000000e+00 : f32
    %251 = vector.broadcast %cst_118 : f32 to vector<2x96xf32>
    %252 = arith.addf %251, %250 : vector<2x96xf32>
    %253 = arith.divf %251, %252 : vector<2x96xf32>
    %254 = vector.extract_strided_slice %253 {offsets = [0, 0], sizes = [2, 32], strides = [1, 1]} : vector<2x96xf32> to vector<2x32xf32>
    %255 = vector.extract_strided_slice %253 {offsets = [0, 32], sizes = [2, 32], strides = [1, 1]} : vector<2x96xf32> to vector<2x32xf32>
    %256 = vector.extract_strided_slice %253 {offsets = [0, 64], sizes = [2, 32], strides = [1, 1]} : vector<2x96xf32> to vector<2x32xf32>
    %257 = vector.extract_strided_slice %247 {offsets = [0, 96], sizes = [2, 32], strides = [1, 1]} : vector<2x128xf32> to vector<2x32xf32>
    %258 = math.tanh %257 : vector<2x32xf32>
    %259 = arith.mulf %255, %245 : vector<2x32xf32>
    %260 = arith.mulf %254, %258 : vector<2x32xf32>
    %261 = arith.addf %259, %260 : vector<2x32xf32>
    %262 = math.tanh %261 : vector<2x32xf32>
    %263 = arith.mulf %256, %262 : vector<2x32xf32>
    %c0_119 = arith.constant 0 : index
    %c0_120 = arith.constant 0 : index
    %264 = vector.load %arg10[%c0_119, %c0_120] : memref<2x32xf32, #tpu.memory_space<vmem>>, vector<2x32xf32>
    %265 = vector.shape_cast %240 : vector<2x1xi1> to vector<2x1xi1>
    %266 = vector.broadcast %265 : vector<2x1xi1> to vector<2x32xi1>
    %267 = arith.select %266, %263, %264 : vector<2x32xi1>, vector<2x32xf32>
    %c0_121 = arith.constant 0 : index
    %c0_122 = arith.constant 0 : index
    %268 = vector.load %arg10[%c0_121, %c0_122] : memref<2x32xf32, #tpu.memory_space<vmem>>, vector<2x32xf32>
    tpu.vector_store %arg10[%c0_121, %c0_122], %267 {strides = array<i32>} : memref<2x32xf32, #tpu.memory_space<vmem>>, vector<2x32xf32>,
    %c0_123 = arith.constant 0 : index
    %c0_124 = arith.constant 0 : index
    %269 = vector.load %arg11[%c0_123, %c0_124] : memref<2x32xf32, #tpu.memory_space<vmem>>, vector<2x32xf32>
    %270 = vector.shape_cast %240 : vector<2x1xi1> to vector<2x1xi1>
    %271 = vector.broadcast %270 : vector<2x1xi1> to vector<2x32xi1>
    %272 = arith.select %271, %261, %269 : vector<2x32xi1>, vector<2x32xf32>
    %c0_125 = arith.constant 0 : index
    %c0_126 = arith.constant 0 : index
    %273 = vector.load %arg11[%c0_125, %c0_126] : memref<2x32xf32, #tpu.memory_space<vmem>>, vector<2x32xf32>
    tpu.vector_store %arg11[%c0_125, %c0_126], %272 {strides = array<i32>} : memref<2x32xf32, #tpu.memory_space<vmem>>, vector<2x32xf32>,
    %cst_127 = arith.constant 0.000000e+00 : f32
    %274 = vector.shape_cast %240 : vector<2x1xi1> to vector<2x1xi1>
    %275 = vector.broadcast %274 : vector<2x1xi1> to vector<2x32xi1>
    %276 = vector.broadcast %cst_127 : f32 to vector<2x32xf32>
    %277 = arith.select %275, %267, %276 : vector<2x32xi1>, vector<2x32xf32>
    %278 = arith.index_cast %235 : i32 to index
    %c0_128 = arith.constant 0 : index
    %c0_129 = arith.constant 0 : index
    %279 = vector.load %arg7[%278, %c0_128, %c0_129] : memref<8x2x32xf32, #tpu.memory_space<vmem>>, vector<1x2x32xf32>
    %280 = vector.shape_cast %279 : vector<1x2x32xf32> to vector<2x32xf32>
    %281 = vector.shape_cast %277 : vector<2x32xf32> to vector<1x2x32xf32>
    tpu.vector_store %arg7[%278, %c0_128, %c0_129], %281 {strides = array<i32>} : memref<8x2x32xf32, #tpu.memory_space<vmem>>, vector<1x2x32xf32>,
    %c3_i32 = arith.constant 3 : i32
    %c8_i32_130 = arith.constant 8 : i32
    %282 = arith.muli %arg0, %c8_i32_130 : i32
    %283 = arith.addi %282, %c3_i32 : i32
    %284 = vector.broadcast %283 : i32 to vector<2x1xi32>
    %285 = arith.cmpi slt, %284, %5 : vector<2x1xi32>
    %286 = arith.index_cast %c3_i32 : i32 to index
    %c0_131 = arith.constant 0 : index
    %c0_132 = arith.constant 0 : index
    %287 = vector.load %arg1[%286, %c0_131, %c0_132] : memref<8x2x128xf32, #tpu.memory_space<vmem>>, vector<1x2x128xf32>
    %288 = vector.shape_cast %287 : vector<1x2x128xf32> to vector<2x128xf32>
    %c0_133 = arith.constant 0 : index
    %c0_134 = arith.constant 0 : index
    %289 = vector.load %arg8[%c0_133, %c0_134] : memref<2x32xf32, #tpu.memory_space<vmem>>, vector<2x32xf32>
    %c0_135 = arith.constant 0 : index
    %c0_136 = arith.constant 0 : index
    %290 = vector.load %arg9[%c0_135, %c0_136] : memref<2x32xf32, #tpu.memory_space<vmem>>, vector<2x32xf32>
    %cst_137 = arith.constant dense<0.000000e+00> : vector<2x128xf32>
    %291 = tpu.matmul %289, %3, %cst_137 {dimension_numbers = #tpu.dot_dimension_numbers<[1], [0], [0], [1], [0, 0, 1, 1], [], []>} : vector<2x32xf32>, vector<32x128xf32>, vector<2x128xf32> -> vector<2x128xf32>
    %292 = arith.addf %288, %291 : vector<2x128xf32>
    %293 = vector.extract_strided_slice %292 {offsets = [0, 0], sizes = [2, 96], strides = [1, 1]} : vector<2x128xf32> to vector<2x96xf32>
    %294 = arith.negf %293 : vector<2x96xf32>
    %295 = math.exp %294 : vector<2x96xf32>
    %cst_138 = arith.constant 1.000000e+00 : f32
    %296 = vector.broadcast %cst_138 : f32 to vector<2x96xf32>
    %297 = arith.addf %296, %295 : vector<2x96xf32>
    %298 = arith.divf %296, %297 : vector<2x96xf32>
    %299 = vector.extract_strided_slice %298 {offsets = [0, 0], sizes = [2, 32], strides = [1, 1]} : vector<2x96xf32> to vector<2x32xf32>
    %300 = vector.extract_strided_slice %298 {offsets = [0, 32], sizes = [2, 32], strides = [1, 1]} : vector<2x96xf32> to vector<2x32xf32>
    %301 = vector.extract_strided_slice %298 {offsets = [0, 64], sizes = [2, 32], strides = [1, 1]} : vector<2x96xf32> to vector<2x32xf32>
    %302 = vector.extract_strided_slice %292 {offsets = [0, 96], sizes = [2, 32], strides = [1, 1]} : vector<2x128xf32> to vector<2x32xf32>
    %303 = math.tanh %302 : vector<2x32xf32>
    %304 = arith.mulf %300, %290 : vector<2x32xf32>
    %305 = arith.mulf %299, %303 : vector<2x32xf32>
    %306 = arith.addf %304, %305 : vector<2x32xf32>
    %307 = math.tanh %306 : vector<2x32xf32>
    %308 = arith.mulf %301, %307 : vector<2x32xf32>
    %c0_139 = arith.constant 0 : index
    %c0_140 = arith.constant 0 : index
    %309 = vector.load %arg8[%c0_139, %c0_140] : memref<2x32xf32, #tpu.memory_space<vmem>>, vector<2x32xf32>
    %310 = vector.shape_cast %285 : vector<2x1xi1> to vector<2x1xi1>
    %311 = vector.broadcast %310 : vector<2x1xi1> to vector<2x32xi1>
    %312 = arith.select %311, %308, %309 : vector<2x32xi1>, vector<2x32xf32>
    %c0_141 = arith.constant 0 : index
    %c0_142 = arith.constant 0 : index
    %313 = vector.load %arg8[%c0_141, %c0_142] : memref<2x32xf32, #tpu.memory_space<vmem>>, vector<2x32xf32>
    tpu.vector_store %arg8[%c0_141, %c0_142], %312 {strides = array<i32>} : memref<2x32xf32, #tpu.memory_space<vmem>>, vector<2x32xf32>,
    %c0_143 = arith.constant 0 : index
    %c0_144 = arith.constant 0 : index
    %314 = vector.load %arg9[%c0_143, %c0_144] : memref<2x32xf32, #tpu.memory_space<vmem>>, vector<2x32xf32>
    %315 = vector.shape_cast %285 : vector<2x1xi1> to vector<2x1xi1>
    %316 = vector.broadcast %315 : vector<2x1xi1> to vector<2x32xi1>
    %317 = arith.select %316, %306, %314 : vector<2x32xi1>, vector<2x32xf32>
    %c0_145 = arith.constant 0 : index
    %c0_146 = arith.constant 0 : index
    %318 = vector.load %arg9[%c0_145, %c0_146] : memref<2x32xf32, #tpu.memory_space<vmem>>, vector<2x32xf32>
    tpu.vector_store %arg9[%c0_145, %c0_146], %317 {strides = array<i32>} : memref<2x32xf32, #tpu.memory_space<vmem>>, vector<2x32xf32>,
    %cst_147 = arith.constant 0.000000e+00 : f32
    %319 = vector.shape_cast %285 : vector<2x1xi1> to vector<2x1xi1>
    %320 = vector.broadcast %319 : vector<2x1xi1> to vector<2x32xi1>
    %321 = vector.broadcast %cst_147 : f32 to vector<2x32xf32>
    %322 = arith.select %320, %312, %321 : vector<2x32xi1>, vector<2x32xf32>
    %323 = arith.index_cast %c3_i32 : i32 to index
    %c0_148 = arith.constant 0 : index
    %c0_149 = arith.constant 0 : index
    %324 = vector.load %arg6[%323, %c0_148, %c0_149] : memref<8x2x32xf32, #tpu.memory_space<vmem>>, vector<1x2x32xf32>
    %325 = vector.shape_cast %324 : vector<1x2x32xf32> to vector<2x32xf32>
    %326 = vector.shape_cast %322 : vector<2x32xf32> to vector<1x2x32xf32>
    tpu.vector_store %arg6[%323, %c0_148, %c0_149], %326 {strides = array<i32>} : memref<8x2x32xf32, #tpu.memory_space<vmem>>, vector<1x2x32xf32>,
    %c7_i32_150 = arith.constant 7 : i32
    %327 = arith.subi %c7_i32_150, %c3_i32 : i32
    %c0_i32_151 = arith.constant 0 : i32
    %328 = arith.subi %c0_i32_151, %arg0 : i32
    %c8_i32_152 = arith.constant 8 : i32
    %329 = arith.muli %328, %c8_i32_152 : i32
    %330 = arith.addi %329, %327 : i32
    %331 = vector.broadcast %330 : i32 to vector<2x1xi32>
    %332 = arith.cmpi slt, %331, %5 : vector<2x1xi32>
    %333 = arith.index_cast %327 : i32 to index
    %c0_153 = arith.constant 0 : index
    %c0_154 = arith.constant 0 : index
    %334 = vector.load %arg2[%333, %c0_153, %c0_154] : memref<8x2x128xf32, #tpu.memory_space<vmem>>, vector<1x2x128xf32>
    %335 = vector.shape_cast %334 : vector<1x2x128xf32> to vector<2x128xf32>
    %c0_155 = arith.constant 0 : index
    %c0_156 = arith.constant 0 : index
    %336 = vector.load %arg10[%c0_155, %c0_156] : memref<2x32xf32, #tpu.memory_space<vmem>>, vector<2x32xf32>
    %c0_157 = arith.constant 0 : index
    %c0_158 = arith.constant 0 : index
    %337 = vector.load %arg11[%c0_157, %c0_158] : memref<2x32xf32, #tpu.memory_space<vmem>>, vector<2x32xf32>
    %cst_159 = arith.constant dense<0.000000e+00> : vector<2x128xf32>
    %338 = tpu.matmul %336, %4, %cst_159 {dimension_numbers = #tpu.dot_dimension_numbers<[1], [0], [0], [1], [0, 0, 1, 1], [], []>} : vector<2x32xf32>, vector<32x128xf32>, vector<2x128xf32> -> vector<2x128xf32>
    %339 = arith.addf %335, %338 : vector<2x128xf32>
    %340 = vector.extract_strided_slice %339 {offsets = [0, 0], sizes = [2, 96], strides = [1, 1]} : vector<2x128xf32> to vector<2x96xf32>
    %341 = arith.negf %340 : vector<2x96xf32>
    %342 = math.exp %341 : vector<2x96xf32>
    %cst_160 = arith.constant 1.000000e+00 : f32
    %343 = vector.broadcast %cst_160 : f32 to vector<2x96xf32>
    %344 = arith.addf %343, %342 : vector<2x96xf32>
    %345 = arith.divf %343, %344 : vector<2x96xf32>
    %346 = vector.extract_strided_slice %345 {offsets = [0, 0], sizes = [2, 32], strides = [1, 1]} : vector<2x96xf32> to vector<2x32xf32>
    %347 = vector.extract_strided_slice %345 {offsets = [0, 32], sizes = [2, 32], strides = [1, 1]} : vector<2x96xf32> to vector<2x32xf32>
    %348 = vector.extract_strided_slice %345 {offsets = [0, 64], sizes = [2, 32], strides = [1, 1]} : vector<2x96xf32> to vector<2x32xf32>
    %349 = vector.extract_strided_slice %339 {offsets = [0, 96], sizes = [2, 32], strides = [1, 1]} : vector<2x128xf32> to vector<2x32xf32>
    %350 = math.tanh %349 : vector<2x32xf32>
    %351 = arith.mulf %347, %337 : vector<2x32xf32>
    %352 = arith.mulf %346, %350 : vector<2x32xf32>
    %353 = arith.addf %351, %352 : vector<2x32xf32>
    %354 = math.tanh %353 : vector<2x32xf32>
    %355 = arith.mulf %348, %354 : vector<2x32xf32>
    %c0_161 = arith.constant 0 : index
    %c0_162 = arith.constant 0 : index
    %356 = vector.load %arg10[%c0_161, %c0_162] : memref<2x32xf32, #tpu.memory_space<vmem>>, vector<2x32xf32>
    %357 = vector.shape_cast %332 : vector<2x1xi1> to vector<2x1xi1>
    %358 = vector.broadcast %357 : vector<2x1xi1> to vector<2x32xi1>
    %359 = arith.select %358, %355, %356 : vector<2x32xi1>, vector<2x32xf32>
    %c0_163 = arith.constant 0 : index
    %c0_164 = arith.constant 0 : index
    %360 = vector.load %arg10[%c0_163, %c0_164] : memref<2x32xf32, #tpu.memory_space<vmem>>, vector<2x32xf32>
    tpu.vector_store %arg10[%c0_163, %c0_164], %359 {strides = array<i32>} : memref<2x32xf32, #tpu.memory_space<vmem>>, vector<2x32xf32>,
    %c0_165 = arith.constant 0 : index
    %c0_166 = arith.constant 0 : index
    %361 = vector.load %arg11[%c0_165, %c0_166] : memref<2x32xf32, #tpu.memory_space<vmem>>, vector<2x32xf32>
    %362 = vector.shape_cast %332 : vector<2x1xi1> to vector<2x1xi1>
    %363 = vector.broadcast %362 : vector<2x1xi1> to vector<2x32xi1>
    %364 = arith.select %363, %353, %361 : vector<2x32xi1>, vector<2x32xf32>
    %c0_167 = arith.constant 0 : index
    %c0_168 = arith.constant 0 : index
    %365 = vector.load %arg11[%c0_167, %c0_168] : memref<2x32xf32, #tpu.memory_space<vmem>>, vector<2x32xf32>
    tpu.vector_store %arg11[%c0_167, %c0_168], %364 {strides = array<i32>} : memref<2x32xf32, #tpu.memory_space<vmem>>, vector<2x32xf32>,
    %cst_169 = arith.constant 0.000000e+00 : f32
    %366 = vector.shape_cast %332 : vector<2x1xi1> to vector<2x1xi1>
    %367 = vector.broadcast %366 : vector<2x1xi1> to vector<2x32xi1>
    %368 = vector.broadcast %cst_169 : f32 to vector<2x32xf32>
    %369 = arith.select %367, %359, %368 : vector<2x32xi1>, vector<2x32xf32>
    %370 = arith.index_cast %327 : i32 to index
    %c0_170 = arith.constant 0 : index
    %c0_171 = arith.constant 0 : index
    %371 = vector.load %arg7[%370, %c0_170, %c0_171] : memref<8x2x32xf32, #tpu.memory_space<vmem>>, vector<1x2x32xf32>
    %372 = vector.shape_cast %371 : vector<1x2x32xf32> to vector<2x32xf32>
    %373 = vector.shape_cast %369 : vector<2x32xf32> to vector<1x2x32xf32>
    tpu.vector_store %arg7[%370, %c0_170, %c0_171], %373 {strides = array<i32>} : memref<8x2x32xf32, #tpu.memory_space<vmem>>, vector<1x2x32xf32>,
    %c4_i32 = arith.constant 4 : i32
    %c8_i32_172 = arith.constant 8 : i32
    %374 = arith.muli %arg0, %c8_i32_172 : i32
    %375 = arith.addi %374, %c4_i32 : i32
    %376 = vector.broadcast %375 : i32 to vector<2x1xi32>
    %377 = arith.cmpi slt, %376, %5 : vector<2x1xi32>
    %378 = arith.index_cast %c4_i32 : i32 to index
    %c0_173 = arith.constant 0 : index
    %c0_174 = arith.constant 0 : index
    %379 = vector.load %arg1[%378, %c0_173, %c0_174] : memref<8x2x128xf32, #tpu.memory_space<vmem>>, vector<1x2x128xf32>
    %380 = vector.shape_cast %379 : vector<1x2x128xf32> to vector<2x128xf32>
    %c0_175 = arith.constant 0 : index
    %c0_176 = arith.constant 0 : index
    %381 = vector.load %arg8[%c0_175, %c0_176] : memref<2x32xf32, #tpu.memory_space<vmem>>, vector<2x32xf32>
    %c0_177 = arith.constant 0 : index
    %c0_178 = arith.constant 0 : index
    %382 = vector.load %arg9[%c0_177, %c0_178] : memref<2x32xf32, #tpu.memory_space<vmem>>, vector<2x32xf32>
    %cst_179 = arith.constant dense<0.000000e+00> : vector<2x128xf32>
    %383 = tpu.matmul %381, %3, %cst_179 {dimension_numbers = #tpu.dot_dimension_numbers<[1], [0], [0], [1], [0, 0, 1, 1], [], []>} : vector<2x32xf32>, vector<32x128xf32>, vector<2x128xf32> -> vector<2x128xf32>
    %384 = arith.addf %380, %383 : vector<2x128xf32>
    %385 = vector.extract_strided_slice %384 {offsets = [0, 0], sizes = [2, 96], strides = [1, 1]} : vector<2x128xf32> to vector<2x96xf32>
    %386 = arith.negf %385 : vector<2x96xf32>
    %387 = math.exp %386 : vector<2x96xf32>
    %cst_180 = arith.constant 1.000000e+00 : f32
    %388 = vector.broadcast %cst_180 : f32 to vector<2x96xf32>
    %389 = arith.addf %388, %387 : vector<2x96xf32>
    %390 = arith.divf %388, %389 : vector<2x96xf32>
    %391 = vector.extract_strided_slice %390 {offsets = [0, 0], sizes = [2, 32], strides = [1, 1]} : vector<2x96xf32> to vector<2x32xf32>
    %392 = vector.extract_strided_slice %390 {offsets = [0, 32], sizes = [2, 32], strides = [1, 1]} : vector<2x96xf32> to vector<2x32xf32>
    %393 = vector.extract_strided_slice %390 {offsets = [0, 64], sizes = [2, 32], strides = [1, 1]} : vector<2x96xf32> to vector<2x32xf32>
    %394 = vector.extract_strided_slice %384 {offsets = [0, 96], sizes = [2, 32], strides = [1, 1]} : vector<2x128xf32> to vector<2x32xf32>
    %395 = math.tanh %394 : vector<2x32xf32>
    %396 = arith.mulf %392, %382 : vector<2x32xf32>
    %397 = arith.mulf %391, %395 : vector<2x32xf32>
    %398 = arith.addf %396, %397 : vector<2x32xf32>
    %399 = math.tanh %398 : vector<2x32xf32>
    %400 = arith.mulf %393, %399 : vector<2x32xf32>
    %c0_181 = arith.constant 0 : index
    %c0_182 = arith.constant 0 : index
    %401 = vector.load %arg8[%c0_181, %c0_182] : memref<2x32xf32, #tpu.memory_space<vmem>>, vector<2x32xf32>
    %402 = vector.shape_cast %377 : vector<2x1xi1> to vector<2x1xi1>
    %403 = vector.broadcast %402 : vector<2x1xi1> to vector<2x32xi1>
    %404 = arith.select %403, %400, %401 : vector<2x32xi1>, vector<2x32xf32>
    %c0_183 = arith.constant 0 : index
    %c0_184 = arith.constant 0 : index
    %405 = vector.load %arg8[%c0_183, %c0_184] : memref<2x32xf32, #tpu.memory_space<vmem>>, vector<2x32xf32>
    tpu.vector_store %arg8[%c0_183, %c0_184], %404 {strides = array<i32>} : memref<2x32xf32, #tpu.memory_space<vmem>>, vector<2x32xf32>,
    %c0_185 = arith.constant 0 : index
    %c0_186 = arith.constant 0 : index
    %406 = vector.load %arg9[%c0_185, %c0_186] : memref<2x32xf32, #tpu.memory_space<vmem>>, vector<2x32xf32>
    %407 = vector.shape_cast %377 : vector<2x1xi1> to vector<2x1xi1>
    %408 = vector.broadcast %407 : vector<2x1xi1> to vector<2x32xi1>
    %409 = arith.select %408, %398, %406 : vector<2x32xi1>, vector<2x32xf32>
    %c0_187 = arith.constant 0 : index
    %c0_188 = arith.constant 0 : index
    %410 = vector.load %arg9[%c0_187, %c0_188] : memref<2x32xf32, #tpu.memory_space<vmem>>, vector<2x32xf32>
    tpu.vector_store %arg9[%c0_187, %c0_188], %409 {strides = array<i32>} : memref<2x32xf32, #tpu.memory_space<vmem>>, vector<2x32xf32>,
    %cst_189 = arith.constant 0.000000e+00 : f32
    %411 = vector.shape_cast %377 : vector<2x1xi1> to vector<2x1xi1>
    %412 = vector.broadcast %411 : vector<2x1xi1> to vector<2x32xi1>
    %413 = vector.broadcast %cst_189 : f32 to vector<2x32xf32>
    %414 = arith.select %412, %404, %413 : vector<2x32xi1>, vector<2x32xf32>
    %415 = arith.index_cast %c4_i32 : i32 to index
    %c0_190 = arith.constant 0 : index
    %c0_191 = arith.constant 0 : index
    %416 = vector.load %arg6[%415, %c0_190, %c0_191] : memref<8x2x32xf32, #tpu.memory_space<vmem>>, vector<1x2x32xf32>
    %417 = vector.shape_cast %416 : vector<1x2x32xf32> to vector<2x32xf32>
    %418 = vector.shape_cast %414 : vector<2x32xf32> to vector<1x2x32xf32>
    tpu.vector_store %arg6[%415, %c0_190, %c0_191], %418 {strides = array<i32>} : memref<8x2x32xf32, #tpu.memory_space<vmem>>, vector<1x2x32xf32>,
    %c7_i32_192 = arith.constant 7 : i32
    %419 = arith.subi %c7_i32_192, %c4_i32 : i32
    %c0_i32_193 = arith.constant 0 : i32
    %420 = arith.subi %c0_i32_193, %arg0 : i32
    %c8_i32_194 = arith.constant 8 : i32
    %421 = arith.muli %420, %c8_i32_194 : i32
    %422 = arith.addi %421, %419 : i32
    %423 = vector.broadcast %422 : i32 to vector<2x1xi32>
    %424 = arith.cmpi slt, %423, %5 : vector<2x1xi32>
    %425 = arith.index_cast %419 : i32 to index
    %c0_195 = arith.constant 0 : index
    %c0_196 = arith.constant 0 : index
    %426 = vector.load %arg2[%425, %c0_195, %c0_196] : memref<8x2x128xf32, #tpu.memory_space<vmem>>, vector<1x2x128xf32>
    %427 = vector.shape_cast %426 : vector<1x2x128xf32> to vector<2x128xf32>
    %c0_197 = arith.constant 0 : index
    %c0_198 = arith.constant 0 : index
    %428 = vector.load %arg10[%c0_197, %c0_198] : memref<2x32xf32, #tpu.memory_space<vmem>>, vector<2x32xf32>
    %c0_199 = arith.constant 0 : index
    %c0_200 = arith.constant 0 : index
    %429 = vector.load %arg11[%c0_199, %c0_200] : memref<2x32xf32, #tpu.memory_space<vmem>>, vector<2x32xf32>
    %cst_201 = arith.constant dense<0.000000e+00> : vector<2x128xf32>
    %430 = tpu.matmul %428, %4, %cst_201 {dimension_numbers = #tpu.dot_dimension_numbers<[1], [0], [0], [1], [0, 0, 1, 1], [], []>} : vector<2x32xf32>, vector<32x128xf32>, vector<2x128xf32> -> vector<2x128xf32>
    %431 = arith.addf %427, %430 : vector<2x128xf32>
    %432 = vector.extract_strided_slice %431 {offsets = [0, 0], sizes = [2, 96], strides = [1, 1]} : vector<2x128xf32> to vector<2x96xf32>
    %433 = arith.negf %432 : vector<2x96xf32>
    %434 = math.exp %433 : vector<2x96xf32>
    %cst_202 = arith.constant 1.000000e+00 : f32
    %435 = vector.broadcast %cst_202 : f32 to vector<2x96xf32>
    %436 = arith.addf %435, %434 : vector<2x96xf32>
    %437 = arith.divf %435, %436 : vector<2x96xf32>
    %438 = vector.extract_strided_slice %437 {offsets = [0, 0], sizes = [2, 32], strides = [1, 1]} : vector<2x96xf32> to vector<2x32xf32>
    %439 = vector.extract_strided_slice %437 {offsets = [0, 32], sizes = [2, 32], strides = [1, 1]} : vector<2x96xf32> to vector<2x32xf32>
    %440 = vector.extract_strided_slice %437 {offsets = [0, 64], sizes = [2, 32], strides = [1, 1]} : vector<2x96xf32> to vector<2x32xf32>
    %441 = vector.extract_strided_slice %431 {offsets = [0, 96], sizes = [2, 32], strides = [1, 1]} : vector<2x128xf32> to vector<2x32xf32>
    %442 = math.tanh %441 : vector<2x32xf32>
    %443 = arith.mulf %439, %429 : vector<2x32xf32>
    %444 = arith.mulf %438, %442 : vector<2x32xf32>
    %445 = arith.addf %443, %444 : vector<2x32xf32>
    %446 = math.tanh %445 : vector<2x32xf32>
    %447 = arith.mulf %440, %446 : vector<2x32xf32>
    %c0_203 = arith.constant 0 : index
    %c0_204 = arith.constant 0 : index
    %448 = vector.load %arg10[%c0_203, %c0_204] : memref<2x32xf32, #tpu.memory_space<vmem>>, vector<2x32xf32>
    %449 = vector.shape_cast %424 : vector<2x1xi1> to vector<2x1xi1>
    %450 = vector.broadcast %449 : vector<2x1xi1> to vector<2x32xi1>
    %451 = arith.select %450, %447, %448 : vector<2x32xi1>, vector<2x32xf32>
    %c0_205 = arith.constant 0 : index
    %c0_206 = arith.constant 0 : index
    %452 = vector.load %arg10[%c0_205, %c0_206] : memref<2x32xf32, #tpu.memory_space<vmem>>, vector<2x32xf32>
    tpu.vector_store %arg10[%c0_205, %c0_206], %451 {strides = array<i32>} : memref<2x32xf32, #tpu.memory_space<vmem>>, vector<2x32xf32>,
    %c0_207 = arith.constant 0 : index
    %c0_208 = arith.constant 0 : index
    %453 = vector.load %arg11[%c0_207, %c0_208] : memref<2x32xf32, #tpu.memory_space<vmem>>, vector<2x32xf32>
    %454 = vector.shape_cast %424 : vector<2x1xi1> to vector<2x1xi1>
    %455 = vector.broadcast %454 : vector<2x1xi1> to vector<2x32xi1>
    %456 = arith.select %455, %445, %453 : vector<2x32xi1>, vector<2x32xf32>
    %c0_209 = arith.constant 0 : index
    %c0_210 = arith.constant 0 : index
    %457 = vector.load %arg11[%c0_209, %c0_210] : memref<2x32xf32, #tpu.memory_space<vmem>>, vector<2x32xf32>
    tpu.vector_store %arg11[%c0_209, %c0_210], %456 {strides = array<i32>} : memref<2x32xf32, #tpu.memory_space<vmem>>, vector<2x32xf32>,
    %cst_211 = arith.constant 0.000000e+00 : f32
    %458 = vector.shape_cast %424 : vector<2x1xi1> to vector<2x1xi1>
    %459 = vector.broadcast %458 : vector<2x1xi1> to vector<2x32xi1>
    %460 = vector.broadcast %cst_211 : f32 to vector<2x32xf32>
    %461 = arith.select %459, %451, %460 : vector<2x32xi1>, vector<2x32xf32>
    %462 = arith.index_cast %419 : i32 to index
    %c0_212 = arith.constant 0 : index
    %c0_213 = arith.constant 0 : index
    %463 = vector.load %arg7[%462, %c0_212, %c0_213] : memref<8x2x32xf32, #tpu.memory_space<vmem>>, vector<1x2x32xf32>
    %464 = vector.shape_cast %463 : vector<1x2x32xf32> to vector<2x32xf32>
    %465 = vector.shape_cast %461 : vector<2x32xf32> to vector<1x2x32xf32>
    tpu.vector_store %arg7[%462, %c0_212, %c0_213], %465 {strides = array<i32>} : memref<8x2x32xf32, #tpu.memory_space<vmem>>, vector<1x2x32xf32>,
    %c5_i32 = arith.constant 5 : i32
    %c8_i32_214 = arith.constant 8 : i32
    %466 = arith.muli %arg0, %c8_i32_214 : i32
    %467 = arith.addi %466, %c5_i32 : i32
    %468 = vector.broadcast %467 : i32 to vector<2x1xi32>
    %469 = arith.cmpi slt, %468, %5 : vector<2x1xi32>
    %470 = arith.index_cast %c5_i32 : i32 to index
    %c0_215 = arith.constant 0 : index
    %c0_216 = arith.constant 0 : index
    %471 = vector.load %arg1[%470, %c0_215, %c0_216] : memref<8x2x128xf32, #tpu.memory_space<vmem>>, vector<1x2x128xf32>
    %472 = vector.shape_cast %471 : vector<1x2x128xf32> to vector<2x128xf32>
    %c0_217 = arith.constant 0 : index
    %c0_218 = arith.constant 0 : index
    %473 = vector.load %arg8[%c0_217, %c0_218] : memref<2x32xf32, #tpu.memory_space<vmem>>, vector<2x32xf32>
    %c0_219 = arith.constant 0 : index
    %c0_220 = arith.constant 0 : index
    %474 = vector.load %arg9[%c0_219, %c0_220] : memref<2x32xf32, #tpu.memory_space<vmem>>, vector<2x32xf32>
    %cst_221 = arith.constant dense<0.000000e+00> : vector<2x128xf32>
    %475 = tpu.matmul %473, %3, %cst_221 {dimension_numbers = #tpu.dot_dimension_numbers<[1], [0], [0], [1], [0, 0, 1, 1], [], []>} : vector<2x32xf32>, vector<32x128xf32>, vector<2x128xf32> -> vector<2x128xf32>
    %476 = arith.addf %472, %475 : vector<2x128xf32>
    %477 = vector.extract_strided_slice %476 {offsets = [0, 0], sizes = [2, 96], strides = [1, 1]} : vector<2x128xf32> to vector<2x96xf32>
    %478 = arith.negf %477 : vector<2x96xf32>
    %479 = math.exp %478 : vector<2x96xf32>
    %cst_222 = arith.constant 1.000000e+00 : f32
    %480 = vector.broadcast %cst_222 : f32 to vector<2x96xf32>
    %481 = arith.addf %480, %479 : vector<2x96xf32>
    %482 = arith.divf %480, %481 : vector<2x96xf32>
    %483 = vector.extract_strided_slice %482 {offsets = [0, 0], sizes = [2, 32], strides = [1, 1]} : vector<2x96xf32> to vector<2x32xf32>
    %484 = vector.extract_strided_slice %482 {offsets = [0, 32], sizes = [2, 32], strides = [1, 1]} : vector<2x96xf32> to vector<2x32xf32>
    %485 = vector.extract_strided_slice %482 {offsets = [0, 64], sizes = [2, 32], strides = [1, 1]} : vector<2x96xf32> to vector<2x32xf32>
    %486 = vector.extract_strided_slice %476 {offsets = [0, 96], sizes = [2, 32], strides = [1, 1]} : vector<2x128xf32> to vector<2x32xf32>
    %487 = math.tanh %486 : vector<2x32xf32>
    %488 = arith.mulf %484, %474 : vector<2x32xf32>
    %489 = arith.mulf %483, %487 : vector<2x32xf32>
    %490 = arith.addf %488, %489 : vector<2x32xf32>
    %491 = math.tanh %490 : vector<2x32xf32>
    %492 = arith.mulf %485, %491 : vector<2x32xf32>
    %c0_223 = arith.constant 0 : index
    %c0_224 = arith.constant 0 : index
    %493 = vector.load %arg8[%c0_223, %c0_224] : memref<2x32xf32, #tpu.memory_space<vmem>>, vector<2x32xf32>
    %494 = vector.shape_cast %469 : vector<2x1xi1> to vector<2x1xi1>
    %495 = vector.broadcast %494 : vector<2x1xi1> to vector<2x32xi1>
    %496 = arith.select %495, %492, %493 : vector<2x32xi1>, vector<2x32xf32>
    %c0_225 = arith.constant 0 : index
    %c0_226 = arith.constant 0 : index
    %497 = vector.load %arg8[%c0_225, %c0_226] : memref<2x32xf32, #tpu.memory_space<vmem>>, vector<2x32xf32>
    tpu.vector_store %arg8[%c0_225, %c0_226], %496 {strides = array<i32>} : memref<2x32xf32, #tpu.memory_space<vmem>>, vector<2x32xf32>,
    %c0_227 = arith.constant 0 : index
    %c0_228 = arith.constant 0 : index
    %498 = vector.load %arg9[%c0_227, %c0_228] : memref<2x32xf32, #tpu.memory_space<vmem>>, vector<2x32xf32>
    %499 = vector.shape_cast %469 : vector<2x1xi1> to vector<2x1xi1>
    %500 = vector.broadcast %499 : vector<2x1xi1> to vector<2x32xi1>
    %501 = arith.select %500, %490, %498 : vector<2x32xi1>, vector<2x32xf32>
    %c0_229 = arith.constant 0 : index
    %c0_230 = arith.constant 0 : index
    %502 = vector.load %arg9[%c0_229, %c0_230] : memref<2x32xf32, #tpu.memory_space<vmem>>, vector<2x32xf32>
    tpu.vector_store %arg9[%c0_229, %c0_230], %501 {strides = array<i32>} : memref<2x32xf32, #tpu.memory_space<vmem>>, vector<2x32xf32>,
    %cst_231 = arith.constant 0.000000e+00 : f32
    %503 = vector.shape_cast %469 : vector<2x1xi1> to vector<2x1xi1>
    %504 = vector.broadcast %503 : vector<2x1xi1> to vector<2x32xi1>
    %505 = vector.broadcast %cst_231 : f32 to vector<2x32xf32>
    %506 = arith.select %504, %496, %505 : vector<2x32xi1>, vector<2x32xf32>
    %507 = arith.index_cast %c5_i32 : i32 to index
    %c0_232 = arith.constant 0 : index
    %c0_233 = arith.constant 0 : index
    %508 = vector.load %arg6[%507, %c0_232, %c0_233] : memref<8x2x32xf32, #tpu.memory_space<vmem>>, vector<1x2x32xf32>
    %509 = vector.shape_cast %508 : vector<1x2x32xf32> to vector<2x32xf32>
    %510 = vector.shape_cast %506 : vector<2x32xf32> to vector<1x2x32xf32>
    tpu.vector_store %arg6[%507, %c0_232, %c0_233], %510 {strides = array<i32>} : memref<8x2x32xf32, #tpu.memory_space<vmem>>, vector<1x2x32xf32>,
    %c7_i32_234 = arith.constant 7 : i32
    %511 = arith.subi %c7_i32_234, %c5_i32 : i32
    %c0_i32_235 = arith.constant 0 : i32
    %512 = arith.subi %c0_i32_235, %arg0 : i32
    %c8_i32_236 = arith.constant 8 : i32
    %513 = arith.muli %512, %c8_i32_236 : i32
    %514 = arith.addi %513, %511 : i32
    %515 = vector.broadcast %514 : i32 to vector<2x1xi32>
    %516 = arith.cmpi slt, %515, %5 : vector<2x1xi32>
    %517 = arith.index_cast %511 : i32 to index
    %c0_237 = arith.constant 0 : index
    %c0_238 = arith.constant 0 : index
    %518 = vector.load %arg2[%517, %c0_237, %c0_238] : memref<8x2x128xf32, #tpu.memory_space<vmem>>, vector<1x2x128xf32>
    %519 = vector.shape_cast %518 : vector<1x2x128xf32> to vector<2x128xf32>
    %c0_239 = arith.constant 0 : index
    %c0_240 = arith.constant 0 : index
    %520 = vector.load %arg10[%c0_239, %c0_240] : memref<2x32xf32, #tpu.memory_space<vmem>>, vector<2x32xf32>
    %c0_241 = arith.constant 0 : index
    %c0_242 = arith.constant 0 : index
    %521 = vector.load %arg11[%c0_241, %c0_242] : memref<2x32xf32, #tpu.memory_space<vmem>>, vector<2x32xf32>
    %cst_243 = arith.constant dense<0.000000e+00> : vector<2x128xf32>
    %522 = tpu.matmul %520, %4, %cst_243 {dimension_numbers = #tpu.dot_dimension_numbers<[1], [0], [0], [1], [0, 0, 1, 1], [], []>} : vector<2x32xf32>, vector<32x128xf32>, vector<2x128xf32> -> vector<2x128xf32>
    %523 = arith.addf %519, %522 : vector<2x128xf32>
    %524 = vector.extract_strided_slice %523 {offsets = [0, 0], sizes = [2, 96], strides = [1, 1]} : vector<2x128xf32> to vector<2x96xf32>
    %525 = arith.negf %524 : vector<2x96xf32>
    %526 = math.exp %525 : vector<2x96xf32>
    %cst_244 = arith.constant 1.000000e+00 : f32
    %527 = vector.broadcast %cst_244 : f32 to vector<2x96xf32>
    %528 = arith.addf %527, %526 : vector<2x96xf32>
    %529 = arith.divf %527, %528 : vector<2x96xf32>
    %530 = vector.extract_strided_slice %529 {offsets = [0, 0], sizes = [2, 32], strides = [1, 1]} : vector<2x96xf32> to vector<2x32xf32>
    %531 = vector.extract_strided_slice %529 {offsets = [0, 32], sizes = [2, 32], strides = [1, 1]} : vector<2x96xf32> to vector<2x32xf32>
    %532 = vector.extract_strided_slice %529 {offsets = [0, 64], sizes = [2, 32], strides = [1, 1]} : vector<2x96xf32> to vector<2x32xf32>
    %533 = vector.extract_strided_slice %523 {offsets = [0, 96], sizes = [2, 32], strides = [1, 1]} : vector<2x128xf32> to vector<2x32xf32>
    %534 = math.tanh %533 : vector<2x32xf32>
    %535 = arith.mulf %531, %521 : vector<2x32xf32>
    %536 = arith.mulf %530, %534 : vector<2x32xf32>
    %537 = arith.addf %535, %536 : vector<2x32xf32>
    %538 = math.tanh %537 : vector<2x32xf32>
    %539 = arith.mulf %532, %538 : vector<2x32xf32>
    %c0_245 = arith.constant 0 : index
    %c0_246 = arith.constant 0 : index
    %540 = vector.load %arg10[%c0_245, %c0_246] : memref<2x32xf32, #tpu.memory_space<vmem>>, vector<2x32xf32>
    %541 = vector.shape_cast %516 : vector<2x1xi1> to vector<2x1xi1>
    %542 = vector.broadcast %541 : vector<2x1xi1> to vector<2x32xi1>
    %543 = arith.select %542, %539, %540 : vector<2x32xi1>, vector<2x32xf32>
    %c0_247 = arith.constant 0 : index
    %c0_248 = arith.constant 0 : index
    %544 = vector.load %arg10[%c0_247, %c0_248] : memref<2x32xf32, #tpu.memory_space<vmem>>, vector<2x32xf32>
    tpu.vector_store %arg10[%c0_247, %c0_248], %543 {strides = array<i32>} : memref<2x32xf32, #tpu.memory_space<vmem>>, vector<2x32xf32>,
    %c0_249 = arith.constant 0 : index
    %c0_250 = arith.constant 0 : index
    %545 = vector.load %arg11[%c0_249, %c0_250] : memref<2x32xf32, #tpu.memory_space<vmem>>, vector<2x32xf32>
    %546 = vector.shape_cast %516 : vector<2x1xi1> to vector<2x1xi1>
    %547 = vector.broadcast %546 : vector<2x1xi1> to vector<2x32xi1>
    %548 = arith.select %547, %537, %545 : vector<2x32xi1>, vector<2x32xf32>
    %c0_251 = arith.constant 0 : index
    %c0_252 = arith.constant 0 : index
    %549 = vector.load %arg11[%c0_251, %c0_252] : memref<2x32xf32, #tpu.memory_space<vmem>>, vector<2x32xf32>
    tpu.vector_store %arg11[%c0_251, %c0_252], %548 {strides = array<i32>} : memref<2x32xf32, #tpu.memory_space<vmem>>, vector<2x32xf32>,
    %cst_253 = arith.constant 0.000000e+00 : f32
    %550 = vector.shape_cast %516 : vector<2x1xi1> to vector<2x1xi1>
    %551 = vector.broadcast %550 : vector<2x1xi1> to vector<2x32xi1>
    %552 = vector.broadcast %cst_253 : f32 to vector<2x32xf32>
    %553 = arith.select %551, %543, %552 : vector<2x32xi1>, vector<2x32xf32>
    %554 = arith.index_cast %511 : i32 to index
    %c0_254 = arith.constant 0 : index
    %c0_255 = arith.constant 0 : index
    %555 = vector.load %arg7[%554, %c0_254, %c0_255] : memref<8x2x32xf32, #tpu.memory_space<vmem>>, vector<1x2x32xf32>
    %556 = vector.shape_cast %555 : vector<1x2x32xf32> to vector<2x32xf32>
    %557 = vector.shape_cast %553 : vector<2x32xf32> to vector<1x2x32xf32>
    tpu.vector_store %arg7[%554, %c0_254, %c0_255], %557 {strides = array<i32>} : memref<8x2x32xf32, #tpu.memory_space<vmem>>, vector<1x2x32xf32>,
    %c6_i32 = arith.constant 6 : i32
    %c8_i32_256 = arith.constant 8 : i32
    %558 = arith.muli %arg0, %c8_i32_256 : i32
    %559 = arith.addi %558, %c6_i32 : i32
    %560 = vector.broadcast %559 : i32 to vector<2x1xi32>
    %561 = arith.cmpi slt, %560, %5 : vector<2x1xi32>
    %562 = arith.index_cast %c6_i32 : i32 to index
    %c0_257 = arith.constant 0 : index
    %c0_258 = arith.constant 0 : index
    %563 = vector.load %arg1[%562, %c0_257, %c0_258] : memref<8x2x128xf32, #tpu.memory_space<vmem>>, vector<1x2x128xf32>
    %564 = vector.shape_cast %563 : vector<1x2x128xf32> to vector<2x128xf32>
    %c0_259 = arith.constant 0 : index
    %c0_260 = arith.constant 0 : index
    %565 = vector.load %arg8[%c0_259, %c0_260] : memref<2x32xf32, #tpu.memory_space<vmem>>, vector<2x32xf32>
    %c0_261 = arith.constant 0 : index
    %c0_262 = arith.constant 0 : index
    %566 = vector.load %arg9[%c0_261, %c0_262] : memref<2x32xf32, #tpu.memory_space<vmem>>, vector<2x32xf32>
    %cst_263 = arith.constant dense<0.000000e+00> : vector<2x128xf32>
    %567 = tpu.matmul %565, %3, %cst_263 {dimension_numbers = #tpu.dot_dimension_numbers<[1], [0], [0], [1], [0, 0, 1, 1], [], []>} : vector<2x32xf32>, vector<32x128xf32>, vector<2x128xf32> -> vector<2x128xf32>
    %568 = arith.addf %564, %567 : vector<2x128xf32>
    %569 = vector.extract_strided_slice %568 {offsets = [0, 0], sizes = [2, 96], strides = [1, 1]} : vector<2x128xf32> to vector<2x96xf32>
    %570 = arith.negf %569 : vector<2x96xf32>
    %571 = math.exp %570 : vector<2x96xf32>
    %cst_264 = arith.constant 1.000000e+00 : f32
    %572 = vector.broadcast %cst_264 : f32 to vector<2x96xf32>
    %573 = arith.addf %572, %571 : vector<2x96xf32>
    %574 = arith.divf %572, %573 : vector<2x96xf32>
    %575 = vector.extract_strided_slice %574 {offsets = [0, 0], sizes = [2, 32], strides = [1, 1]} : vector<2x96xf32> to vector<2x32xf32>
    %576 = vector.extract_strided_slice %574 {offsets = [0, 32], sizes = [2, 32], strides = [1, 1]} : vector<2x96xf32> to vector<2x32xf32>
    %577 = vector.extract_strided_slice %574 {offsets = [0, 64], sizes = [2, 32], strides = [1, 1]} : vector<2x96xf32> to vector<2x32xf32>
    %578 = vector.extract_strided_slice %568 {offsets = [0, 96], sizes = [2, 32], strides = [1, 1]} : vector<2x128xf32> to vector<2x32xf32>
    %579 = math.tanh %578 : vector<2x32xf32>
    %580 = arith.mulf %576, %566 : vector<2x32xf32>
    %581 = arith.mulf %575, %579 : vector<2x32xf32>
    %582 = arith.addf %580, %581 : vector<2x32xf32>
    %583 = math.tanh %582 : vector<2x32xf32>
    %584 = arith.mulf %577, %583 : vector<2x32xf32>
    %c0_265 = arith.constant 0 : index
    %c0_266 = arith.constant 0 : index
    %585 = vector.load %arg8[%c0_265, %c0_266] : memref<2x32xf32, #tpu.memory_space<vmem>>, vector<2x32xf32>
    %586 = vector.shape_cast %561 : vector<2x1xi1> to vector<2x1xi1>
    %587 = vector.broadcast %586 : vector<2x1xi1> to vector<2x32xi1>
    %588 = arith.select %587, %584, %585 : vector<2x32xi1>, vector<2x32xf32>
    %c0_267 = arith.constant 0 : index
    %c0_268 = arith.constant 0 : index
    %589 = vector.load %arg8[%c0_267, %c0_268] : memref<2x32xf32, #tpu.memory_space<vmem>>, vector<2x32xf32>
    tpu.vector_store %arg8[%c0_267, %c0_268], %588 {strides = array<i32>} : memref<2x32xf32, #tpu.memory_space<vmem>>, vector<2x32xf32>,
    %c0_269 = arith.constant 0 : index
    %c0_270 = arith.constant 0 : index
    %590 = vector.load %arg9[%c0_269, %c0_270] : memref<2x32xf32, #tpu.memory_space<vmem>>, vector<2x32xf32>
    %591 = vector.shape_cast %561 : vector<2x1xi1> to vector<2x1xi1>
    %592 = vector.broadcast %591 : vector<2x1xi1> to vector<2x32xi1>
    %593 = arith.select %592, %582, %590 : vector<2x32xi1>, vector<2x32xf32>
    %c0_271 = arith.constant 0 : index
    %c0_272 = arith.constant 0 : index
    %594 = vector.load %arg9[%c0_271, %c0_272] : memref<2x32xf32, #tpu.memory_space<vmem>>, vector<2x32xf32>
    tpu.vector_store %arg9[%c0_271, %c0_272], %593 {strides = array<i32>} : memref<2x32xf32, #tpu.memory_space<vmem>>, vector<2x32xf32>,
    %cst_273 = arith.constant 0.000000e+00 : f32
    %595 = vector.shape_cast %561 : vector<2x1xi1> to vector<2x1xi1>
    %596 = vector.broadcast %595 : vector<2x1xi1> to vector<2x32xi1>
    %597 = vector.broadcast %cst_273 : f32 to vector<2x32xf32>
    %598 = arith.select %596, %588, %597 : vector<2x32xi1>, vector<2x32xf32>
    %599 = arith.index_cast %c6_i32 : i32 to index
    %c0_274 = arith.constant 0 : index
    %c0_275 = arith.constant 0 : index
    %600 = vector.load %arg6[%599, %c0_274, %c0_275] : memref<8x2x32xf32, #tpu.memory_space<vmem>>, vector<1x2x32xf32>
    %601 = vector.shape_cast %600 : vector<1x2x32xf32> to vector<2x32xf32>
    %602 = vector.shape_cast %598 : vector<2x32xf32> to vector<1x2x32xf32>
    tpu.vector_store %arg6[%599, %c0_274, %c0_275], %602 {strides = array<i32>} : memref<8x2x32xf32, #tpu.memory_space<vmem>>, vector<1x2x32xf32>,
    %c7_i32_276 = arith.constant 7 : i32
    %603 = arith.subi %c7_i32_276, %c6_i32 : i32
    %c0_i32_277 = arith.constant 0 : i32
    %604 = arith.subi %c0_i32_277, %arg0 : i32
    %c8_i32_278 = arith.constant 8 : i32
    %605 = arith.muli %604, %c8_i32_278 : i32
    %606 = arith.addi %605, %603 : i32
    %607 = vector.broadcast %606 : i32 to vector<2x1xi32>
    %608 = arith.cmpi slt, %607, %5 : vector<2x1xi32>
    %609 = arith.index_cast %603 : i32 to index
    %c0_279 = arith.constant 0 : index
    %c0_280 = arith.constant 0 : index
    %610 = vector.load %arg2[%609, %c0_279, %c0_280] : memref<8x2x128xf32, #tpu.memory_space<vmem>>, vector<1x2x128xf32>
    %611 = vector.shape_cast %610 : vector<1x2x128xf32> to vector<2x128xf32>
    %c0_281 = arith.constant 0 : index
    %c0_282 = arith.constant 0 : index
    %612 = vector.load %arg10[%c0_281, %c0_282] : memref<2x32xf32, #tpu.memory_space<vmem>>, vector<2x32xf32>
    %c0_283 = arith.constant 0 : index
    %c0_284 = arith.constant 0 : index
    %613 = vector.load %arg11[%c0_283, %c0_284] : memref<2x32xf32, #tpu.memory_space<vmem>>, vector<2x32xf32>
    %cst_285 = arith.constant dense<0.000000e+00> : vector<2x128xf32>
    %614 = tpu.matmul %612, %4, %cst_285 {dimension_numbers = #tpu.dot_dimension_numbers<[1], [0], [0], [1], [0, 0, 1, 1], [], []>} : vector<2x32xf32>, vector<32x128xf32>, vector<2x128xf32> -> vector<2x128xf32>
    %615 = arith.addf %611, %614 : vector<2x128xf32>
    %616 = vector.extract_strided_slice %615 {offsets = [0, 0], sizes = [2, 96], strides = [1, 1]} : vector<2x128xf32> to vector<2x96xf32>
    %617 = arith.negf %616 : vector<2x96xf32>
    %618 = math.exp %617 : vector<2x96xf32>
    %cst_286 = arith.constant 1.000000e+00 : f32
    %619 = vector.broadcast %cst_286 : f32 to vector<2x96xf32>
    %620 = arith.addf %619, %618 : vector<2x96xf32>
    %621 = arith.divf %619, %620 : vector<2x96xf32>
    %622 = vector.extract_strided_slice %621 {offsets = [0, 0], sizes = [2, 32], strides = [1, 1]} : vector<2x96xf32> to vector<2x32xf32>
    %623 = vector.extract_strided_slice %621 {offsets = [0, 32], sizes = [2, 32], strides = [1, 1]} : vector<2x96xf32> to vector<2x32xf32>
    %624 = vector.extract_strided_slice %621 {offsets = [0, 64], sizes = [2, 32], strides = [1, 1]} : vector<2x96xf32> to vector<2x32xf32>
    %625 = vector.extract_strided_slice %615 {offsets = [0, 96], sizes = [2, 32], strides = [1, 1]} : vector<2x128xf32> to vector<2x32xf32>
    %626 = math.tanh %625 : vector<2x32xf32>
    %627 = arith.mulf %623, %613 : vector<2x32xf32>
    %628 = arith.mulf %622, %626 : vector<2x32xf32>
    %629 = arith.addf %627, %628 : vector<2x32xf32>
    %630 = math.tanh %629 : vector<2x32xf32>
    %631 = arith.mulf %624, %630 : vector<2x32xf32>
    %c0_287 = arith.constant 0 : index
    %c0_288 = arith.constant 0 : index
    %632 = vector.load %arg10[%c0_287, %c0_288] : memref<2x32xf32, #tpu.memory_space<vmem>>, vector<2x32xf32>
    %633 = vector.shape_cast %608 : vector<2x1xi1> to vector<2x1xi1>
    %634 = vector.broadcast %633 : vector<2x1xi1> to vector<2x32xi1>
    %635 = arith.select %634, %631, %632 : vector<2x32xi1>, vector<2x32xf32>
    %c0_289 = arith.constant 0 : index
    %c0_290 = arith.constant 0 : index
    %636 = vector.load %arg10[%c0_289, %c0_290] : memref<2x32xf32, #tpu.memory_space<vmem>>, vector<2x32xf32>
    tpu.vector_store %arg10[%c0_289, %c0_290], %635 {strides = array<i32>} : memref<2x32xf32, #tpu.memory_space<vmem>>, vector<2x32xf32>,
    %c0_291 = arith.constant 0 : index
    %c0_292 = arith.constant 0 : index
    %637 = vector.load %arg11[%c0_291, %c0_292] : memref<2x32xf32, #tpu.memory_space<vmem>>, vector<2x32xf32>
    %638 = vector.shape_cast %608 : vector<2x1xi1> to vector<2x1xi1>
    %639 = vector.broadcast %638 : vector<2x1xi1> to vector<2x32xi1>
    %640 = arith.select %639, %629, %637 : vector<2x32xi1>, vector<2x32xf32>
    %c0_293 = arith.constant 0 : index
    %c0_294 = arith.constant 0 : index
    %641 = vector.load %arg11[%c0_293, %c0_294] : memref<2x32xf32, #tpu.memory_space<vmem>>, vector<2x32xf32>
    tpu.vector_store %arg11[%c0_293, %c0_294], %640 {strides = array<i32>} : memref<2x32xf32, #tpu.memory_space<vmem>>, vector<2x32xf32>,
    %cst_295 = arith.constant 0.000000e+00 : f32
    %642 = vector.shape_cast %608 : vector<2x1xi1> to vector<2x1xi1>
    %643 = vector.broadcast %642 : vector<2x1xi1> to vector<2x32xi1>
    %644 = vector.broadcast %cst_295 : f32 to vector<2x32xf32>
    %645 = arith.select %643, %635, %644 : vector<2x32xi1>, vector<2x32xf32>
    %646 = arith.index_cast %603 : i32 to index
    %c0_296 = arith.constant 0 : index
    %c0_297 = arith.constant 0 : index
    %647 = vector.load %arg7[%646, %c0_296, %c0_297] : memref<8x2x32xf32, #tpu.memory_space<vmem>>, vector<1x2x32xf32>
    %648 = vector.shape_cast %647 : vector<1x2x32xf32> to vector<2x32xf32>
    %649 = vector.shape_cast %645 : vector<2x32xf32> to vector<1x2x32xf32>
    tpu.vector_store %arg7[%646, %c0_296, %c0_297], %649 {strides = array<i32>} : memref<8x2x32xf32, #tpu.memory_space<vmem>>, vector<1x2x32xf32>,
    %c7_i32_298 = arith.constant 7 : i32
    %c8_i32_299 = arith.constant 8 : i32
    %650 = arith.muli %arg0, %c8_i32_299 : i32
    %651 = arith.addi %650, %c7_i32_298 : i32
    %652 = vector.broadcast %651 : i32 to vector<2x1xi32>
    %653 = arith.cmpi slt, %652, %5 : vector<2x1xi32>
    %654 = arith.index_cast %c7_i32_298 : i32 to index
    %c0_300 = arith.constant 0 : index
    %c0_301 = arith.constant 0 : index
    %655 = vector.load %arg1[%654, %c0_300, %c0_301] : memref<8x2x128xf32, #tpu.memory_space<vmem>>, vector<1x2x128xf32>
    %656 = vector.shape_cast %655 : vector<1x2x128xf32> to vector<2x128xf32>
    %c0_302 = arith.constant 0 : index
    %c0_303 = arith.constant 0 : index
    %657 = vector.load %arg8[%c0_302, %c0_303] : memref<2x32xf32, #tpu.memory_space<vmem>>, vector<2x32xf32>
    %c0_304 = arith.constant 0 : index
    %c0_305 = arith.constant 0 : index
    %658 = vector.load %arg9[%c0_304, %c0_305] : memref<2x32xf32, #tpu.memory_space<vmem>>, vector<2x32xf32>
    %cst_306 = arith.constant dense<0.000000e+00> : vector<2x128xf32>
    %659 = tpu.matmul %657, %3, %cst_306 {dimension_numbers = #tpu.dot_dimension_numbers<[1], [0], [0], [1], [0, 0, 1, 1], [], []>} : vector<2x32xf32>, vector<32x128xf32>, vector<2x128xf32> -> vector<2x128xf32>
    %660 = arith.addf %656, %659 : vector<2x128xf32>
    %661 = vector.extract_strided_slice %660 {offsets = [0, 0], sizes = [2, 96], strides = [1, 1]} : vector<2x128xf32> to vector<2x96xf32>
    %662 = arith.negf %661 : vector<2x96xf32>
    %663 = math.exp %662 : vector<2x96xf32>
    %cst_307 = arith.constant 1.000000e+00 : f32
    %664 = vector.broadcast %cst_307 : f32 to vector<2x96xf32>
    %665 = arith.addf %664, %663 : vector<2x96xf32>
    %666 = arith.divf %664, %665 : vector<2x96xf32>
    %667 = vector.extract_strided_slice %666 {offsets = [0, 0], sizes = [2, 32], strides = [1, 1]} : vector<2x96xf32> to vector<2x32xf32>
    %668 = vector.extract_strided_slice %666 {offsets = [0, 32], sizes = [2, 32], strides = [1, 1]} : vector<2x96xf32> to vector<2x32xf32>
    %669 = vector.extract_strided_slice %666 {offsets = [0, 64], sizes = [2, 32], strides = [1, 1]} : vector<2x96xf32> to vector<2x32xf32>
    %670 = vector.extract_strided_slice %660 {offsets = [0, 96], sizes = [2, 32], strides = [1, 1]} : vector<2x128xf32> to vector<2x32xf32>
    %671 = math.tanh %670 : vector<2x32xf32>
    %672 = arith.mulf %668, %658 : vector<2x32xf32>
    %673 = arith.mulf %667, %671 : vector<2x32xf32>
    %674 = arith.addf %672, %673 : vector<2x32xf32>
    %675 = math.tanh %674 : vector<2x32xf32>
    %676 = arith.mulf %669, %675 : vector<2x32xf32>
    %c0_308 = arith.constant 0 : index
    %c0_309 = arith.constant 0 : index
    %677 = vector.load %arg8[%c0_308, %c0_309] : memref<2x32xf32, #tpu.memory_space<vmem>>, vector<2x32xf32>
    %678 = vector.shape_cast %653 : vector<2x1xi1> to vector<2x1xi1>
    %679 = vector.broadcast %678 : vector<2x1xi1> to vector<2x32xi1>
    %680 = arith.select %679, %676, %677 : vector<2x32xi1>, vector<2x32xf32>
    %c0_310 = arith.constant 0 : index
    %c0_311 = arith.constant 0 : index
    %681 = vector.load %arg8[%c0_310, %c0_311] : memref<2x32xf32, #tpu.memory_space<vmem>>, vector<2x32xf32>
    tpu.vector_store %arg8[%c0_310, %c0_311], %680 {strides = array<i32>} : memref<2x32xf32, #tpu.memory_space<vmem>>, vector<2x32xf32>,
    %c0_312 = arith.constant 0 : index
    %c0_313 = arith.constant 0 : index
    %682 = vector.load %arg9[%c0_312, %c0_313] : memref<2x32xf32, #tpu.memory_space<vmem>>, vector<2x32xf32>
    %683 = vector.shape_cast %653 : vector<2x1xi1> to vector<2x1xi1>
    %684 = vector.broadcast %683 : vector<2x1xi1> to vector<2x32xi1>
    %685 = arith.select %684, %674, %682 : vector<2x32xi1>, vector<2x32xf32>
    %c0_314 = arith.constant 0 : index
    %c0_315 = arith.constant 0 : index
    %686 = vector.load %arg9[%c0_314, %c0_315] : memref<2x32xf32, #tpu.memory_space<vmem>>, vector<2x32xf32>
    tpu.vector_store %arg9[%c0_314, %c0_315], %685 {strides = array<i32>} : memref<2x32xf32, #tpu.memory_space<vmem>>, vector<2x32xf32>,
    %cst_316 = arith.constant 0.000000e+00 : f32
    %687 = vector.shape_cast %653 : vector<2x1xi1> to vector<2x1xi1>
    %688 = vector.broadcast %687 : vector<2x1xi1> to vector<2x32xi1>
    %689 = vector.broadcast %cst_316 : f32 to vector<2x32xf32>
    %690 = arith.select %688, %680, %689 : vector<2x32xi1>, vector<2x32xf32>
    %691 = arith.index_cast %c7_i32_298 : i32 to index
    %c0_317 = arith.constant 0 : index
    %c0_318 = arith.constant 0 : index
    %692 = vector.load %arg6[%691, %c0_317, %c0_318] : memref<8x2x32xf32, #tpu.memory_space<vmem>>, vector<1x2x32xf32>
    %693 = vector.shape_cast %692 : vector<1x2x32xf32> to vector<2x32xf32>
    %694 = vector.shape_cast %690 : vector<2x32xf32> to vector<1x2x32xf32>
    tpu.vector_store %arg6[%691, %c0_317, %c0_318], %694 {strides = array<i32>} : memref<8x2x32xf32, #tpu.memory_space<vmem>>, vector<1x2x32xf32>,
    %c7_i32_319 = arith.constant 7 : i32
    %695 = arith.subi %c7_i32_319, %c7_i32_298 : i32
    %c0_i32_320 = arith.constant 0 : i32
    %696 = arith.subi %c0_i32_320, %arg0 : i32
    %c8_i32_321 = arith.constant 8 : i32
    %697 = arith.muli %696, %c8_i32_321 : i32
    %698 = arith.addi %697, %695 : i32
    %699 = vector.broadcast %698 : i32 to vector<2x1xi32>
    %700 = arith.cmpi slt, %699, %5 : vector<2x1xi32>
    %701 = arith.index_cast %695 : i32 to index
    %c0_322 = arith.constant 0 : index
    %c0_323 = arith.constant 0 : index
    %702 = vector.load %arg2[%701, %c0_322, %c0_323] : memref<8x2x128xf32, #tpu.memory_space<vmem>>, vector<1x2x128xf32>
    %703 = vector.shape_cast %702 : vector<1x2x128xf32> to vector<2x128xf32>
    %c0_324 = arith.constant 0 : index
    %c0_325 = arith.constant 0 : index
    %704 = vector.load %arg10[%c0_324, %c0_325] : memref<2x32xf32, #tpu.memory_space<vmem>>, vector<2x32xf32>
    %c0_326 = arith.constant 0 : index
    %c0_327 = arith.constant 0 : index
    %705 = vector.load %arg11[%c0_326, %c0_327] : memref<2x32xf32, #tpu.memory_space<vmem>>, vector<2x32xf32>
    %cst_328 = arith.constant dense<0.000000e+00> : vector<2x128xf32>
    %706 = tpu.matmul %704, %4, %cst_328 {dimension_numbers = #tpu.dot_dimension_numbers<[1], [0], [0], [1], [0, 0, 1, 1], [], []>} : vector<2x32xf32>, vector<32x128xf32>, vector<2x128xf32> -> vector<2x128xf32>
    %707 = arith.addf %703, %706 : vector<2x128xf32>
    %708 = vector.extract_strided_slice %707 {offsets = [0, 0], sizes = [2, 96], strides = [1, 1]} : vector<2x128xf32> to vector<2x96xf32>
    %709 = arith.negf %708 : vector<2x96xf32>
    %710 = math.exp %709 : vector<2x96xf32>
    %cst_329 = arith.constant 1.000000e+00 : f32
    %711 = vector.broadcast %cst_329 : f32 to vector<2x96xf32>
    %712 = arith.addf %711, %710 : vector<2x96xf32>
    %713 = arith.divf %711, %712 : vector<2x96xf32>
    %714 = vector.extract_strided_slice %713 {offsets = [0, 0], sizes = [2, 32], strides = [1, 1]} : vector<2x96xf32> to vector<2x32xf32>
    %715 = vector.extract_strided_slice %713 {offsets = [0, 32], sizes = [2, 32], strides = [1, 1]} : vector<2x96xf32> to vector<2x32xf32>
    %716 = vector.extract_strided_slice %713 {offsets = [0, 64], sizes = [2, 32], strides = [1, 1]} : vector<2x96xf32> to vector<2x32xf32>
    %717 = vector.extract_strided_slice %707 {offsets = [0, 96], sizes = [2, 32], strides = [1, 1]} : vector<2x128xf32> to vector<2x32xf32>
    %718 = math.tanh %717 : vector<2x32xf32>
    %719 = arith.mulf %715, %705 : vector<2x32xf32>
    %720 = arith.mulf %714, %718 : vector<2x32xf32>
    %721 = arith.addf %719, %720 : vector<2x32xf32>
    %722 = math.tanh %721 : vector<2x32xf32>
    %723 = arith.mulf %716, %722 : vector<2x32xf32>
    %c0_330 = arith.constant 0 : index
    %c0_331 = arith.constant 0 : index
    %724 = vector.load %arg10[%c0_330, %c0_331] : memref<2x32xf32, #tpu.memory_space<vmem>>, vector<2x32xf32>
    %725 = vector.shape_cast %700 : vector<2x1xi1> to vector<2x1xi1>
    %726 = vector.broadcast %725 : vector<2x1xi1> to vector<2x32xi1>
    %727 = arith.select %726, %723, %724 : vector<2x32xi1>, vector<2x32xf32>
    %c0_332 = arith.constant 0 : index
    %c0_333 = arith.constant 0 : index
    %728 = vector.load %arg10[%c0_332, %c0_333] : memref<2x32xf32, #tpu.memory_space<vmem>>, vector<2x32xf32>
    tpu.vector_store %arg10[%c0_332, %c0_333], %727 {strides = array<i32>} : memref<2x32xf32, #tpu.memory_space<vmem>>, vector<2x32xf32>,
    %c0_334 = arith.constant 0 : index
    %c0_335 = arith.constant 0 : index
    %729 = vector.load %arg11[%c0_334, %c0_335] : memref<2x32xf32, #tpu.memory_space<vmem>>, vector<2x32xf32>
    %730 = vector.shape_cast %700 : vector<2x1xi1> to vector<2x1xi1>
    %731 = vector.broadcast %730 : vector<2x1xi1> to vector<2x32xi1>
    %732 = arith.select %731, %721, %729 : vector<2x32xi1>, vector<2x32xf32>
    %c0_336 = arith.constant 0 : index
    %c0_337 = arith.constant 0 : index
    %733 = vector.load %arg11[%c0_336, %c0_337] : memref<2x32xf32, #tpu.memory_space<vmem>>, vector<2x32xf32>
    tpu.vector_store %arg11[%c0_336, %c0_337], %732 {strides = array<i32>} : memref<2x32xf32, #tpu.memory_space<vmem>>, vector<2x32xf32>,
    %cst_338 = arith.constant 0.000000e+00 : f32
    %734 = vector.shape_cast %700 : vector<2x1xi1> to vector<2x1xi1>
    %735 = vector.broadcast %734 : vector<2x1xi1> to vector<2x32xi1>
    %736 = vector.broadcast %cst_338 : f32 to vector<2x32xf32>
    %737 = arith.select %735, %727, %736 : vector<2x32xi1>, vector<2x32xf32>
    %738 = arith.index_cast %695 : i32 to index
    %c0_339 = arith.constant 0 : index
    %c0_340 = arith.constant 0 : index
    %739 = vector.load %arg7[%738, %c0_339, %c0_340] : memref<8x2x32xf32, #tpu.memory_space<vmem>>, vector<1x2x32xf32>
    %740 = vector.shape_cast %739 : vector<1x2x32xf32> to vector<2x32xf32>
    %741 = vector.shape_cast %737 : vector<2x32xf32> to vector<1x2x32xf32>
    tpu.vector_store %arg7[%738, %c0_339, %c0_340], %741 {strides = array<i32>} : memref<8x2x32xf32, #tpu.memory_space<vmem>>, vector<1x2x32xf32>,
    %c8_i32_341 = arith.constant 8 : i32
    return
  }
  func.func @transform_0(%arg0: i32) -> (i32, i32, i32) {
    %c0_i32 = arith.constant 0 : i32
    %c0_i32_0 = arith.constant 0 : i32
    %c0_i32_1 = arith.constant 0 : i32
    return %arg0, %c0_i32, %c0_i32_0 : i32, i32, i32
  }
  func.func @transform_1(%arg0: i32) -> (i32, i32, i32) {
    %c0_i32 = arith.constant 0 : i32
    %0 = arith.subi %c0_i32, %arg0 : i32
    %c0_i32_0 = arith.constant 0 : i32
    %c0_i32_1 = arith.constant 0 : i32
    %c0_i32_2 = arith.constant 0 : i32
    return %0, %c0_i32_0, %c0_i32_1 : i32, i32, i32
  }
  func.func @transform_2(%arg0: i32) -> (i32, i32) {
    %c0_i32 = arith.constant 0 : i32
    %c0_i32_0 = arith.constant 0 : i32
    %c0_i32_1 = arith.constant 0 : i32
    return %c0_i32, %c0_i32_0 : i32, i32
  }
  func.func @transform_3(%arg0: i32) -> (i32, i32) {
    %c0_i32 = arith.constant 0 : i32
    %c0_i32_0 = arith.constant 0 : i32
    %c0_i32_1 = arith.constant 0 : i32
    return %c0_i32, %c0_i32_0 : i32, i32
  }
  func.func @transform_4(%arg0: i32) -> (i32, i32) {
    %c0_i32 = arith.constant 0 : i32
    %c0_i32_0 = arith.constant 0 : i32
    %c0_i32_1 = arith.constant 0 : i32
    return %c0_i32, %c0_i32_0 : i32, i32
  }
  func.func @transform_5(%arg0: i32) -> (i32, i32, i32) {
    %c0_i32 = arith.constant 0 : i32
    %c0_i32_0 = arith.constant 0 : i32
    %c0_i32_1 = arith.constant 0 : i32
    return %arg0, %c0_i32, %c0_i32_0 : i32, i32, i32
  }
  func.func @transform_6(%arg0: i32) -> (i32, i32, i32) {
    %c0_i32 = arith.constant 0 : i32
    %0 = arith.subi %c0_i32, %arg0 : i32
    %c0_i32_0 = arith.constant 0 : i32
    %c0_i32_1 = arith.constant 0 : i32
    %c0_i32_2 = arith.constant 0 : i32
    return %0, %c0_i32_0, %c0_i32_1 : i32, i32, i32
  }
}

</mosaic_0001>

<bundles_post_ra>
// kernel: blstm_encoder_v1.2
= control target key start
LH: loop header
LB: loop body
LE: loop exit
PB: predicated region body
PF: predicated region fallthrough
CT: control target
= control target key end

     0   :  { %vm62_vm0 = vcmask 254976   ;;  %v2932_v0 = vmov 0.0|0.0   ;;  %v2933_v4 = vmov 0.0   ;;  %vm2934_vm1 = vmmov 0   ;;  %s2938_s18 = smov 96   ;;  %s3721_s2 = inlined_call_operand.vmem [shape: f32[32,128], index: 2, kind: input, shape index: {}]   ;;  %s3722_s3 = inlined_call_operand.vmem [shape: f32[32,128], index: 3, kind: input, shape index: {}]   ;;  %s3723_s0 = inlined_call_operand.vmem [shape: f32[8,2,128], index: 0, kind: input, shape index: {}]   ;;  %s3724_s1 = inlined_call_operand.vmem [shape: f32[8,2,128], index: 1, kind: input, shape index: {}]   ;;  %s3725_s4 = inlined_call_operand.vmem [shape: s32[2,1], index: 4, kind: input, shape index: {}]   ;;  %s3726_s5 = inlined_call_operand.vmem [shape: f32[8,2,32], index: 5, kind: output, shape index: {0}]   ;;  %s3727_s6 = inlined_call_operand.vmem [shape: f32[8,2,32], index: 6, kind: output, shape index: {1}]  }
   0x1   :  { %2699 = vmatprep.subr.bf16.mxu0 %v2932_v0  ;;  %v67_v1 = vld [vmem:[%s3721_s2] sm:$0xff]  ;;  %v68_v2 = vld [vmem:[%s3721_s2 + $0x8] sm:$0xff]  ;;  %2705 = vmatprep.subr.bf16.mxu1 %v2932_v0  ;;  %63 = vst.msk [vmem:[#allocation2] sm:$0x3] %vm62_vm0, %v2933_v4  ;;  %64 = vst.msk [vmem:[#allocation3] sm:$0x3] %vm62_vm0, %v2933_v4 }
   0x2   :  { %v71_v3 = vld [vmem:[%s3722_s3] sm:$0xff]  ;;  %65 = vst.msk [vmem:[#allocation4] sm:$0x3] %vm62_vm0, %v2933_v4  ;;  %66 = vst.msk [vmem:[#allocation5] sm:$0x3] %vm62_vm0, %v2933_v4  ;;  %v2993_v5 = vpack.c.bf16 %v68_v2, %v67_v1  ;;  %v72_v6 = vld [vmem:[%s3722_s3 + $0x8] sm:$0xff]  ;;  %2531 = vmatprep.mubr.msk.f32.mxu0 %vm2934_vm1, %v2933_v4  ;;  %2542 = vmatprep.mubr.msk.f32.mxu1 %vm2934_vm1, %v2933_v4 }
   0x3   :  { %v69_v7 = vld [vmem:[%s3721_s2 + $0x10] sm:$0xff]  ;;  %v70_v8 = vld [vmem:[%s3721_s2 + $0x18] sm:$0xff]  ;;  %v3008_v9 = vpack.c.bf16 %v72_v6, %v71_v3  ;;  %vm82_vm2 = vcmask 261120   ;;  %s2935_s2 = smov 32   ;;  %v79_v18 = vld [vmem:[%s3723_s0] sm:$0x3] }
   0x4   :  { %v73_v10 = vld [vmem:[%s3722_s3 + $0x10] sm:$0xff]  ;;  %v74_v11 = vld [vmem:[%s3722_s3 + $0x18] sm:$0xff]  ;;  %2701 = vmatpush3.bf16.msra.mxu0 %v2993_v5  ;;  %v3017_v12 = vpack.c.bf16 %v70_v8, %v69_v7  ;;  %v2371_v19 = vld [vmem:[%s3724_s1 + $0xe] sm:$0x3]  ;;  %v2936_v26 = vmov 0  }
   0x5   :  { %2702 = vmatprep.subr.bf16.mxu0 %v2932_v0  ;;  %2707 = vmatpush3.bf16.msra.mxu1 %v3008_v9  ;;  %v3021_v13 = vpack.c.bf16 %v74_v11, %v73_v10  ;;  %v3063_v37 = vld [vmem:[%s3725_s4] sm:$0x3]  ;;  %s2937_s4 = smov 64  }
   0x6   :  { %2708 = vmatprep.subr.bf16.mxu1 %v2932_v0  ;;  %2803 = vset.pattern.permute.xlu1 %v2936_v26  ;;  %vm2367_vm3 = vcmp.gt.s32.totalorder %v3063_v37, 0  ;;  %vm2370_vm4 = vcmp.gt.s32.totalorder %v3063_v37, 7  ;;  %vm2375_vm7 = vcmp.gt.s32.totalorder %v3063_v37, 1  ;;  %vm2380_vm8 = vcmp.gt.s32.totalorder %v3063_v37, 6 }
   0x7   :  { %2802 = vset.pattern.permute.xlu0 %v2936_v26  ;;  %v3068_v41 = vsel %vm2367_vm3, 1, %v2936_v26  ;;  %v3074_v43 = vsel %vm2370_vm4, 1, %v2936_v26  ;;  %vm2385_vm11 = vcmp.gt.s32.totalorder %v3063_v37, 2  ;;  %vm2390_vm12 = vcmp.gt.s32.totalorder %v3063_v37, 5 }
   0x8   :  { %2704 = vmatpush3.bf16.msra.mxu0 %v3017_v12  ;;  %v3025_v14 = vld [vmem:[#allocation2] sm:$0x3]  ;;  %v81_v15 = vld [vmem:[#allocation3] sm:$0x3]  ;;  %vm2395_vm15 = vcmp.gt.s32.totalorder %v3063_v37, 3  ;;  %vm2400_vm3 = vcmp.gt.s32.totalorder %v3063_v37, 4 }
   0x9   :  { %2710 = vmatpush3.bf16.msra.mxu1 %v3021_v13  ;;  %v3028_v16 = vld [vmem:[#allocation4] sm:$0x3]  ;;  %165 = vrot.lane.b32.xlu1 %v81_v15, %s2935_s2  ;;  %v225_v17 = vld [vmem:[#allocation5] sm:$0x3]  ;;  %v200_v62 = vld [vmem:[#allocation3] sm:$0x3] }
   0xa   :  { %2711 = vmatprep.subr.bf16.mxu0 %v2932_v0  ;;  %2717 = vmatprep.subr.bf16.mxu1 %v2932_v0  ;;  %v342_v2 = vld [vmem:[#allocation5] sm:$0x3] }
   0xb   :  { %2532 = vmatmul.mubr.msk.f32.vlgmr.msra.gmra.mrb[0].mxu0 %vm82_vm2, %v3025_v14 }
   0xc   :  { %2543 = vmatmul.mubr.msk.f32.vlgmr.msra.gmra.mrb[0].mxu1 %vm82_vm2, %v3028_v16  ;;  %2713 = vmatpush3.bf16.msra.mxu0 %v2993_v5 }
   0xd   :  { %308 = vrot.lane.b32.xlu1 %v225_v17, %s2935_s2  ;;  %2714 = vmatprep.subr.bf16.mxu0 %v2932_v0 }
   0xe   :  { %2719 = vmatpush3.bf16.msra.mxu1 %v3008_v9  ;;  %2553 = vmatprep.mubr.msk.f32.mxu0 %vm2934_vm1, %v2933_v4 }
   0xf   :  { %2720 = vmatprep.subr.bf16.mxu1 %v2932_v0  ;;  %2564 = vmatprep.mubr.msk.f32.mxu1 %vm2934_vm1, %v2933_v4 }
  0x10   :  { %2716 = vmatpush3.bf16.msra.mxu0 %v3017_v12 }
  0x11   :  { %2723 = vmatprep.subr.bf16.mxu0 %v2932_v0 }
  0x12   :  { %2722 = vmatpush3.bf16.msra.mxu1 %v3021_v13 }
  0x13   :  { %2729 = vmatprep.subr.bf16.mxu1 %v2932_v0 }
  0x7b   :  { %v166_v44 = vpop.permute.xlu1 %165 }
  0x7f   :  { %v309_v46 = vpop.permute.xlu1 %308 }
  0xde   :  { %v152_v20 = vpop.f32.mrb[0].mxu0 }
  0xdf   :  { %v156_v21 = vadd.f32 %v152_v20, %v79_v18  ;;  %v2533_v22 = vpop.f32.mrb[1].mxu0  ;;  %v295_v23 = vpop.f32.mrb[0].mxu1  ;;  %v2376_v18 = vld [vmem:[%s3723_s0 + $0x2] sm:$0x3] }
  0xe0   :  { %v299_v24 = vadd.f32 %v2371_v19, %v295_v23  ;;  %v2544_v25 = vpop.f32.mrb[1].mxu1  ;;  %v2381_v22 = vld [vmem:[%s3724_s1 + $0xc] sm:$0x3] }
  0xe1   :  { %2804 = vtanh.f32 %v156_v21  ;;  %v2369_v29 = vmul.f32 -1.442695, %v156_v21 }
  0xe2   :  { %2806 = vtanh.f32 %v299_v24  ;;  %v2373_v30 = vmul.f32 -1.442695, %v299_v24 }
  0xe3   :  { %2808 = vpow2.f32 %v2369_v29 }
  0xe4   :  { %2810 = vpow2.f32 %v2373_v30 }
  0xeb   :  { %v2805_v27 = vpop.eup %2804 }
  0xec   :  { %170 = vrot.lane.b32.xlu0 %v2805_v27, %s2935_s2  ;;  %v2807_v28 = vpop.eup %2806 }
  0xed   :  { %v2809_v31 = vpop.eup %2808 }
  0xee   :  { %v160_v32 = vadd.f32 1.0, %v2809_v31  ;;  %v2811_v33 = vpop.eup %2810 }
  0xef   :  { %v303_v34 = vadd.f32 1.0, %v2811_v33 }
  0xf0   :  { %313 = vrot.lane.b32.xlu0 %v2807_v28, %s2935_s2  ;;  %2812 = vrcp.f32 %v160_v32 }
  0xf1   :  { %2814 = vrcp.f32 %v303_v34 }
  0xfa   :  { %v2813_v35 = vpop.eup %2812 }
  0xfb   :  { %v2815_v39 = vpop.eup %2814  ;;  %v168_v45 = vmul.f32 %v2813_v35, %v166_v44 }
  0xfc   :  { %v311_v49 = vmul.f32 %v2815_v39, %v309_v46 }
 0x15e   :  { %v171_v36 = vpop.permute.xlu0 %170 }
 0x15f   :  { %v173_v38 = vmul.f32 %v2813_v35, %v171_v36 }
 0x161   :  { %175 = vrot.lane.b32.xlu0 %v173_v38, %s2935_s2 }
 0x162   :  { %v314_v40 = vpop.permute.xlu0 %313 }
 0x163   :  { %v316_v42 = vmul.f32 %v2815_v39, %v314_v40 }
 0x165   :  { %318 = vrot.lane.b32.xlu1 %v316_v42, %s2935_s2  ;;  %187 = vperm.xlu0 %2802, %v3068_v41  }
 0x169   :  { %330 = vperm.xlu1 %2803, %v3074_v43  }
 0x1d3   :  { %v176_v47 = vpop.permute.xlu0 %175 }
 0x1d4   :  { %v178_v48 = vadd.f32 %v176_v47, %v168_v45  ;;  %v3146_v45 = vsel %vm2375_vm7, 1, %v2936_v26  ;;  %v3152_v47 = vsel %vm2380_vm8, 1, %v2936_v26 }
 0x1d6   :  { %2816 = vtanh.f32 %v178_v48 }
 0x1d7   :  { %v319_v50 = vpop.permute.xlu1 %318 }
 0x1d8   :  { %v321_v51 = vadd.f32 %v319_v50, %v311_v49 }
 0x1da   :  { %2818 = vtanh.f32 %v321_v51 }
 0x1e0   :  { %v2817_v52 = vpop.eup %2816 }
 0x1e1   :  { %181 = vrot.lane.b32.xlu1 %v2817_v52, %s2935_s2 }
 0x1e4   :  { %v2819_v53 = vpop.eup %2818  ;;  %v3085_v55 = vpop.permute.xlu0 %187 }
 0x1e5   :  { %324 = vrot.lane.b32.xlu0 %v2819_v53, %s2935_s2  ;;  %190 = vrot.lane.b32.xlu1 %v3025_v14, %s2937_s4  ;;  %vm189_vm5 = vcmp.eq.s32.totalorder %v3085_v55, 1 }
 0x1e8   :  { %v3083_v54 = vpop.permute.xlu1 %330 }
 0x1e9   :  { %333 = vrot.lane.b32.xlu0 %v3028_v16, %s2937_s4  ;;  %vm332_vm6 = vcmp.eq.s32.totalorder %v3083_v54, 1 }
 0x253   :  { %v182_v56 = vpop.permute.xlu1 %181 }
 0x254   :  { %v3087_v57 = vmul.f32 %v2813_v35, %v182_v56 }
 0x257   :  { %v325_v58 = vpop.permute.xlu0 %324  ;;  %v191_v59 = vpop.permute.xlu1 %190 }
 0x258   :  { %v193_v60 = vsel %vm189_vm5, %v3087_v57, %v191_v59  ;;  %v3094_v61 = vmul.f32 %v2815_v39, %v325_v58 }
 0x259   :  { %195 = vrot.lane.b32.xlu1 %v193_v60, %s2937_s4 }
 0x25b   :  { %v334_v63 = vpop.permute.xlu0 %333 }
 0x25c   :  { %v336_v1 = vsel %vm332_vm6, %v3094_v61, %v334_v63 }
 0x25d   :  { %338 = vrot.lane.b32.xlu0 %v336_v1, %s2937_s4  ;;  %202 = vrot.lane.b32.xlu1 %v200_v62, %s2935_s2 }
 0x261   :  { %344 = vrot.lane.b32.xlu0 %v342_v2, %s2935_s2 }
 0x2cb   :  { %v196_v3 = vpop.permute.xlu1 %195 }
 0x2cc   :  { %199 = vst.msk [vmem:[#allocation2] sm:$0x3] %vm62_vm0, %v196_v3 }
 0x2cf   :  { %v339_v6 = vpop.permute.xlu0 %338  ;;  %v203_v7 = vpop.permute.xlu1 %202 }
 0x2d0   :  { %341 = vst.msk [vmem:[#allocation4] sm:$0x3] %vm62_vm0, %v339_v6  ;;  %v205_v8 = vsel %vm189_vm5, %v178_v48, %v203_v7 }
 0x2d1   :  { %207 = vrot.lane.b32.xlu1 %v205_v8, %s2938_s18 }
 0x2d3   :  { %v345_v10 = vpop.permute.xlu0 %344  ;;  %v3108_v11 = vld [vmem:[#allocation2] sm:$0x3] }
 0x2d4   :  { %2554 = vmatmul.mubr.msk.f32.vlgmr.msra.gmra.mrb[2].mxu0 %vm82_vm2, %v3108_v11  ;;  %v347_v14 = vsel %vm332_vm6, %v321_v51, %v345_v10 }
 0x2d5   :  { %349 = vrot.lane.b32.xlu0 %v347_v14, %s2938_s18  ;;  %2725 = vmatpush3.bf16.msra.mxu0 %v2993_v5 }
 0x2d6   :  { %2726 = vmatprep.subr.bf16.mxu0 %v2932_v0  ;;  %2575 = vmatprep.mubr.msk.f32.mxu0 %vm2934_vm1, %v2933_v4 }
 0x2d7   :  { %v3119_v15 = vld [vmem:[#allocation4] sm:$0x3] }
 0x2d8   :  { %2565 = vmatmul.mubr.msk.f32.vlgmr.msra.gmra.mrb[2].mxu1 %vm82_vm2, %v3119_v15 }
 0x2d9   :  { %2728 = vmatpush3.bf16.msra.mxu0 %v3017_v12  ;;  %2731 = vmatpush3.bf16.msra.mxu1 %v3008_v9 }
 0x2da   :  { %2732 = vmatprep.subr.bf16.mxu1 %v2932_v0  ;;  %2586 = vmatprep.mubr.msk.f32.mxu1 %vm2934_vm1, %v2933_v4 }
 0x2db   :  { %2735 = vmatprep.subr.bf16.mxu0 %v2932_v0 }
 0x2dd   :  { %2734 = vmatpush3.bf16.msra.mxu1 %v3021_v13 }
 0x2de   :  { %2741 = vmatprep.subr.bf16.mxu1 %v2932_v0 }
 0x343   :  { %v208_v16 = vpop.permute.xlu1 %207 }
 0x344   :  { %210 = vst.msk [vmem:[#allocation3] sm:$0x3] %vm62_vm0, %v208_v16 }
 0x347   :  { %v350_v17 = vpop.permute.xlu0 %349 }
 0x348   :  { %352 = vst.msk [vmem:[#allocation5] sm:$0x3] %vm62_vm0, %v350_v17 }
 0x34b   :  { %v366_v29 = vld [vmem:[#allocation3] sm:$0x3] }
 0x34c   :  { %v483_v14 = vld [vmem:[#allocation3] sm:$0x3] }
 0x34f   :  { %v507_v30 = vld [vmem:[#allocation5] sm:$0x3] }
 0x3a7   :  { %v436_v19 = vpop.f32.mrb[2].mxu0 }
 0x3a8   :  { %v440_v20 = vadd.f32 %v2376_v18, %v436_v19  ;;  %v2555_v21 = vpop.f32.mrb[3].mxu0 }
 0x3aa   :  { %2820 = vtanh.f32 %v440_v20  ;;  %v2378_v31 = vmul.f32 -1.442695, %v440_v20 }
 0x3ab   :  { %v577_v23 = vpop.f32.mrb[2].mxu1 }
 0x3ac   :  { %v581_v24 = vadd.f32 %v2381_v22, %v577_v23  ;;  %v2566_v25 = vpop.f32.mrb[3].mxu1 }
 0x3ae   :  { %2822 = vtanh.f32 %v581_v24  ;;  %v2383_v32 = vmul.f32 -1.442695, %v581_v24 }
 0x3af   :  { %2824 = vpow2.f32 %v2378_v31  ;;  %v2391_v31 = vld [vmem:[%s3724_s1 + $0xa] sm:$0x3] }
 0x3b0   :  { %2826 = vpow2.f32 %v2383_v32 }
 0x3b4   :  { %v2821_v27 = vpop.eup %2820 }
 0x3b5   :  { %454 = vrot.lane.b32.xlu1 %v2821_v27, %s2935_s2  ;;  %v2386_v27 = vld [vmem:[%s3723_s0 + $0x4] sm:$0x3] }
 0x3b8   :  { %v2823_v28 = vpop.eup %2822 }
 0x3b9   :  { %595 = vrot.lane.b32.xlu0 %v2823_v28, %s2935_s2  ;;  %449 = vrot.lane.b32.xlu1 %v366_v29, %s2935_s2  ;;  %v2825_v33 = vpop.eup %2824 }
 0x3ba   :  { %v444_v34 = vadd.f32 1.0, %v2825_v33  ;;  %v2827_v35 = vpop.eup %2826 }
 0x3bb   :  { %v585_v36 = vadd.f32 1.0, %v2827_v35 }
 0x3bc   :  { %2828 = vrcp.f32 %v444_v34 }
 0x3bd   :  { %590 = vrot.lane.b32.xlu0 %v507_v30, %s2935_s2  ;;  %2830 = vrcp.f32 %v585_v36 }
 0x3c6   :  { %v2829_v38 = vpop.eup %2828 }
 0x3c7   :  { %v2831_v42 = vpop.eup %2830 }
 0x427   :  { %v455_v39 = vpop.permute.xlu1 %454 }
 0x428   :  { %v457_v40 = vmul.f32 %v2829_v38, %v455_v39 }
 0x42a   :  { %459 = vrot.lane.b32.xlu1 %v457_v40, %s2935_s2 }
 0x42b   :  { %v596_v44 = vpop.permute.xlu0 %595  ;;  %v450_v48 = vpop.permute.xlu1 %449 }
 0x42c   :  { %v598_v46 = vmul.f32 %v2831_v42, %v596_v44  ;;  %v452_v49 = vmul.f32 %v2829_v38, %v450_v48 }
 0x42e   :  { %600 = vrot.lane.b32.xlu0 %v598_v46, %s2935_s2  ;;  %471 = vperm.xlu1 %2803, %v3146_v45  }
 0x42f   :  { %v591_v50 = vpop.permute.xlu0 %590 }
 0x430   :  { %v593_v53 = vmul.f32 %v2831_v42, %v591_v50 }
 0x432   :  { %612 = vperm.xlu0 %2802, %v3152_v47  }
 0x49c   :  { %v460_v51 = vpop.permute.xlu1 %459 }
 0x49d   :  { %v462_v52 = vadd.f32 %v460_v51, %v452_v49 }
 0x49f   :  { %2832 = vtanh.f32 %v462_v52 }
 0x4a0   :  { %v601_v56 = vpop.permute.xlu0 %600 }
 0x4a1   :  { %v603_v58 = vadd.f32 %v601_v56, %v593_v53 }
 0x4a3   :  { %2834 = vtanh.f32 %v603_v58 }
 0x4a9   :  { %v2833_v59 = vpop.eup %2832 }
 0x4aa   :  { %465 = vrot.lane.b32.xlu1 %v2833_v59, %s2935_s2 }
 0x4ad   :  { %v2835_v60 = vpop.eup %2834  ;;  %v3161_v62 = vpop.permute.xlu1 %471 }
 0x4ae   :  { %606 = vrot.lane.b32.xlu0 %v2835_v60, %s2935_s2  ;;  %474 = vrot.lane.b32.xlu1 %v3108_v11, %s2937_s4  ;;  %vm473_vm9 = vcmp.eq.s32.totalorder %v3161_v62, 1  ;;  %v3230_v60 = vsel %vm2390_vm12, 1, %v2936_v26 }
 0x4b1   :  { %v3163_v63 = vpop.permute.xlu0 %612 }
 0x4b2   :  { %615 = vrot.lane.b32.xlu0 %v3119_v15, %s2937_s4  ;;  %vm614_vm10 = vcmp.eq.s32.totalorder %v3163_v63, 1  ;;  %v624_v15 = vld [vmem:[#allocation5] sm:$0x3] }
 0x51c   :  { %v466_v1 = vpop.permute.xlu1 %465 }
 0x51d   :  { %v3165_v2 = vmul.f32 %v2829_v38, %v466_v1 }
 0x520   :  { %v607_v3 = vpop.permute.xlu0 %606  ;;  %v475_v6 = vpop.permute.xlu1 %474 }
 0x521   :  { %v477_v7 = vsel %vm473_vm9, %v3165_v2, %v475_v6  ;;  %v3172_v8 = vmul.f32 %v2831_v42, %v607_v3 }
 0x522   :  { %479 = vrot.lane.b32.xlu1 %v477_v7, %s2937_s4 }
 0x523   :  { %v635_v55 = vsel %vm614_vm10, %v3172_v8, 0.0 }
 0x524   :  { %v616_v10 = vpop.permute.xlu0 %615 }
 0x525   :  { %v618_v11 = vsel %vm614_vm10, %v3172_v8, %v616_v10 }
 0x526   :  { %620 = vrot.lane.b32.xlu0 %v618_v11, %s2937_s4  ;;  %485 = vrot.lane.b32.xlu1 %v483_v14, %s2935_s2 }
 0x52a   :  { %626 = vrot.lane.b32.xlu0 %v624_v15, %s2935_s2 }
 0x594   :  { %v480_v16 = vpop.permute.xlu1 %479 }
 0x595   :  { %482 = vst.msk [vmem:[#allocation2] sm:$0x3] %vm62_vm0, %v480_v16 }
 0x598   :  { %v621_v17 = vpop.permute.xlu0 %620  ;;  %v486_v18 = vpop.permute.xlu1 %485 }
 0x599   :  { %623 = vst.msk [vmem:[#allocation4] sm:$0x3] %vm62_vm0, %v621_v17  ;;  %v488_v19 = vsel %vm473_vm9, %v462_v52, %v486_v18 }
 0x59a   :  { %490 = vrot.lane.b32.xlu1 %v488_v19, %s2938_s18 }
 0x59c   :  { %v627_v20 = vpop.permute.xlu0 %626  ;;  %v3186_v21 = vld [vmem:[#allocation2] sm:$0x3] }
 0x59d   :  { %2576 = vmatmul.mubr.msk.f32.vlgmr.msra.gmra.mrb[4].mxu0 %vm82_vm2, %v3186_v21  ;;  %v629_v22 = vsel %vm614_vm10, %v603_v58, %v627_v20  ;;  %v3224_v58 = vsel %vm2385_vm11, 1, %v2936_v26 }
 0x59e   :  { %631 = vrot.lane.b32.xlu0 %v629_v22, %s2938_s18  ;;  %2737 = vmatpush3.bf16.msra.mxu0 %v2993_v5 }
 0x59f   :  { %2738 = vmatprep.subr.bf16.mxu0 %v2932_v0  ;;  %2597 = vmatprep.mubr.msk.f32.mxu0 %vm2934_vm1, %v2933_v4 }
 0x5a0   :  { %v3197_v23 = vld [vmem:[#allocation4] sm:$0x3] }
 0x5a1   :  { %2587 = vmatmul.mubr.msk.f32.vlgmr.msra.gmra.mrb[4].mxu1 %vm82_vm2, %v3197_v23 }
 0x5a2   :  { %2740 = vmatpush3.bf16.msra.mxu0 %v3017_v12  ;;  %2743 = vmatpush3.bf16.msra.mxu1 %v3008_v9 }
 0x5a3   :  { %2744 = vmatprep.subr.bf16.mxu1 %v2932_v0  ;;  %2608 = vmatprep.mubr.msk.f32.mxu1 %vm2934_vm1, %v2933_v4 }
 0x5a4   :  { %2747 = vmatprep.subr.bf16.mxu0 %v2932_v0 }
 0x5a6   :  { %2746 = vmatpush3.bf16.msra.mxu1 %v3021_v13 }
 0x5a7   :  { %2753 = vmatprep.subr.bf16.mxu1 %v2932_v0 }
 0x60c   :  { %v491_v24 = vpop.permute.xlu1 %490 }
 0x60d   :  { %493 = vst.msk [vmem:[#allocation3] sm:$0x3] %vm62_vm0, %v491_v24 }
 0x610   :  { %v632_v25 = vpop.permute.xlu0 %631 }
 0x611   :  { %634 = vst.msk [vmem:[#allocation5] sm:$0x3] %vm62_vm0, %v632_v25 }
 0x614   :  { %v648_v38 = vld [vmem:[#allocation3] sm:$0x3] }
 0x618   :  { %v789_v39 = vld [vmem:[#allocation5] sm:$0x3] }
 0x670   :  { %v718_v28 = vpop.f32.mrb[4].mxu0 }
 0x671   :  { %v722_v29 = vadd.f32 %v2386_v27, %v718_v28  ;;  %v2577_v30 = vpop.f32.mrb[5].mxu0 }
 0x672   :  { %v906_v30 = vld [vmem:[#allocation5] sm:$0x3] }
 0x673   :  { %2836 = vtanh.f32 %v722_v29  ;;  %v2388_v40 = vmul.f32 -1.442695, %v722_v29  ;;  %v765_v29 = vld [vmem:[#allocation3] sm:$0x3] }
 0x674   :  { %v859_v32 = vpop.f32.mrb[4].mxu1 }
 0x675   :  { %v863_v33 = vadd.f32 %v2391_v31, %v859_v32  ;;  %v2588_v34 = vpop.f32.mrb[5].mxu1 }
 0x677   :  { %2838 = vtanh.f32 %v863_v33  ;;  %v2393_v42 = vmul.f32 -1.442695, %v863_v33 }
 0x678   :  { %2840 = vpow2.f32 %v2388_v40 }
 0x679   :  { %2842 = vpow2.f32 %v2393_v42 }
 0x67d   :  { %v2837_v35 = vpop.eup %2836 }
 0x67e   :  { %736 = vrot.lane.b32.xlu1 %v2837_v35, %s2935_s2 }
 0x681   :  { %v2839_v36 = vpop.eup %2838 }
 0x682   :  { %877 = vrot.lane.b32.xlu0 %v2839_v36, %s2935_s2  ;;  %731 = vrot.lane.b32.xlu1 %v648_v38, %s2935_s2  ;;  %v2841_v44 = vpop.eup %2840 }
 0x683   :  { %v726_v46 = vadd.f32 1.0, %v2841_v44  ;;  %v2843_v48 = vpop.eup %2842  ;;  %v2396_v44 = vld [vmem:[%s3723_s0 + $0x6] sm:$0x3] }
 0x684   :  { %v867_v49 = vadd.f32 1.0, %v2843_v48 }
 0x685   :  { %2844 = vrcp.f32 %v726_v46 }
 0x686   :  { %872 = vrot.lane.b32.xlu0 %v789_v39, %s2935_s2  ;;  %2846 = vrcp.f32 %v867_v49 }
 0x68f   :  { %v2845_v50 = vpop.eup %2844 }
 0x690   :  { %v2847_v53 = vpop.eup %2846 }
 0x6f0   :  { %v737_v51 = vpop.permute.xlu1 %736 }
 0x6f1   :  { %v739_v52 = vmul.f32 %v2845_v50, %v737_v51 }
 0x6f3   :  { %741 = vrot.lane.b32.xlu1 %v739_v52, %s2935_s2 }
 0x6f4   :  { %v878_v56 = vpop.permute.xlu0 %877  ;;  %v732_v1 = vpop.permute.xlu1 %731 }
 0x6f5   :  { %v880_v59 = vmul.f32 %v2847_v53, %v878_v56  ;;  %v734_v3 = vmul.f32 %v2845_v50, %v732_v1 }
 0x6f7   :  { %882 = vrot.lane.b32.xlu0 %v880_v59, %s2935_s2  ;;  %753 = vperm.xlu1 %2803, %v3224_v58  }
 0x6f8   :  { %v873_v6 = vpop.permute.xlu0 %872 }
 0x6f9   :  { %v875_v11 = vmul.f32 %v2847_v53, %v873_v6 }
 0x6fb   :  { %894 = vperm.xlu0 %2802, %v3230_v60  }
 0x765   :  { %v742_v7 = vpop.permute.xlu1 %741 }
 0x766   :  { %v744_v10 = vadd.f32 %v742_v7, %v734_v3 }
 0x768   :  { %2848 = vtanh.f32 %v744_v10 }
 0x769   :  { %v883_v14 = vpop.permute.xlu0 %882 }
 0x76a   :  { %v885_v15 = vadd.f32 %v883_v14, %v875_v11 }
 0x76c   :  { %2850 = vtanh.f32 %v885_v15 }
 0x772   :  { %v2849_v16 = vpop.eup %2848 }
 0x773   :  { %747 = vrot.lane.b32.xlu1 %v2849_v16, %s2935_s2 }
 0x776   :  { %v2851_v17 = vpop.eup %2850  ;;  %v3239_v18 = vpop.permute.xlu1 %753 }
 0x777   :  { %888 = vrot.lane.b32.xlu0 %v2851_v17, %s2935_s2  ;;  %756 = vrot.lane.b32.xlu1 %v3186_v21, %s2937_s4  ;;  %vm755_vm13 = vcmp.eq.s32.totalorder %v3239_v18, 1 }
 0x77a   :  { %v3241_v19 = vpop.permute.xlu0 %894 }
 0x77b   :  { %897 = vrot.lane.b32.xlu0 %v3197_v23, %s2937_s4  ;;  %vm896_vm14 = vcmp.eq.s32.totalorder %v3241_v19, 1 }
 0x7e5   :  { %v748_v20 = vpop.permute.xlu1 %747 }
 0x7e6   :  { %v3243_v22 = vmul.f32 %v2845_v50, %v748_v20  ;;  %v2401_v50 = vld [vmem:[%s3724_s1 + $0x8] sm:$0x3] }
 0x7e9   :  { %v889_v24 = vpop.permute.xlu0 %888  ;;  %v757_v25 = vpop.permute.xlu1 %756 }
 0x7ea   :  { %v759_v27 = vsel %vm755_vm13, %v3243_v22, %v757_v25  ;;  %v3250_v21 = vmul.f32 %v2847_v53, %v889_v24 }
 0x7eb   :  { %761 = vrot.lane.b32.xlu1 %v759_v27, %s2937_s4  ;;  %v3302_v27 = vsel %vm2395_vm15, 1, %v2936_v26 }
 0x7ed   :  { %v898_v23 = vpop.permute.xlu0 %897 }
 0x7ee   :  { %v900_v28 = vsel %vm896_vm14, %v3250_v21, %v898_v23 }
 0x7ef   :  { %902 = vrot.lane.b32.xlu0 %v900_v28, %s2937_s4  ;;  %767 = vrot.lane.b32.xlu1 %v765_v29, %s2935_s2  ;;  %v3308_v28 = vsel %vm2400_vm3, 1, %v2936_v26 }
 0x7f3   :  { %908 = vrot.lane.b32.xlu0 %v906_v30, %s2935_s2 }
 0x85d   :  { %v762_v31 = vpop.permute.xlu1 %761 }
 0x85e   :  { %764 = vst.msk [vmem:[#allocation2] sm:$0x3] %vm62_vm0, %v762_v31 }
 0x861   :  { %v903_v32 = vpop.permute.xlu0 %902  ;;  %v768_v33 = vpop.permute.xlu1 %767 }
 0x862   :  { %905 = vst.msk [vmem:[#allocation4] sm:$0x3] %vm62_vm0, %v903_v32  ;;  %v770_v34 = vsel %vm755_vm13, %v744_v10, %v768_v33 }
 0x863   :  { %772 = vrot.lane.b32.xlu1 %v770_v34, %s2938_s18 }
 0x865   :  { %v909_v35 = vpop.permute.xlu0 %908  ;;  %v3264_v36 = vld [vmem:[#allocation2] sm:$0x3] }
 0x866   :  { %2598 = vmatmul.mubr.msk.f32.vlgmr.msra.gmra.mrb[6].mxu0 %vm82_vm2, %v3264_v36  ;;  %v911_v38 = vsel %vm896_vm14, %v885_v15, %v909_v35 }
 0x867   :  { %913 = vrot.lane.b32.xlu0 %v911_v38, %s2938_s18  ;;  %2749 = vmatpush3.bf16.msra.mxu0 %v2993_v5 }
 0x868   :  { %2750 = vmatprep.subr.bf16.mxu0 %v2932_v0  ;;  %2619 = vmatprep.mubr.msk.f32.mxu0 %vm2934_vm1, %v2933_v4 }
 0x869   :  { %v3275_v39 = vld [vmem:[#allocation4] sm:$0x3] }
 0x86a   :  { %2609 = vmatmul.mubr.msk.f32.vlgmr.msra.gmra.mrb[6].mxu1 %vm82_vm2, %v3275_v39 }
 0x86b   :  { %2752 = vmatpush3.bf16.msra.mxu0 %v3017_v12  ;;  %2755 = vmatpush3.bf16.msra.mxu1 %v3008_v9 }
 0x86c   :  { %2756 = vmatprep.subr.bf16.mxu1 %v2932_v0  ;;  %2630 = vmatprep.mubr.msk.f32.mxu1 %vm2934_vm1, %v2933_v4 }
 0x86d   :  { %2759 = vmatprep.subr.bf16.mxu0 %v2932_v0 }
 0x86f   :  { %2758 = vmatpush3.bf16.msra.mxu1 %v3021_v13 }
 0x870   :  { %2765 = vmatprep.subr.bf16.mxu1 %v2932_v0 }
 0x8d5   :  { %v773_v40 = vpop.permute.xlu1 %772 }
 0x8d6   :  { %775 = vst.msk [vmem:[#allocation3] sm:$0x3] %vm62_vm0, %v773_v40 }
 0x8d9   :  { %v914_v42 = vpop.permute.xlu0 %913 }
 0x8da   :  { %916 = vst.msk [vmem:[#allocation5] sm:$0x3] %vm62_vm0, %v914_v42 }
 0x8dd   :  { %v930_v1 = vld [vmem:[#allocation3] sm:$0x3] }
 0x8e1   :  { %v1071_v3 = vld [vmem:[#allocation5] sm:$0x3] }
 0x939   :  { %v1000_v46 = vpop.f32.mrb[6].mxu0 }
 0x93a   :  { %v1004_v48 = vadd.f32 %v2396_v44, %v1000_v46  ;;  %v2599_v49 = vpop.f32.mrb[7].mxu0 }
 0x93c   :  { %2852 = vtanh.f32 %v1004_v48  ;;  %v2398_v6 = vmul.f32 -1.442695, %v1004_v48 }
 0x93d   :  { %v1141_v51 = vpop.f32.mrb[6].mxu1 }
 0x93e   :  { %v1145_v52 = vadd.f32 %v2401_v50, %v1141_v51  ;;  %v2610_v53 = vpop.f32.mrb[7].mxu1 }
 0x93f   :  { %v1188_v53 = vld [vmem:[#allocation5] sm:$0x3] }
 0x940   :  { %2854 = vtanh.f32 %v1145_v52  ;;  %v2403_v7 = vmul.f32 -1.442695, %v1145_v52  ;;  %v1047_v52 = vld [vmem:[#allocation3] sm:$0x3] }
 0x941   :  { %2856 = vpow2.f32 %v2398_v6 }
 0x942   :  { %2858 = vpow2.f32 %v2403_v7 }
 0x946   :  { %v2853_v56 = vpop.eup %2852 }
 0x947   :  { %1018 = vrot.lane.b32.xlu1 %v2853_v56, %s2935_s2 }
 0x94a   :  { %v2855_v59 = vpop.eup %2854 }
 0x94b   :  { %1159 = vrot.lane.b32.xlu0 %v2855_v59, %s2935_s2  ;;  %1013 = vrot.lane.b32.xlu1 %v930_v1, %s2935_s2  ;;  %v2857_v10 = vpop.eup %2856 }
 0x94c   :  { %v1008_v11 = vadd.f32 1.0, %v2857_v10  ;;  %v2859_v14 = vpop.eup %2858 }
 0x94d   :  { %v1149_v15 = vadd.f32 1.0, %v2859_v14 }
 0x94e   :  { %2860 = vrcp.f32 %v1008_v11 }
 0x94f   :  { %1154 = vrot.lane.b32.xlu0 %v1071_v3, %s2935_s2  ;;  %2862 = vrcp.f32 %v1149_v15 }
 0x958   :  { %v2861_v16 = vpop.eup %2860 }
 0x959   :  { %v2863_v24 = vpop.eup %2862 }
 0x9b9   :  { %v1019_v17 = vpop.permute.xlu1 %1018 }
 0x9ba   :  { %v1021_v20 = vmul.f32 %v2861_v16, %v1019_v17 }
 0x9bc   :  { %1023 = vrot.lane.b32.xlu1 %v1021_v20, %s2935_s2 }
 0x9bd   :  { %v1160_v25 = vpop.permute.xlu0 %1159  ;;  %v1014_v29 = vpop.permute.xlu1 %1013 }
 0x9be   :  { %v1162_v23 = vmul.f32 %v2863_v24, %v1160_v25  ;;  %v1016_v30 = vmul.f32 %v2861_v16, %v1014_v29  ;;  %v2411_v25 = vld [vmem:[%s3724_s1 + $0x6] sm:$0x3] }
 0x9c0   :  { %1164 = vrot.lane.b32.xlu0 %v1162_v23, %s2935_s2  ;;  %1035 = vperm.xlu1 %2803, %v3302_v27  }
 0x9c1   :  { %v1155_v31 = vpop.permute.xlu0 %1154 }
 0x9c2   :  { %v1157_v34 = vmul.f32 %v2863_v24, %v1155_v31 }
 0x9c4   :  { %1176 = vperm.xlu0 %2802, %v3308_v28  }
 0xa2e   :  { %v1024_v32 = vpop.permute.xlu1 %1023 }
 0xa2f   :  { %v1026_v33 = vadd.f32 %v1024_v32, %v1016_v30 }
 0xa31   :  { %2864 = vtanh.f32 %v1026_v33 }
 0xa32   :  { %v1165_v35 = vpop.permute.xlu0 %1164 }
 0xa33   :  { %v1167_v38 = vadd.f32 %v1165_v35, %v1157_v34 }
 0xa35   :  { %2866 = vtanh.f32 %v1167_v38 }
 0xa3b   :  { %v2865_v37 = vpop.eup %2864 }
 0xa3c   :  { %1029 = vrot.lane.b32.xlu1 %v2865_v37, %s2935_s2 }
 0xa3f   :  { %v2867_v40 = vpop.eup %2866  ;;  %v3317_v26 = vpop.permute.xlu1 %1035 }
 0xa40   :  { %1170 = vrot.lane.b32.xlu0 %v2867_v40, %s2935_s2  ;;  %1038 = vrot.lane.b32.xlu1 %v3264_v36, %s2937_s4  ;;  %vm1037_vm4 = vcmp.eq.s32.totalorder %v3317_v26, 1 }
 0xa43   :  { %v3319_v42 = vpop.permute.xlu0 %1176 }
 0xa44   :  { %1179 = vrot.lane.b32.xlu0 %v3275_v39, %s2937_s4  ;;  %vm1178_vm7 = vcmp.eq.s32.totalorder %v3319_v42, 1 }
 0xaae   :  { %v1030_v44 = vpop.permute.xlu1 %1029 }
 0xaaf   :  { %v3321_v46 = vmul.f32 %v2861_v16, %v1030_v44  ;;  %v2406_v16 = vld [vmem:[%s3723_s0 + $0x8] sm:$0x3] }
 0xab1   :  { %v1058_v54 = vsel %vm1037_vm4, %v3321_v46, 0.0 }
 0xab2   :  { %v1171_v48 = vpop.permute.xlu0 %1170  ;;  %v1039_v49 = vpop.permute.xlu1 %1038 }
 0xab3   :  { %v1041_v50 = vsel %vm1037_vm4, %v3321_v46, %v1039_v49  ;;  %v3328_v36 = vmul.f32 %v2863_v24, %v1171_v48 }
 0xab4   :  { %1043 = vrot.lane.b32.xlu1 %v1041_v50, %s2937_s4 }
 0xab5   :  { %v1199_v62 = vsel %vm1178_vm7, %v3328_v36, 0.0 }
 0xab6   :  { %v1180_v39 = vpop.permute.xlu0 %1179 }
 0xab7   :  { %v1182_v51 = vsel %vm1178_vm7, %v3328_v36, %v1180_v39 }
 0xab8   :  { %1184 = vrot.lane.b32.xlu0 %v1182_v51, %s2937_s4  ;;  %1049 = vrot.lane.b32.xlu1 %v1047_v52, %s2935_s2 }
 0xabc   :  { %1190 = vrot.lane.b32.xlu0 %v1188_v53, %s2935_s2 }
 0xb26   :  { %v1044_v56 = vpop.permute.xlu1 %1043 }
 0xb27   :  { %1046 = vst.msk [vmem:[#allocation2] sm:$0x3] %vm62_vm0, %v1044_v56 }
 0xb2a   :  { %v1185_v59 = vpop.permute.xlu0 %1184  ;;  %v1050_v1 = vpop.permute.xlu1 %1049 }
 0xb2b   :  { %1187 = vst.msk [vmem:[#allocation4] sm:$0x3] %vm62_vm0, %v1185_v59  ;;  %v1052_v3 = vsel %vm1037_vm4, %v1026_v33, %v1050_v1 }
 0xb2c   :  { %1054 = vrot.lane.b32.xlu1 %v1052_v3, %s2938_s18 }
 0xb2e   :  { %v1191_v6 = vpop.permute.xlu0 %1190  ;;  %v3342_v7 = vld [vmem:[#allocation2] sm:$0x3] }
 0xb2f   :  { %2620 = vmatmul.mubr.msk.f32.vlgmr.msra.gmra.mrb[8].mxu0 %vm82_vm2, %v3342_v7  ;;  %v1193_v10 = vsel %vm1178_vm7, %v1167_v38, %v1191_v6 }
 0xb30   :  { %1195 = vrot.lane.b32.xlu0 %v1193_v10, %s2938_s18  ;;  %2761 = vmatpush3.bf16.msra.mxu0 %v2993_v5 }
 0xb31   :  { %2762 = vmatprep.subr.bf16.mxu0 %v2932_v0  ;;  %2641 = vmatprep.mubr.msk.f32.mxu0 %vm2934_vm1, %v2933_v4 }
 0xb32   :  { %v3353_v11 = vld [vmem:[#allocation4] sm:$0x3] }
 0xb33   :  { %2631 = vmatmul.mubr.msk.f32.vlgmr.msra.gmra.mrb[8].mxu1 %vm82_vm2, %v3353_v11 }
 0xb34   :  { %2764 = vmatpush3.bf16.msra.mxu0 %v3017_v12  ;;  %2767 = vmatpush3.bf16.msra.mxu1 %v3008_v9 }
 0xb35   :  { %2768 = vmatprep.subr.bf16.mxu1 %v2932_v0  ;;  %2652 = vmatprep.mubr.msk.f32.mxu1 %vm2934_vm1, %v2933_v4 }
 0xb36   :  { %2771 = vmatprep.subr.bf16.mxu0 %v2932_v0 }
 0xb38   :  { %2770 = vmatpush3.bf16.msra.mxu1 %v3021_v13 }
 0xb39   :  { %2777 = vmatprep.subr.bf16.mxu1 %v2932_v0 }
 0xb9e   :  { %v1055_v14 = vpop.permute.xlu1 %1054 }
 0xb9f   :  { %1057 = vst.msk [vmem:[#allocation3] sm:$0x3] %vm62_vm0, %v1055_v14 }
 0xba2   :  { %v1196_v15 = vpop.permute.xlu0 %1195 }
 0xba3   :  { %1198 = vst.msk [vmem:[#allocation5] sm:$0x3] %vm62_vm0, %v1196_v15 }
 0xba6   :  { %v1212_v33 = vld [vmem:[#allocation3] sm:$0x3] }
 0xbaa   :  { %v1353_v34 = vld [vmem:[#allocation5] sm:$0x3] }
 0xc02   :  { %v1282_v17 = vpop.f32.mrb[8].mxu0 }
 0xc03   :  { %v1286_v20 = vadd.f32 %v2406_v16, %v1282_v17  ;;  %v2621_v24 = vpop.f32.mrb[9].mxu0 }
 0xc05   :  { %2868 = vtanh.f32 %v1286_v20  ;;  %v2408_v35 = vmul.f32 -1.442695, %v1286_v20 }
 0xc06   :  { %v1423_v23 = vpop.f32.mrb[8].mxu1 }
 0xc07   :  { %v1427_v29 = vadd.f32 %v2411_v25, %v1423_v23  ;;  %v2632_v30 = vpop.f32.mrb[9].mxu1 }
 0xc09   :  { %2870 = vtanh.f32 %v1427_v29  ;;  %v2413_v38 = vmul.f32 -1.442695, %v1427_v29 }
 0xc0a   :  { %2872 = vpow2.f32 %v2408_v35 }
 0xc0b   :  { %2874 = vpow2.f32 %v2413_v38 }
 0xc0f   :  { %v2869_v31 = vpop.eup %2868 }
 0xc10   :  { %1300 = vrot.lane.b32.xlu1 %v2869_v31, %s2935_s2  ;;  %v1329_v31 = vld [vmem:[#allocation3] sm:$0x3] }
 0xc13   :  { %v2871_v32 = vpop.eup %2870 }
 0xc14   :  { %1441 = vrot.lane.b32.xlu0 %v2871_v32, %s2935_s2  ;;  %1295 = vrot.lane.b32.xlu1 %v1212_v33, %s2935_s2  ;;  %v2873_v37 = vpop.eup %2872  ;;  %v1470_v32 = vld [vmem:[#allocation5] sm:$0x3] }
 0xc15   :  { %v1290_v40 = vadd.f32 1.0, %v2873_v37  ;;  %v2875_v44 = vpop.eup %2874 }
 0xc16   :  { %v1431_v48 = vadd.f32 1.0, %v2875_v44 }
 0xc17   :  { %2876 = vrcp.f32 %v1290_v40 }
 0xc18   :  { %1436 = vrot.lane.b32.xlu0 %v1353_v34, %s2935_s2  ;;  %2878 = vrcp.f32 %v1431_v48 }
 0xc21   :  { %v2877_v49 = vpop.eup %2876 }
 0xc22   :  { %v2879_v51 = vpop.eup %2878 }
 0xc82   :  { %v1301_v50 = vpop.permute.xlu1 %1300 }
 0xc83   :  { %v1303_v39 = vmul.f32 %v2877_v49, %v1301_v50 }
 0xc85   :  { %1305 = vrot.lane.b32.xlu1 %v1303_v39, %s2935_s2  ;;  %v2416_v39 = vld [vmem:[%s3723_s0 + $0xa] sm:$0x3] }
 0xc86   :  { %v1442_v52 = vpop.permute.xlu0 %1441  ;;  %v1296_v56 = vpop.permute.xlu1 %1295 }
 0xc87   :  { %v1444_v53 = vmul.f32 %v2879_v51, %v1442_v52  ;;  %v1298_v59 = vmul.f32 %v2877_v49, %v1296_v56  ;;  %v2421_v56 = vld [vmem:[%s3724_s1 + $0x4] sm:$0x3] }
 0xc89   :  { %1446 = vrot.lane.b32.xlu0 %v1444_v53, %s2935_s2  ;;  %1317 = vperm.xlu1 %2803, %v3308_v28  }
 0xc8a   :  { %v1437_v1 = vpop.permute.xlu0 %1436 }
 0xc8b   :  { %v1439_v10 = vmul.f32 %v2879_v51, %v1437_v1 }
 0xc8d   :  { %1458 = vperm.xlu0 %2802, %v3302_v27  }
 0xcf7   :  { %v1306_v3 = vpop.permute.xlu1 %1305 }
 0xcf8   :  { %v1308_v6 = vadd.f32 %v1306_v3, %v1298_v59 }
 0xcfa   :  { %2880 = vtanh.f32 %v1308_v6 }
 0xcfb   :  { %v1447_v14 = vpop.permute.xlu0 %1446 }
 0xcfc   :  { %v1449_v15 = vadd.f32 %v1447_v14, %v1439_v10 }
 0xcfe   :  { %2882 = vtanh.f32 %v1449_v15 }
 0xd04   :  { %v2881_v16 = vpop.eup %2880 }
 0xd05   :  { %1311 = vrot.lane.b32.xlu1 %v2881_v16, %s2935_s2 }
 0xd08   :  { %v2883_v17 = vpop.eup %2882  ;;  %v3387_v27 = vpop.permute.xlu1 %1317 }
 0xd09   :  { %1452 = vrot.lane.b32.xlu0 %v2883_v17, %s2935_s2  ;;  %1320 = vrot.lane.b32.xlu1 %v3342_v7, %s2937_s4  ;;  %vm1319_vm8 = vcmp.eq.s32.totalorder %v3387_v27, 1 }
 0xd0c   :  { %v3389_v28 = vpop.permute.xlu0 %1458 }
 0xd0d   :  { %1461 = vrot.lane.b32.xlu0 %v3353_v11, %s2937_s4  ;;  %vm1460_vm11 = vcmp.eq.s32.totalorder %v3389_v28, 1 }
 0xd77   :  { %v1312_v20 = vpop.permute.xlu1 %1311 }
 0xd78   :  { %v3391_v24 = vmul.f32 %v2877_v49, %v1312_v20 }
 0xd7a   :  { %v1340_v63 = vsel %vm1319_vm8, %v3391_v24, 0.0 }
 0xd7b   :  { %v1453_v25 = vpop.permute.xlu0 %1452  ;;  %v1321_v23 = vpop.permute.xlu1 %1320 }
 0xd7c   :  { %v1323_v29 = vsel %vm1319_vm8, %v3391_v24, %v1321_v23  ;;  %v3398_v7 = vmul.f32 %v2879_v51, %v1453_v25 }
 0xd7d   :  { %1325 = vrot.lane.b32.xlu1 %v1323_v29, %s2937_s4 }
 0xd7f   :  { %v1462_v11 = vpop.permute.xlu0 %1461 }
 0xd80   :  { %v1464_v30 = vsel %vm1460_vm11, %v3398_v7, %v1462_v11 }
 0xd81   :  { %1466 = vrot.lane.b32.xlu0 %v1464_v30, %s2937_s4  ;;  %1331 = vrot.lane.b32.xlu1 %v1329_v31, %s2935_s2 }
 0xd85   :  { %1472 = vrot.lane.b32.xlu0 %v1470_v32, %s2935_s2 }
 0xdef   :  { %v1326_v33 = vpop.permute.xlu1 %1325 }
 0xdf0   :  { %1328 = vst.msk [vmem:[#allocation2] sm:$0x3] %vm62_vm0, %v1326_v33 }
 0xdf3   :  { %v1467_v34 = vpop.permute.xlu0 %1466  ;;  %v1332_v35 = vpop.permute.xlu1 %1331 }
 0xdf4   :  { %1469 = vst.msk [vmem:[#allocation4] sm:$0x3] %vm62_vm0, %v1467_v34  ;;  %v1334_v38 = vsel %vm1319_vm8, %v1308_v6, %v1332_v35 }
 0xdf5   :  { %1336 = vrot.lane.b32.xlu1 %v1334_v38, %s2938_s18 }
 0xdf7   :  { %v1473_v37 = vpop.permute.xlu0 %1472  ;;  %v3412_v40 = vld [vmem:[#allocation2] sm:$0x3] }
 0xdf8   :  { %2642 = vmatmul.mubr.msk.f32.vlgmr.msra.gmra.mrb[10].mxu0 %vm82_vm2, %v3412_v40  ;;  %v1475_v44 = vsel %vm1460_vm11, %v1449_v15, %v1473_v37 }
 0xdf9   :  { %1477 = vrot.lane.b32.xlu0 %v1475_v44, %s2938_s18  ;;  %2773 = vmatpush3.bf16.msra.mxu0 %v2993_v5 }
 0xdfa   :  { %2774 = vmatprep.subr.bf16.mxu0 %v2932_v0  ;;  %2663 = vmatprep.mubr.msk.f32.mxu0 %vm2934_vm1, %v2933_v4 }
 0xdfb   :  { %v3423_v48 = vld [vmem:[#allocation4] sm:$0x3] }
 0xdfc   :  { %2653 = vmatmul.mubr.msk.f32.vlgmr.msra.gmra.mrb[10].mxu1 %vm82_vm2, %v3423_v48 }
 0xdfd   :  { %2776 = vmatpush3.bf16.msra.mxu0 %v3017_v12  ;;  %2779 = vmatpush3.bf16.msra.mxu1 %v3008_v9 }
 0xdfe   :  { %2780 = vmatprep.subr.bf16.mxu1 %v2932_v0  ;;  %2674 = vmatprep.mubr.msk.f32.mxu1 %vm2934_vm1, %v2933_v4 }
 0xdff   :  { %2783 = vmatprep.subr.bf16.mxu0 %v2932_v0 }
 0xe01   :  { %2782 = vmatpush3.bf16.msra.mxu1 %v3021_v13 }
 0xe02   :  { %2789 = vmatprep.subr.bf16.mxu1 %v2932_v0 }
 0xe67   :  { %v1337_v49 = vpop.permute.xlu1 %1336 }
 0xe68   :  { %1339 = vst.msk [vmem:[#allocation3] sm:$0x3] %vm62_vm0, %v1337_v49 }
 0xe6b   :  { %v1478_v50 = vpop.permute.xlu0 %1477 }
 0xe6c   :  { %1480 = vst.msk [vmem:[#allocation5] sm:$0x3] %vm62_vm0, %v1478_v50 }
 0xe6f   :  { %v1494_v14 = vld [vmem:[#allocation3] sm:$0x3] }
 0xe73   :  { %v1635_v15 = vld [vmem:[#allocation5] sm:$0x3] }
 0xecb   :  { %v1564_v51 = vpop.f32.mrb[10].mxu0 }
 0xecc   :  { %v1568_v52 = vadd.f32 %v2416_v39, %v1564_v51  ;;  %v2643_v53 = vpop.f32.mrb[11].mxu0 }
 0xece   :  { %2884 = vtanh.f32 %v1568_v52  ;;  %v2418_v16 = vmul.f32 -1.442695, %v1568_v52 }
 0xecf   :  { %v1705_v59 = vpop.f32.mrb[10].mxu1 }
 0xed0   :  { %v1709_v1 = vadd.f32 %v2421_v56, %v1705_v59  ;;  %v2654_v3 = vpop.f32.mrb[11].mxu1 }
 0xed2   :  { %2886 = vtanh.f32 %v1709_v1  ;;  %v2423_v17 = vmul.f32 -1.442695, %v1709_v1 }
 0xed3   :  { %2888 = vpow2.f32 %v2418_v16 }
 0xed4   :  { %2890 = vpow2.f32 %v2423_v17 }
 0xed8   :  { %v2885_v6 = vpop.eup %2884 }
 0xed9   :  { %1582 = vrot.lane.b32.xlu1 %v2885_v6, %s2935_s2 }
 0xedc   :  { %v2887_v10 = vpop.eup %2886 }
 0xedd   :  { %1723 = vrot.lane.b32.xlu0 %v2887_v10, %s2935_s2  ;;  %1577 = vrot.lane.b32.xlu1 %v1494_v14, %s2935_s2  ;;  %v2889_v20 = vpop.eup %2888  ;;  %v1611_v14 = vld [vmem:[#allocation3] sm:$0x3] }
 0xede   :  { %v1572_v25 = vadd.f32 1.0, %v2889_v20  ;;  %v2891_v23 = vpop.eup %2890 }
 0xedf   :  { %v1713_v29 = vadd.f32 1.0, %v2891_v23 }
 0xee0   :  { %2892 = vrcp.f32 %v1572_v25 }
 0xee1   :  { %1718 = vrot.lane.b32.xlu0 %v1635_v15, %s2935_s2  ;;  %2894 = vrcp.f32 %v1713_v29  ;;  %v1752_v15 = vld [vmem:[#allocation5] sm:$0x3] }
 0xeea   :  { %v2893_v11 = vpop.eup %2892 }
 0xeeb   :  { %v2895_v32 = vpop.eup %2894 }
 0xf4b   :  { %v1583_v30 = vpop.permute.xlu1 %1582 }
 0xf4c   :  { %v1585_v31 = vmul.f32 %v2893_v11, %v1583_v30 }
 0xf4e   :  { %1587 = vrot.lane.b32.xlu1 %v1585_v31, %s2935_s2 }
 0xf4f   :  { %v1724_v33 = vpop.permute.xlu0 %1723  ;;  %v1578_v35 = vpop.permute.xlu1 %1577 }
 0xf50   :  { %v1726_v34 = vmul.f32 %v2895_v32, %v1724_v33  ;;  %v1580_v38 = vmul.f32 %v2893_v11, %v1578_v35 }
 0xf52   :  { %1728 = vrot.lane.b32.xlu0 %v1726_v34, %s2935_s2  ;;  %1599 = vperm.xlu1 %2803, %v3230_v60  }
 0xf53   :  { %v1719_v37 = vpop.permute.xlu0 %1718 }
 0xf54   :  { %v1721_v50 = vmul.f32 %v2895_v32, %v1719_v37 }
 0xf56   :  { %1740 = vperm.xlu0 %2802, %v3224_v58  }
 0xfc0   :  { %v1588_v44 = vpop.permute.xlu1 %1587 }
 0xfc1   :  { %v1590_v49 = vadd.f32 %v1588_v44, %v1580_v38 }
 0xfc3   :  { %2896 = vtanh.f32 %v1590_v49 }
 0xfc4   :  { %v1729_v39 = vpop.permute.xlu0 %1728 }
 0xfc5   :  { %v1731_v51 = vadd.f32 %v1729_v39, %v1721_v50 }
 0xfc7   :  { %2898 = vtanh.f32 %v1731_v51 }
 0xfcd   :  { %v2897_v52 = vpop.eup %2896 }
 0xfce   :  { %1593 = vrot.lane.b32.xlu1 %v2897_v52, %s2935_s2 }
 0xfd1   :  { %v2899_v53 = vpop.eup %2898  ;;  %v3457_v58 = vpop.permute.xlu1 %1599 }
 0xfd2   :  { %1734 = vrot.lane.b32.xlu0 %v2899_v53, %s2935_s2  ;;  %1602 = vrot.lane.b32.xlu1 %v3412_v40, %s2937_s4  ;;  %vm1601_vm12 = vcmp.eq.s32.totalorder %v3457_v58, 1 }
 0xfd5   :  { %v3459_v60 = vpop.permute.xlu0 %1740 }
 0xfd6   :  { %1743 = vrot.lane.b32.xlu0 %v3423_v48, %s2937_s4  ;;  %vm1742_vm15 = vcmp.eq.s32.totalorder %v3459_v60, 1 }
0x1040   :  { %v1594_v56 = vpop.permute.xlu1 %1593 }
0x1041   :  { %v3461_v59 = vmul.f32 %v2893_v11, %v1594_v56 }
0x1043   :  { %v1622_v8 = vsel %vm1601_vm12, %v3461_v59, 0.0 }
0x1044   :  { %v1735_v1 = vpop.permute.xlu0 %1734  ;;  %v1603_v3 = vpop.permute.xlu1 %1602 }
0x1045   :  { %v1605_v6 = vsel %vm1601_vm12, %v3461_v59, %v1603_v3  ;;  %v3468_v40 = vmul.f32 %v2895_v32, %v1735_v1  ;;  %v2426_v32 = vld [vmem:[%s3723_s0 + $0xc] sm:$0x3] }
0x1046   :  { %1607 = vrot.lane.b32.xlu1 %v1605_v6, %s2937_s4 }
0x1047   :  { %v1763_v19 = vsel %vm1742_vm15, %v3468_v40, 0.0 }
0x1048   :  { %v1744_v48 = vpop.permute.xlu0 %1743 }
0x1049   :  { %v1746_v10 = vsel %vm1742_vm15, %v3468_v40, %v1744_v48 }
0x104a   :  { %1748 = vrot.lane.b32.xlu0 %v1746_v10, %s2937_s4  ;;  %1613 = vrot.lane.b32.xlu1 %v1611_v14, %s2935_s2 }
0x104e   :  { %1754 = vrot.lane.b32.xlu0 %v1752_v15, %s2935_s2 }
0x10b8   :  { %v1608_v16 = vpop.permute.xlu1 %1607 }
0x10b9   :  { %1610 = vst.msk [vmem:[#allocation2] sm:$0x3] %vm62_vm0, %v1608_v16 }
0x10bc   :  { %v1749_v17 = vpop.permute.xlu0 %1748  ;;  %v1614_v20 = vpop.permute.xlu1 %1613 }
0x10bd   :  { %1751 = vst.msk [vmem:[#allocation4] sm:$0x3] %vm62_vm0, %v1749_v17  ;;  %v1616_v25 = vsel %vm1601_vm12, %v1590_v49, %v1614_v20 }
0x10be   :  { %1618 = vrot.lane.b32.xlu1 %v1616_v25, %s2938_s18 }
0x10c0   :  { %v1755_v23 = vpop.permute.xlu0 %1754  ;;  %v3482_v29 = vld [vmem:[#allocation2] sm:$0x3] }
0x10c1   :  { %v1757_v11 = vsel %vm1742_vm15, %v1731_v51, %v1755_v23  ;;  %2664 = vmatmul.mubr.msk.f32.vlgmr.msra.gmra.mrb[12].mxu0 %vm82_vm2, %v3482_v29 }
0x10c2   :  { %1759 = vrot.lane.b32.xlu0 %v1757_v11, %s2938_s18  ;;  %2785 = vmatpush3.bf16.msra.mxu0 %v2993_v5 }
0x10c3   :  { %2786 = vmatprep.subr.bf16.mxu0 %v2932_v0  ;;  %2685 = vmatprep.mubr.msk.f32.mxu0 %vm2934_vm1, %v2933_v4 }
0x10c4   :  { %v3493_v30 = vld [vmem:[#allocation4] sm:$0x3] }
0x10c5   :  { %2675 = vmatmul.mubr.msk.f32.vlgmr.msra.gmra.mrb[12].mxu1 %vm82_vm2, %v3493_v30 }
0x10c6   :  { %2788 = vmatpush3.bf16.msra.mxu0 %v3017_v12  ;;  %2791 = vmatpush3.bf16.msra.mxu1 %v3008_v9 }
0x10c7   :  { %2792 = vmatprep.subr.bf16.mxu1 %v2932_v0  ;;  %2696 = vmatprep.mubr.msk.f32.mxu1 %vm2934_vm1, %v2933_v4  ;;  %v2431_v0 = vld [vmem:[%s3724_s1 + $0x2] sm:$0x3] }
0x10ca   :  { %2794 = vmatpush3.bf16.msra.mxu1 %v3021_v13 }
0x1130   :  { %v1619_v5 = vpop.permute.xlu1 %1618 }
0x1131   :  { %1621 = vst.msk [vmem:[#allocation3] sm:$0x3] %vm62_vm0, %v1619_v5 }
0x1134   :  { %v1760_v31 = vpop.permute.xlu0 %1759 }
0x1135   :  { %1762 = vst.msk [vmem:[#allocation5] sm:$0x3] %vm62_vm0, %v1760_v31 }
0x1138   :  { %v1776_v37 = vld [vmem:[#allocation3] sm:$0x3] }
0x113c   :  { %v1917_v44 = vld [vmem:[#allocation5] sm:$0x3] }
0x1194   :  { %v1846_v12 = vpop.f32.mrb[12].mxu0 }
0x1195   :  { %v1850_v33 = vadd.f32 %v2426_v32, %v1846_v12  ;;  %v2665_v9 = vpop.f32.mrb[13].mxu0 }
0x1197   :  { %2900 = vtanh.f32 %v1850_v33  ;;  %v2428_v49 = vmul.f32 -1.442695, %v1850_v33 }
0x1198   :  { %v1987_v4 = vpop.f32.mrb[12].mxu1 }
0x1199   :  { %v1991_v13 = vadd.f32 %v2431_v0, %v1987_v4  ;;  %v2676_v34 = vpop.f32.mrb[13].mxu1 }
0x119a   :  { %v2034_v34 = vld [vmem:[#allocation5] sm:$0x3] }
0x119b   :  { %2902 = vtanh.f32 %v1991_v13  ;;  %v2433_v50 = vmul.f32 -1.442695, %v1991_v13  ;;  %v1893_v13 = vld [vmem:[#allocation3] sm:$0x3] }
0x119c   :  { %2904 = vpow2.f32 %v2428_v49 }
0x119d   :  { %2906 = vpow2.f32 %v2433_v50 }
0x11a1   :  { %v2901_v35 = vpop.eup %2900 }
0x11a2   :  { %1864 = vrot.lane.b32.xlu1 %v2901_v35, %s2935_s2 }
0x11a5   :  { %v2903_v38 = vpop.eup %2902 }
0x11a6   :  { %2005 = vrot.lane.b32.xlu0 %v2903_v38, %s2935_s2  ;;  %1859 = vrot.lane.b32.xlu1 %v1776_v37, %s2935_s2  ;;  %v2905_v39 = vpop.eup %2904 }
0x11a7   :  { %v1854_v51 = vadd.f32 1.0, %v2905_v39  ;;  %v2907_v52 = vpop.eup %2906 }
0x11a8   :  { %v1995_v53 = vadd.f32 1.0, %v2907_v52 }
0x11a9   :  { %2908 = vrcp.f32 %v1854_v51 }
0x11aa   :  { %2000 = vrot.lane.b32.xlu0 %v1917_v44, %s2935_s2  ;;  %2910 = vrcp.f32 %v1995_v53 }
0x11b3   :  { %v2909_v56 = vpop.eup %2908 }
0x11b4   :  { %v2911_v6 = vpop.eup %2910 }
0x1214   :  { %v1865_v1 = vpop.permute.xlu1 %1864 }
0x1215   :  { %v1867_v3 = vmul.f32 %v2909_v56, %v1865_v1 }
0x1217   :  { %1869 = vrot.lane.b32.xlu1 %v1867_v3, %s2935_s2 }
0x1218   :  { %v2006_v48 = vpop.permute.xlu0 %2005  ;;  %v1860_v14 = vpop.permute.xlu1 %1859 }
0x1219   :  { %v2008_v10 = vmul.f32 %v2911_v6, %v2006_v48  ;;  %v1862_v15 = vmul.f32 %v2909_v56, %v1860_v14  ;;  %v2195_v48 = vld [vmem:[%s3724_s1] sm:$0x3] }
0x121b   :  { %2010 = vrot.lane.b32.xlu0 %v2008_v10, %s2935_s2  ;;  %1881 = vperm.xlu1 %2803, %v3152_v47  }
0x121c   :  { %v2001_v16 = vpop.permute.xlu0 %2000 }
0x121d   :  { %v2003_v25 = vmul.f32 %v2911_v6, %v2001_v16 }
0x121f   :  { %2022 = vperm.xlu0 %2802, %v3146_v45  }
0x1289   :  { %v1870_v17 = vpop.permute.xlu1 %1869 }
0x128a   :  { %v1872_v20 = vadd.f32 %v1870_v17, %v1862_v15 }
0x128c   :  { %2912 = vtanh.f32 %v1872_v20 }
0x128d   :  { %v2011_v23 = vpop.permute.xlu0 %2010 }
0x128e   :  { %v2013_v11 = vadd.f32 %v2011_v23, %v2003_v25 }
0x1290   :  { %2914 = vtanh.f32 %v2013_v11 }
0x1296   :  { %v2913_v5 = vpop.eup %2912 }
0x1297   :  { %1875 = vrot.lane.b32.xlu1 %v2913_v5, %s2935_s2 }
0x129a   :  { %v2915_v31 = vpop.eup %2914  ;;  %v3525_v45 = vpop.permute.xlu1 %1881 }
0x129b   :  { %2016 = vrot.lane.b32.xlu0 %v2915_v31, %s2935_s2  ;;  %1884 = vrot.lane.b32.xlu1 %v3482_v29, %s2937_s4  ;;  %vm1883_vm1 = vcmp.eq.s32.totalorder %v3525_v45, 1 }
0x129e   :  { %v3527_v47 = vpop.permute.xlu0 %2022 }
0x129f   :  { %2025 = vrot.lane.b32.xlu0 %v3493_v30, %s2937_s4  ;;  %vm2024_vm3 = vcmp.eq.s32.totalorder %v3527_v47, 1 }
0x1309   :  { %v1876_v32 = vpop.permute.xlu1 %1875 }
0x130a   :  { %v3529_v12 = vmul.f32 %v2909_v56, %v1876_v32  ;;  %v2436_v56 = vld [vmem:[%s3723_s0 + $0xe] sm:$0x3] }
0x130d   :  { %v2017_v33 = vpop.permute.xlu0 %2016  ;;  %v1885_v9 = vpop.permute.xlu1 %1884 }
0x130e   :  { %v1887_v0 = vsel %vm1883_vm1, %v3529_v12, %v1885_v9  ;;  %v3536_v29 = vmul.f32 %v2911_v6, %v2017_v33 }
0x130f   :  { %1889 = vrot.lane.b32.xlu1 %v1887_v0, %s2937_s4 }
0x1311   :  { %v2026_v30 = vpop.permute.xlu0 %2025 }
0x1312   :  { %v2028_v4 = vsel %vm2024_vm3, %v3536_v29, %v2026_v30 }
0x1313   :  { %2030 = vrot.lane.b32.xlu0 %v2028_v4, %s2937_s4  ;;  %1895 = vrot.lane.b32.xlu1 %v1893_v13, %s2935_s2 }
0x1317   :  { %2036 = vrot.lane.b32.xlu0 %v2034_v34, %s2935_s2 }
0x1381   :  { %v1890_v35 = vpop.permute.xlu1 %1889 }
0x1382   :  { %1892 = vst.msk [vmem:[#allocation2] sm:$0x3] %vm62_vm0, %v1890_v35 }
0x1385   :  { %v2031_v38 = vpop.permute.xlu0 %2030  ;;  %v1896_v37 = vpop.permute.xlu1 %1895 }
0x1386   :  { %2033 = vst.msk [vmem:[#allocation4] sm:$0x3] %vm62_vm0, %v2031_v38  ;;  %v1898_v44 = vsel %vm1883_vm1, %v1872_v20, %v1896_v37 }
0x1387   :  { %1900 = vrot.lane.b32.xlu1 %v1898_v44, %s2938_s18 }
0x1389   :  { %v2037_v49 = vpop.permute.xlu0 %2036  ;;  %v2057_v50 = vld [vmem:[#allocation2] sm:$0x3] }
0x138a   :  { %v2039_v39 = vsel %vm2024_vm3, %v2013_v11, %v2037_v49  ;;  %2686 = vmatmul.mubr.msk.f32.vlgmr.msra.gmra.mrb[14].mxu0 %vm82_vm2, %v2057_v50 }
0x138b   :  { %2041 = vrot.lane.b32.xlu0 %v2039_v39, %s2938_s18 }
0x138d   :  { %v2196_v51 = vld [vmem:[#allocation4] sm:$0x3] }
0x138e   :  { %2697 = vmatmul.mubr.msk.f32.vlgmr.msra.gmra.mrb[14].mxu1 %vm82_vm2, %v2196_v51 }
0x13f9   :  { %v1901_v52 = vpop.permute.xlu1 %1900 }
0x13fa   :  { %1903 = vst.msk [vmem:[#allocation3] sm:$0x3] %vm62_vm0, %v1901_v52 }
0x13fd   :  { %v2042_v53 = vpop.permute.xlu0 %2041 }
0x13fe   :  { %2044 = vst.msk [vmem:[#allocation5] sm:$0x3] %vm62_vm0, %v2042_v53 }
0x1401   :  { %v2058_v20 = vld [vmem:[#allocation3] sm:$0x3] }
0x1402   :  { %v2175_v35 = vld [vmem:[#allocation3] sm:$0x3] }
0x1405   :  { %v2197_v25 = vld [vmem:[#allocation5] sm:$0x3] }
0x145d   :  { %v2128_v1 = vpop.f32.mrb[14].mxu0 }
0x145e   :  { %v2132_v3 = vadd.f32 %v2436_v56, %v2128_v1  ;;  %v2687_v6 = vpop.f32.mrb[15].mxu0  ;;  %v211_v1 = vsel %vm189_vm5, %v3087_v57, 0.0  ;;  %v776_v57 = vsel %vm755_vm13, %v3243_v22, 0.0  ;;  %v1904_v22 = vsel %vm1883_vm1, %v3529_v12, 0.0 }
0x145f   :  { %v494_v6 = vsel %vm473_vm9, %v3165_v2, 0.0  ;;  %v1481_v2 = vsel %vm1460_vm11, %v3398_v7, 0.0 }
0x1460   :  { %2916 = vtanh.f32 %v2132_v3  ;;  %v2438_v23 = vmul.f32 -1.442695, %v2132_v3  ;;  %v353_v3 = vsel %vm332_vm6, %v3094_v61, 0.0  ;;  %v917_v61 = vsel %vm896_vm14, %v3250_v21, 0.0 }
0x1461   :  { %v2267_v10 = vpop.f32.mrb[14].mxu1  ;;  %v2045_v21 = vsel %vm2024_vm3, %v3536_v29, 0.0 }
0x1462   :  { %v2271_v14 = vadd.f32 %v2267_v10, %v2195_v48  ;;  %v2698_v15 = vpop.f32.mrb[15].mxu1 }
0x1464   :  { %2918 = vtanh.f32 %v2271_v14  ;;  %v2442_v11 = vmul.f32 -1.442695, %v2271_v14 }
0x1465   :  { %2920 = vpow2.f32 %v2438_v23 }
0x1466   :  { %2922 = vpow2.f32 %v2442_v11 }
0x146a   :  { %v2917_v16 = vpop.eup %2916 }
0x146b   :  { %2146 = vrot.lane.b32.xlu1 %v2917_v16, %s2935_s2 }
0x146e   :  { %v2919_v17 = vpop.eup %2918 }
0x146f   :  { %2285 = vrot.lane.b32.xlu0 %v2919_v17, %s2935_s2  ;;  %2141 = vrot.lane.b32.xlu1 %v2058_v20, %s2935_s2  ;;  %v2921_v5 = vpop.eup %2920 }
0x1470   :  { %v2136_v31 = vadd.f32 1.0, %v2921_v5  ;;  %v2923_v32 = vpop.eup %2922 }
0x1471   :  { %v2275_v33 = vadd.f32 1.0, %v2923_v32 }
0x1472   :  { %2924 = vrcp.f32 %v2136_v31 }
0x1473   :  { %2280 = vrot.lane.b32.xlu0 %v2197_v25, %s2935_s2  ;;  %2926 = vrcp.f32 %v2275_v33 }
0x147c   :  { %v3567_v9 = vpop.eup %2924 }
0x147d   :  { %v3571_v4 = vpop.eup %2926 }
0x14dd   :  { %v2147_v0 = vpop.permute.xlu1 %2146 }
0x14de   :  { %v2149_v30 = vmul.f32 %v3567_v9, %v2147_v0 }
0x14e0   :  { %2151 = vrot.lane.b32.xlu1 %v2149_v30, %s2935_s2 }
0x14e1   :  { %v2286_v13 = vpop.permute.xlu0 %2285  ;;  %v2142_v38 = vpop.permute.xlu1 %2141 }
0x14e2   :  { %v2288_v34 = vmul.f32 %v3571_v4, %v2286_v13  ;;  %v2144_v37 = vmul.f32 %v3567_v9, %v2142_v38 }
0x14e4   :  { %2290 = vrot.lane.b32.xlu0 %v2288_v34, %s2935_s2  ;;  %2163 = vperm.xlu1 %2803, %v3074_v43  }
0x14e5   :  { %v2281_v44 = vpop.permute.xlu0 %2280 }
0x14e6   :  { %v2283_v52 = vmul.f32 %v3571_v4, %v2281_v44 }
0x14e8   :  { %2302 = vperm.xlu0 %2802, %v3068_v41   ;;  %2166 = vrot.lane.b32.xlu1 %v2057_v50, %s2937_s4  ;;  %v2314_v50 = vld [vmem:[#allocation5] sm:$0x3] }
0x14ec   :  { %2177 = vrot.lane.b32.xlu0 %v2175_v35, %s2935_s2 }
0x1552   :  { %v2152_v49 = vpop.permute.xlu1 %2151 }
0x1553   :  { %v2154_v39 = vadd.f32 %v2152_v49, %v2144_v37 }
0x1555   :  { %2928 = vtanh.f32 %v2154_v39 }
0x1556   :  { %v2291_v53 = vpop.permute.xlu0 %2290 }
0x1557   :  { %v3581_v56 = vadd.f32 %v2291_v53, %v2283_v52 }
0x1559   :  { %2930 = vtanh.f32 %v3581_v56 }
0x155f   :  { %v2929_v41 = vpop.eup %2928 }
0x1560   :  { %2157 = vrot.lane.b32.xlu1 %v2929_v41, %s2935_s2 }
0x1563   :  { %v2931_v43 = vpop.eup %2930  ;;  %v2164_v26 = vpop.permute.xlu1 %2163 }
0x1564   :  { %2296 = vrot.lane.b32.xlu0 %v2931_v43, %s2935_s2  ;;  %2305 = vrot.lane.b32.xlu1 %v2196_v51, %s2937_s4  ;;  %vm2165_vm2 = vcmp.eq.s32.totalorder %v2164_v26, 1 }
0x1567   :  { %v2303_v18 = vpop.permute.xlu0 %2302  ;;  %v2167_v36 = vpop.permute.xlu1 %2166 }
0x1568   :  { %2316 = vrot.lane.b32.xlu0 %v2314_v50, %s2935_s2  ;;  %213 = vrot.lane.b32.xlu1 %v211_v1, %s2937_s4  ;;  %vm2304_vm5 = vcmp.eq.s32.totalorder %v2303_v18, 1 }
0x156b   :  { %v2178_v42 = vpop.permute.xlu0 %2177 }
0x156c   :  { %355 = vrot.lane.b32.xlu0 %v353_v3, %s2937_s4  ;;  %496 = vrot.lane.b32.xlu1 %v494_v6, %s2937_s4  ;;  %v2180_v46 = vsel %vm2165_vm2, %v2154_v39, %v2178_v42 }
0x1570   :  { %637 = vrot.lane.b32.xlu0 %v635_v55, %s2937_s4  ;;  %778 = vrot.lane.b32.xlu1 %v776_v57, %s2937_s4 }
0x1574   :  { %919 = vrot.lane.b32.xlu0 %v917_v61, %s2937_s4  ;;  %1060 = vrot.lane.b32.xlu1 %v1058_v54, %s2937_s4 }
0x1578   :  { %1201 = vrot.lane.b32.xlu0 %v1199_v62, %s2937_s4  ;;  %1342 = vrot.lane.b32.xlu1 %v1340_v63, %s2937_s4 }
0x157c   :  { %1483 = vrot.lane.b32.xlu0 %v1481_v2, %s2937_s4  ;;  %1624 = vrot.lane.b32.xlu1 %v1622_v8, %s2937_s4 }
0x1580   :  { %1765 = vrot.lane.b32.xlu0 %v1763_v19, %s2937_s4  ;;  %1906 = vrot.lane.b32.xlu1 %v1904_v22, %s2937_s4 }
0x1584   :  { %2047 = vrot.lane.b32.xlu0 %v2045_v21, %s2937_s4 }
0x1588   :  { %2182 = vrot.lane.b32.xlu0 %v2180_v46, %s2938_s18 }
0x15d2   :  { %v2158_v27 = vpop.permute.xlu1 %2157 }
0x15d3   :  { %v2160_v28 = vmul.f32 %v3567_v9, %v2158_v27 }
0x15d5   :  { %v2169_v24 = vsel %vm2165_vm2, %v2160_v28, %v2167_v36  ;;  %v2186_v59 = vsel %vm2165_vm2, %v2160_v28, 0.0 }
0x15d6   :  { %v2297_v7 = vpop.permute.xlu0 %2296  ;;  %2171 = vrot.lane.b32.xlu1 %v2169_v24, %s2937_s4  ;;  %v2306_v58 = vpop.permute.xlu1 %2305 }
0x15d7   :  { %v2299_v60 = vmul.f32 %v3571_v4, %v2297_v7 }
0x15d9   :  { %v2308_v40 = vsel %vm2304_vm5, %v2299_v60, %v2306_v58  ;;  %v2325_v12 = vsel %vm2304_vm5, %v2299_v60, 0.0 }
0x15da   :  { %v2317_v45 = vpop.permute.xlu0 %2316  ;;  %2188 = vrot.lane.b32.xlu1 %v2186_v59, %s2937_s4  ;;  %2310 = vrot.lane.b32.xlu0 %v2308_v40, %s2937_s4  ;;  %v214_v47 = vpop.permute.xlu1 %213 }
0x15db   :  { %216 = vst.msk [vmem:[%s3726_s5] sm:$0x3] %vm62_vm0, %v214_v47  ;;  %v2319_v29 = vsel %vm2304_vm5, %v3581_v56, %v2317_v45 }
0x15de   :  { %v356_v51 = vpop.permute.xlu0 %355  ;;  %2321 = vrot.lane.b32.xlu1 %v2319_v29, %s2938_s18  ;;  %2327 = vrot.lane.b32.xlu0 %v2325_v12, %s2937_s4  ;;  %v497_v48 = vpop.permute.xlu1 %496 }
0x15df   :  { %2374 = vst.msk [vmem:[%s3727_s6 + $0xe] sm:$0x3] %vm62_vm0, %v356_v51  ;;  %2379 = vst.msk [vmem:[%s3726_s5 + $0x2] sm:$0x3] %vm62_vm0, %v497_v48 }
0x15e2   :  { %v638_v10 = vpop.permute.xlu0 %637  ;;  %v779_v14 = vpop.permute.xlu1 %778 }
0x15e3   :  { %2384 = vst.msk [vmem:[%s3727_s6 + $0xc] sm:$0x3] %vm62_vm0, %v638_v10  ;;  %2389 = vst.msk [vmem:[%s3726_s5 + $0x4] sm:$0x3] %vm62_vm0, %v779_v14 }
0x15e6   :  { %v920_v15 = vpop.permute.xlu0 %919  ;;  %v1061_v16 = vpop.permute.xlu1 %1060 }
0x15e7   :  { %2394 = vst.msk [vmem:[%s3727_s6 + $0xa] sm:$0x3] %vm62_vm0, %v920_v15  ;;  %2399 = vst.msk [vmem:[%s3726_s5 + $0x6] sm:$0x3] %vm62_vm0, %v1061_v16 }
0x15ea   :  { %v1202_v17 = vpop.permute.xlu0 %1201  ;;  %v1343_v20 = vpop.permute.xlu1 %1342 }
0x15eb   :  { %2404 = vst.msk [vmem:[%s3727_s6 + $0x8] sm:$0x3] %vm62_vm0, %v1202_v17  ;;  %2409 = vst.msk [vmem:[%s3726_s5 + $0x8] sm:$0x3] %vm62_vm0, %v1343_v20 }
0x15ee   :  { %v1484_v25 = vpop.permute.xlu0 %1483  ;;  %v1625_v23 = vpop.permute.xlu1 %1624 }
0x15ef   :  { %2414 = vst.msk [vmem:[%s3727_s6 + $0x6] sm:$0x3] %vm62_vm0, %v1484_v25  ;;  %2419 = vst.msk [vmem:[%s3726_s5 + $0xa] sm:$0x3] %vm62_vm0, %v1625_v23 }
0x15f2   :  { %v1766_v11 = vpop.permute.xlu0 %1765  ;;  %v1907_v5 = vpop.permute.xlu1 %1906 }
0x15f3   :  { %2424 = vst.msk [vmem:[%s3727_s6 + $0x4] sm:$0x3] %vm62_vm0, %v1766_v11  ;;  %2429 = vst.msk [vmem:[%s3726_s5 + $0xc] sm:$0x3] %vm62_vm0, %v1907_v5 }
0x15f6   :  { %v2048_v31 = vpop.permute.xlu0 %2047 }
0x15f7   :  { %2434 = vst.msk [vmem:[%s3727_s6 + $0x2] sm:$0x3] %vm62_vm0, %v2048_v31 }
0x15fa   :  { %v2183_v32 = vpop.permute.xlu0 %2182 }
0x15fb   :  { %2185 = vst.msk [vmem:[#allocation3] sm:$0x3] %vm62_vm0, %v2183_v32 }
0x1648   :  { %v2172_v33 = vpop.permute.xlu1 %2171 }
0x1649   :  { %2174 = vst.msk [vmem:[#allocation2] sm:$0x3] %vm62_vm0, %v2172_v33 }
0x164c   :  { %v2311_v9 = vpop.permute.xlu0 %2310  ;;  %v2189_v0 = vpop.permute.xlu1 %2188 }
0x164d   :  { %2313 = vst.msk [vmem:[#allocation4] sm:$0x3] %vm62_vm0, %v2311_v9  ;;  %2439 = vst.msk [vmem:[%s3726_s5 + $0xe] sm:$0x3] %vm62_vm0, %v2189_v0 }
0x1650   :  { %v2328_v30 = vpop.permute.xlu0 %2327  ;;  %v2322_v4 = vpop.permute.xlu1 %2321 }
0x1651   :  { %2330 = vst.msk [vmem:[%s3727_s6] sm:$0x3] %vm62_vm0, %v2328_v30  ;;  %2324 = vst.msk [vmem:[#allocation5] sm:$0x3] %vm62_vm0, %v2322_v4 }

</bundles_post_ra>
